<compile_context>
chip_gen: v5e
topology: v5e:2x2
jax: 0.10.0
libtpu: 0.0.40
codegen_flags: <defaults>
</compile_context>

<pallas_src>
import jax
import jax.numpy as jnp
import numpy as np
from jax.experimental import pallas as pl
from jax.experimental.pallas import tpu as pltpu


_BRICK = 16                 # rows per group: one packed bf16 sublane tile / two f32 tiles
_VMEM_BUDGET = 24 << 20     # keep the single-tile footprint well under the 32 MiB default
                            # scoped VMEM limit (and v7x's 64 MiB physical VMEM)


# ---------------------------------------------------------------------------
# In-kernel circulant construction:  r_ref[j, i] <- x[(i + j) % d]
# ---------------------------------------------------------------------------
def _emit_circulant(x_row, r_ref, d, masks, out_dtype):
    """x_row: (1, d) f32 value; r_ref: (d, d) VMEM ref (out_dtype); masks: 4 precomputed
    (_BRICK, d) bool masks with masks[p][r, :] = bit p of sublane index r."""
    # 16-row brick: row r = x rolled LEFT by r, via binary decomposition of r
    # (4 rolls + 4 selects instead of a long per-row select chain).
    cur = jnp.broadcast_to(x_row, (_BRICK, d))
    for p, mask in enumerate(masks):
        amt = 1 << p
        cur = jnp.where(mask, pltpu.roll(cur, shift=d - amt, axis=1), cur)
    r_ref[pl.ds(0, _BRICK), :] = cur.astype(out_dtype)
    # Every other 16-row group is the brick rolled left by its row offset.  All rolls
    # depend only on `cur` (depth 1), so the XLU work overlaps with stores / matmul.
    for m in range(_BRICK, d, _BRICK):
        r_ref[pl.ds(m, _BRICK), :] = pltpu.roll(cur, shift=d - m, axis=1).astype(out_dtype)


# ---------------------------------------------------------------------------
# Fused single-tile kernel: one (d, d) output per sample, TB samples per grid step.
# ---------------------------------------------------------------------------
def _make_fused_kernel(d, tb, work_dtype):
    def kernel(x_ref, o_ref, r_ref):
        # x_ref: (tb, 1, d) f32 | o_ref: (tb, d, d) f32 | r_ref: (d, d) work_dtype
        sub = jax.lax.broadcasted_iota(jnp.int32, (_BRICK, d), 0)
        masks = [(sub & (1 << p)) != 0 for p in range(4)]      # hoisted out of the tb loop
        for t in range(tb):                                    # static unroll, scratch reused
            x_row = x_ref[t]                                   # (1, d) f32
            _emit_circulant(x_row, r_ref, d, masks, work_dtype)
            R = r_ref[...]                                     # (d, d) work_dtype
            rolls_mult = x_row.astype(work_dtype) * R          # broadcast over rows
            o_ref[t] = jnp.dot(rolls_mult, R, preferred_element_type=jnp.float32)
    return kernel


def _pick_tb(bk, d, r_bytes):
    """Largest samples-per-step in {4,3,2} dividing bk that fits VMEM and still leaves
    >= 2 grid steps for v7x's two TensorCores; otherwise 1."""
    for cand in (4, 3, 2):
        footprint = 2 * cand * d * d * 4 + d * d * r_bytes + 2 * cand * d * 4
        if bk % cand == 0 and bk // cand >= 2 and footprint <= _VMEM_BUDGET:
            return cand
    return 1


def _tc_fused_single(x_flat, bk, d, mxu_dtype):
    work_dtype = jnp.bfloat16 if mxu_dtype == jnp.bfloat16 else jnp.float32
    r_bytes = jnp.dtype(work_dtype).itemsize
    tb = _pick_tb(bk, d, r_bytes)
    x_in = x_flat.reshape(bk, 1, d)

    footprint = 2 * tb * d * d * 4 + d * d * r_bytes + 2 * tb * d * 4
    vmem_limit = int(min(max(footprint + (4 << 20), 16 << 20), 64 << 20))

    return pl.pallas_call(
        _make_fused_kernel(d, tb, work_dtype),
        out_shape=jax.ShapeDtypeStruct((bk, d, d), jnp.float32),
        grid_spec=pltpu.PrefetchScalarGridSpec(
            num_scalar_prefetch=0,
            grid=(bk // tb,),
            in_specs=[pl.BlockSpec((tb, 1, d), lambda m: (m, 0, 0))],
            out_specs=pl.BlockSpec((tb, d, d), lambda m: (m, 0, 0)),
            scratch_shapes=[pltpu.VMEM((d, d), work_dtype)],
        ),
        compiler_params=pltpu.CompilerParams(
            dimension_semantics=("parallel",),
            vmem_limit_bytes=vmem_limit,
        ),
        cost_estimate=pl.CostEstimate(
            flops=2 * bk * d * d * d + bk * d * d,
            transcendentals=0,
            bytes_accessed=bk * d * 4 + bk * d * d * 4,
        ),
    )(x_in)


# ---------------------------------------------------------------------------
# Output-row-tiled fused kernel: grid=(bk, d // tj), R built once per sample.
# Used for large d (bounded VMEM) or when row_block is forced (testing).
# ---------------------------------------------------------------------------
def _make_row_tiled_kernel(d, tj, work_dtype):
    def kernel(x_ref, o_ref, r_ref):
        # x_ref: (1, 1, d) f32 | o_ref: (1, tj, d) f32 | r_ref: (d, d) persistent scratch
        x_row = x_ref[0]                                       # (1, d) f32

        @pl.when(pl.program_id(1) == 0)                        # build R once per sample
        def _():
            sub = jax.lax.broadcasted_iota(jnp.int32, (_BRICK, d), 0)
            masks = [(sub & (1 << p)) != 0 for p in range(4)]
            _emit_circulant(x_row, r_ref, d, masks, work_dtype)

        start = pl.multiple_of(pl.program_id(1) * tj, tj)
        rows = r_ref[pl.ds(start, tj), :]                      # R rows of this output block
        rolls_mult = x_row.astype(work_dtype) * rows           # (tj, d)
        # TODO(synk): for very large d (>= ~4096) also block the contraction (loop over
        # row blocks of R with an f32 accumulator) so the RHS is not one huge operand.
        o_ref[0] = jnp.dot(rolls_mult, r_ref[...], preferred_element_type=jnp.float32)
    return kernel


def _tc_fused_row_tiled(x_flat, bk, d, mxu_dtype, tj):
    work_dtype = jnp.bfloat16 if mxu_dtype == jnp.bfloat16 else jnp.float32
    r_bytes = jnp.dtype(work_dtype).itemsize
    x_in = x_flat.reshape(bk, 1, d)

    footprint = d * d * r_bytes + 2 * tj * d * 4 + 2 * d * 4
    vmem_limit = int(min(max(footprint + (4 << 20), 16 << 20), 64 << 20))

    return pl.pallas_call(
        _make_row_tiled_kernel(d, tj, work_dtype),
        out_shape=jax.ShapeDtypeStruct((bk, d, d), jnp.float32),
        grid_spec=pltpu.PrefetchScalarGridSpec(
            num_scalar_prefetch=0,
            grid=(bk, d // tj),
            in_specs=[pl.BlockSpec((1, 1, d), lambda m, j: (m, 0, 0))],
            out_specs=pl.BlockSpec((1, tj, d), lambda m, j: (m, j, 0)),
            scratch_shapes=[pltpu.VMEM((d, d), work_dtype)],
        ),
        compiler_params=pltpu.CompilerParams(
            dimension_semantics=("parallel", "arbitrary"),
            vmem_limit_bytes=vmem_limit,
        ),
        cost_estimate=pl.CostEstimate(
            flops=2 * bk * d * d * d + bk * d * d,
            transcendentals=0,
            bytes_accessed=bk * d * 4 + bk * d * d * 4,
        ),
    )(x_in)


# ---------------------------------------------------------------------------
# Tiny / irregular d fallback (d % 128 != 0, e.g. d = 16): bypass Pallas.
# ---------------------------------------------------------------------------
def _tc_xla(x_flat, bk, d):
    # Reviewer-endorsed: at d < 128 the MXU is heavily under-utilised and the output
    # would not be lane-dense, so a Pallas kernel only adds per-step overhead.
    # TODO(synk): mid-size d that is not a multiple of 128 could still get a padded
    # Pallas path; not needed for the module's typical spatial sizes.
    idx = (jnp.arange(d)[:, None] + jnp.arange(d)[None, :]) % d
    R = x_flat[:, idx]                                          # (bk, d, d)
    return jnp.einsum("mji,mil->mjl", x_flat[:, None, :] * R, R,
                      precision=jax.lax.Precision.HIGHEST)


# ---------------------------------------------------------------------------
# Public wrapper (TCGroupPoolingR2Spatial.forward)
# ---------------------------------------------------------------------------
def tc_group_pooling_r2_spatial(x, *, mxu_dtype=jnp.float32, row_block=None):
    """x: (b, k, n, n) -> (b, k, n*n, n*n) float32 triple correlation.

    mxu_dtype=jnp.float32 (default) keeps exact module semantics.
    mxu_dtype=jnp.bfloat16 is an explicit opt-in: R scratch, elementwise multiply and
    MXU operands in bf16 (f32 accumulation) — recommended on v6e/v7x, measure on v5e.
    row_block forces the output-row-tiled variant with that row tile (testing / large d).
    """
    if x.ndim != 4:
        # Explicit analogue of torch `.squeeze()`: only drop unit dims, require a 4-D
        # (b, k, n, n) core (plain squeeze silently breaks when b, k or n == 1).
        core = tuple(s for s in x.shape if s != 1)
        if len(core) != 4:
            raise ValueError(f"expected a (b, k, n, n)-shaped input, got {x.shape}")
        x = x.reshape(core)
    b, k, n, n2 = x.shape
    if n != n2:
        raise ValueError("expects square spatial dims")
    d = n * n
    bk = b * k
    x_flat = x.reshape(bk, d).astype(jnp.float32)

    if d % 128 == 0:
        r_bytes = 2 if mxu_dtype == jnp.bfloat16 else 4
        if row_block is not None:
            tj = int(row_block)
            if d % tj != 0 or tj % _BRICK != 0:
                raise ValueError("row_block must divide d and be a multiple of 16")
            out = _tc_fused_row_tiled(x_flat, bk, d, mxu_dtype, tj)
        elif 2 * d * d * 4 + d * d * r_bytes > _VMEM_BUDGET:
            tj = 256 if d % 256 == 0 else 128
            out = _tc_fused_row_tiled(x_flat, bk, d, mxu_dtype, tj)
        else:
            out = _tc_fused_single(x_flat, bk, d, mxu_dtype)
        return out.reshape(b, k, d, d)

    return _tc_xla(x_flat, bk, d).reshape(b, k, d, d)


# ---------------------------------------------------------------------------
# Pure-JAX reference mirroring the PyTorch code, for verification.
# ---------------------------------------------------------------------------
def _reference_tc(x):
    if x.ndim != 4:
        x = x.reshape(tuple(s for s in x.shape if s != 1))
    b, k, n, _ = x.shape
    d = n * n
    xf = x.reshape(b * k, d).astype(jnp.float32)
    jj = jnp.arange(d)[:, None]
    ii = jnp.arange(d)[None, :]
    R = xf[:, (jj + ii) % d]                                    # (bk, d, d)
    rm = xf[:, None, :] * R
    TC = jnp.einsum("mji,mil->mjl", rm, R, precision=jax.lax.Precision.HIGHEST)
    return TC.reshape(b, k, d, d)


if __name__ == "__main__":
    # Primary size (n=16 -> d=256, lane-dense): fused single-tile path, TB=4 batching.
    b, k, n = 2, 4, 16
    x = jax.random.normal(jax.random.PRNGKey(0), (b, k, n, n), dtype=jnp.float32)
    ref = jax.block_until_ready(_reference_tc(x))

    out = jax.block_until_ready(tc_group_pooling_r2_spatial(x))
    assert out.shape == (b, k, n * n, n * n)
    assert out.dtype == jnp.float32
    np.testing.assert_allclose(np.asarray(out), np.asarray(ref), rtol=2e-3, atol=1e-2)

    # Output-row-tiled variant (forced at small d to validate that code path).
    out_rt = jax.block_until_ready(tc_group_pooling_r2_spatial(x, row_block=128))
    np.testing.assert_allclose(np.asarray(out_rt), np.asarray(ref), rtol=2e-3, atol=1e-2)

    # bf16 opt-in (bf16 R scratch + bf16 multiply + bf16 MXU operands, f32 accumulate).
    out_bf16 = jax.block_until_ready(
        tc_group_pooling_r2_spatial(x, mxu_dtype=jnp.bfloat16))
    np.testing.assert_allclose(np.asarray(out_bf16), np.asarray(ref),
                               rtol=5e-2, atol=1.0)

    # Tiny size (n=4 -> d=16 < 128): reviewer-endorsed XLA bypass.
    x_small = jax.random.normal(jax.random.PRNGKey(1), (2, 4, 4, 4), dtype=jnp.float32)
    out_s = jax.block_until_ready(tc_group_pooling_r2_spatial(x_small))
    ref_s = jax.block_until_ready(_reference_tc(x_small))
    np.testing.assert_allclose(np.asarray(out_s), np.asarray(ref_s),
                               rtol=1e-4, atol=1e-4)

    print("KERNEL_OK")
</pallas_src>

<mosaic_0001>
module attributes {stable_mosaic.version = 11 : i64} {
  func.func @kernel(%arg0: i32, %arg1: memref<4x1x256xf32, #tpu.memory_space<vmem>>, %arg2: memref<4x256x256xf32, #tpu.memory_space<vmem>>, %arg3: memref<256x256xf32, #tpu.memory_space<vmem>>) attributes {dimension_semantics = [#tpu.dimension_semantics<parallel>], iteration_bounds = array<i64: 2>, scalar_prefetch = 0 : i64, scratch_operands = 1 : i64, tpu.core_type = #tpu.core_type<tc>, window_params = [{transform_indices = @transform_0, window_bounds = array<i64: 4, 1, 256>}, {transform_indices = @transform_1, window_bounds = array<i64: 4, 256, 256>}]} {
    %0 = tpu.iota {dimensions = array<i32: 0>} : vector<16x256xi32>
    %c1_i32 = arith.constant 1 : i32
    %1 = vector.broadcast %c1_i32 : i32 to vector<16x256xi32>
    %2 = arith.andi %0, %1 : vector<16x256xi32>
    %c0_i32 = arith.constant 0 : i32
    %3 = vector.broadcast %c0_i32 : i32 to vector<16x256xi32>
    %4 = arith.cmpi ne, %2, %3 : vector<16x256xi32>
    %c2_i32 = arith.constant 2 : i32
    %5 = vector.broadcast %c2_i32 : i32 to vector<16x256xi32>
    %6 = arith.andi %0, %5 : vector<16x256xi32>
    %c0_i32_0 = arith.constant 0 : i32
    %7 = vector.broadcast %c0_i32_0 : i32 to vector<16x256xi32>
    %8 = arith.cmpi ne, %6, %7 : vector<16x256xi32>
    %c4_i32 = arith.constant 4 : i32
    %9 = vector.broadcast %c4_i32 : i32 to vector<16x256xi32>
    %10 = arith.andi %0, %9 : vector<16x256xi32>
    %c0_i32_1 = arith.constant 0 : i32
    %11 = vector.broadcast %c0_i32_1 : i32 to vector<16x256xi32>
    %12 = arith.cmpi ne, %10, %11 : vector<16x256xi32>
    %c8_i32 = arith.constant 8 : i32
    %13 = vector.broadcast %c8_i32 : i32 to vector<16x256xi32>
    %14 = arith.andi %0, %13 : vector<16x256xi32>
    %c0_i32_2 = arith.constant 0 : i32
    %15 = vector.broadcast %c0_i32_2 : i32 to vector<16x256xi32>
    %16 = arith.cmpi ne, %14, %15 : vector<16x256xi32>
    %c0 = arith.constant 0 : index
    %c0_3 = arith.constant 0 : index
    %c0_4 = arith.constant 0 : index
    %17 = vector.load %arg1[%c0, %c0_3, %c0_4] : memref<4x1x256xf32, #tpu.memory_space<vmem>>, vector<1x1x256xf32>
    %18 = vector.shape_cast %17 : vector<1x1x256xf32> to vector<1x256xf32>
    %19 = vector.shape_cast %18 : vector<1x256xf32> to vector<1x256xf32>
    %20 = vector.broadcast %19 : vector<1x256xf32> to vector<16x256xf32>
    %c255_i32 = arith.constant 255 : i32
    %21 = tpu.dynamic_rotate %20 by %c255_i32 dim 1 : vector<16x256xf32>, i32 -> vector<16x256xf32>
    %22 = arith.select %4, %21, %20 : vector<16x256xi1>, vector<16x256xf32>
    %c254_i32 = arith.constant 254 : i32
    %23 = tpu.dynamic_rotate %22 by %c254_i32 dim 1 : vector<16x256xf32>, i32 -> vector<16x256xf32>
    %24 = arith.select %8, %23, %22 : vector<16x256xi1>, vector<16x256xf32>
    %c252_i32 = arith.constant 252 : i32
    %25 = tpu.dynamic_rotate %24 by %c252_i32 dim 1 : vector<16x256xf32>, i32 -> vector<16x256xf32>
    %26 = arith.select %12, %25, %24 : vector<16x256xi1>, vector<16x256xf32>
    %c248_i32 = arith.constant 248 : i32
    %27 = tpu.dynamic_rotate %26 by %c248_i32 dim 1 : vector<16x256xf32>, i32 -> vector<16x256xf32>
    %28 = arith.select %16, %27, %26 : vector<16x256xi1>, vector<16x256xf32>
    %c0_5 = arith.constant 0 : index
    %c0_6 = arith.constant 0 : index
    %29 = vector.load %arg3[%c0_5, %c0_6] : memref<256x256xf32, #tpu.memory_space<vmem>>, vector<16x256xf32>
    tpu.vector_store %arg3[%c0_5, %c0_6], %28 {strides = array<i32>} : memref<256x256xf32, #tpu.memory_space<vmem>>, vector<16x256xf32>,
    %c240_i32 = arith.constant 240 : i32
    %30 = tpu.dynamic_rotate %28 by %c240_i32 dim 1 : vector<16x256xf32>, i32 -> vector<16x256xf32>
    %c16 = arith.constant 16 : index
    %c0_7 = arith.constant 0 : index
    %31 = vector.load %arg3[%c16, %c0_7] : memref<256x256xf32, #tpu.memory_space<vmem>>, vector<16x256xf32>
    tpu.vector_store %arg3[%c16, %c0_7], %30 {strides = array<i32>} : memref<256x256xf32, #tpu.memory_space<vmem>>, vector<16x256xf32>,
    %c224_i32 = arith.constant 224 : i32
    %32 = tpu.dynamic_rotate %28 by %c224_i32 dim 1 : vector<16x256xf32>, i32 -> vector<16x256xf32>
    %c32 = arith.constant 32 : index
    %c0_8 = arith.constant 0 : index
    %33 = vector.load %arg3[%c32, %c0_8] : memref<256x256xf32, #tpu.memory_space<vmem>>, vector<16x256xf32>
    tpu.vector_store %arg3[%c32, %c0_8], %32 {strides = array<i32>} : memref<256x256xf32, #tpu.memory_space<vmem>>, vector<16x256xf32>,
    %c208_i32 = arith.constant 208 : i32
    %34 = tpu.dynamic_rotate %28 by %c208_i32 dim 1 : vector<16x256xf32>, i32 -> vector<16x256xf32>
    %c48 = arith.constant 48 : index
    %c0_9 = arith.constant 0 : index
    %35 = vector.load %arg3[%c48, %c0_9] : memref<256x256xf32, #tpu.memory_space<vmem>>, vector<16x256xf32>
    tpu.vector_store %arg3[%c48, %c0_9], %34 {strides = array<i32>} : memref<256x256xf32, #tpu.memory_space<vmem>>, vector<16x256xf32>,
    %c192_i32 = arith.constant 192 : i32
    %36 = tpu.dynamic_rotate %28 by %c192_i32 dim 1 : vector<16x256xf32>, i32 -> vector<16x256xf32>
    %c64 = arith.constant 64 : index
    %c0_10 = arith.constant 0 : index
    %37 = vector.load %arg3[%c64, %c0_10] : memref<256x256xf32, #tpu.memory_space<vmem>>, vector<16x256xf32>
    tpu.vector_store %arg3[%c64, %c0_10], %36 {strides = array<i32>} : memref<256x256xf32, #tpu.memory_space<vmem>>, vector<16x256xf32>,
    %c176_i32 = arith.constant 176 : i32
    %38 = tpu.dynamic_rotate %28 by %c176_i32 dim 1 : vector<16x256xf32>, i32 -> vector<16x256xf32>
    %c80 = arith.constant 80 : index
    %c0_11 = arith.constant 0 : index
    %39 = vector.load %arg3[%c80, %c0_11] : memref<256x256xf32, #tpu.memory_space<vmem>>, vector<16x256xf32>
    tpu.vector_store %arg3[%c80, %c0_11], %38 {strides = array<i32>} : memref<256x256xf32, #tpu.memory_space<vmem>>, vector<16x256xf32>,
    %c160_i32 = arith.constant 160 : i32
    %40 = tpu.dynamic_rotate %28 by %c160_i32 dim 1 : vector<16x256xf32>, i32 -> vector<16x256xf32>
    %c96 = arith.constant 96 : index
    %c0_12 = arith.constant 0 : index
    %41 = vector.load %arg3[%c96, %c0_12] : memref<256x256xf32, #tpu.memory_space<vmem>>, vector<16x256xf32>
    tpu.vector_store %arg3[%c96, %c0_12], %40 {strides = array<i32>} : memref<256x256xf32, #tpu.memory_space<vmem>>, vector<16x256xf32>,
    %c144_i32 = arith.constant 144 : i32
    %42 = tpu.dynamic_rotate %28 by %c144_i32 dim 1 : vector<16x256xf32>, i32 -> vector<16x256xf32>
    %c112 = arith.constant 112 : index
    %c0_13 = arith.constant 0 : index
    %43 = vector.load %arg3[%c112, %c0_13] : memref<256x256xf32, #tpu.memory_space<vmem>>, vector<16x256xf32>
    tpu.vector_store %arg3[%c112, %c0_13], %42 {strides = array<i32>} : memref<256x256xf32, #tpu.memory_space<vmem>>, vector<16x256xf32>,
    %c128_i32 = arith.constant 128 : i32
    %44 = tpu.dynamic_rotate %28 by %c128_i32 dim 1 : vector<16x256xf32>, i32 -> vector<16x256xf32>
    %c128 = arith.constant 128 : index
    %c0_14 = arith.constant 0 : index
    %45 = vector.load %arg3[%c128, %c0_14] : memref<256x256xf32, #tpu.memory_space<vmem>>, vector<16x256xf32>
    tpu.vector_store %arg3[%c128, %c0_14], %44 {strides = array<i32>} : memref<256x256xf32, #tpu.memory_space<vmem>>, vector<16x256xf32>,
    %c112_i32 = arith.constant 112 : i32
    %46 = tpu.dynamic_rotate %28 by %c112_i32 dim 1 : vector<16x256xf32>, i32 -> vector<16x256xf32>
    %c144 = arith.constant 144 : index
    %c0_15 = arith.constant 0 : index
    %47 = vector.load %arg3[%c144, %c0_15] : memref<256x256xf32, #tpu.memory_space<vmem>>, vector<16x256xf32>
    tpu.vector_store %arg3[%c144, %c0_15], %46 {strides = array<i32>} : memref<256x256xf32, #tpu.memory_space<vmem>>, vector<16x256xf32>,
    %c96_i32 = arith.constant 96 : i32
    %48 = tpu.dynamic_rotate %28 by %c96_i32 dim 1 : vector<16x256xf32>, i32 -> vector<16x256xf32>
    %c160 = arith.constant 160 : index
    %c0_16 = arith.constant 0 : index
    %49 = vector.load %arg3[%c160, %c0_16] : memref<256x256xf32, #tpu.memory_space<vmem>>, vector<16x256xf32>
    tpu.vector_store %arg3[%c160, %c0_16], %48 {strides = array<i32>} : memref<256x256xf32, #tpu.memory_space<vmem>>, vector<16x256xf32>,
    %c80_i32 = arith.constant 80 : i32
    %50 = tpu.dynamic_rotate %28 by %c80_i32 dim 1 : vector<16x256xf32>, i32 -> vector<16x256xf32>
    %c176 = arith.constant 176 : index
    %c0_17 = arith.constant 0 : index
    %51 = vector.load %arg3[%c176, %c0_17] : memref<256x256xf32, #tpu.memory_space<vmem>>, vector<16x256xf32>
    tpu.vector_store %arg3[%c176, %c0_17], %50 {strides = array<i32>} : memref<256x256xf32, #tpu.memory_space<vmem>>, vector<16x256xf32>,
    %c64_i32 = arith.constant 64 : i32
    %52 = tpu.dynamic_rotate %28 by %c64_i32 dim 1 : vector<16x256xf32>, i32 -> vector<16x256xf32>
    %c192 = arith.constant 192 : index
    %c0_18 = arith.constant 0 : index
    %53 = vector.load %arg3[%c192, %c0_18] : memref<256x256xf32, #tpu.memory_space<vmem>>, vector<16x256xf32>
    tpu.vector_store %arg3[%c192, %c0_18], %52 {strides = array<i32>} : memref<256x256xf32, #tpu.memory_space<vmem>>, vector<16x256xf32>,
    %c48_i32 = arith.constant 48 : i32
    %54 = tpu.dynamic_rotate %28 by %c48_i32 dim 1 : vector<16x256xf32>, i32 -> vector<16x256xf32>
    %c208 = arith.constant 208 : index
    %c0_19 = arith.constant 0 : index
    %55 = vector.load %arg3[%c208, %c0_19] : memref<256x256xf32, #tpu.memory_space<vmem>>, vector<16x256xf32>
    tpu.vector_store %arg3[%c208, %c0_19], %54 {strides = array<i32>} : memref<256x256xf32, #tpu.memory_space<vmem>>, vector<16x256xf32>,
    %c32_i32 = arith.constant 32 : i32
    %56 = tpu.dynamic_rotate %28 by %c32_i32 dim 1 : vector<16x256xf32>, i32 -> vector<16x256xf32>
    %c224 = arith.constant 224 : index
    %c0_20 = arith.constant 0 : index
    %57 = vector.load %arg3[%c224, %c0_20] : memref<256x256xf32, #tpu.memory_space<vmem>>, vector<16x256xf32>
    tpu.vector_store %arg3[%c224, %c0_20], %56 {strides = array<i32>} : memref<256x256xf32, #tpu.memory_space<vmem>>, vector<16x256xf32>,
    %c16_i32 = arith.constant 16 : i32
    %58 = tpu.dynamic_rotate %28 by %c16_i32 dim 1 : vector<16x256xf32>, i32 -> vector<16x256xf32>
    %c240 = arith.constant 240 : index
    %c0_21 = arith.constant 0 : index
    %59 = vector.load %arg3[%c240, %c0_21] : memref<256x256xf32, #tpu.memory_space<vmem>>, vector<16x256xf32>
    tpu.vector_store %arg3[%c240, %c0_21], %58 {strides = array<i32>} : memref<256x256xf32, #tpu.memory_space<vmem>>, vector<16x256xf32>,
    %c0_22 = arith.constant 0 : index
    %c0_23 = arith.constant 0 : index
    %60 = vector.load %arg3[%c0_22, %c0_23] : memref<256x256xf32, #tpu.memory_space<vmem>>, vector<256x256xf32>
    %61 = vector.broadcast %18 : vector<1x256xf32> to vector<256x256xf32>
    %62 = arith.mulf %61, %60 : vector<256x256xf32>
    %cst = arith.constant dense<0.000000e+00> : vector<256x256xf32>
    %63 = tpu.matmul %62, %60, %cst {dimension_numbers = #tpu.dot_dimension_numbers<[1], [0], [0], [1], [0, 0, 1, 1], [], []>} : vector<256x256xf32>, vector<256x256xf32>, vector<256x256xf32> -> vector<256x256xf32>
    %c0_24 = arith.constant 0 : index
    %c0_25 = arith.constant 0 : index
    %c0_26 = arith.constant 0 : index
    %64 = vector.load %arg2[%c0_24, %c0_25, %c0_26] : memref<4x256x256xf32, #tpu.memory_space<vmem>>, vector<1x256x256xf32>
    %65 = vector.shape_cast %64 : vector<1x256x256xf32> to vector<256x256xf32>
    %66 = vector.shape_cast %63 : vector<256x256xf32> to vector<1x256x256xf32>
    tpu.vector_store %arg2[%c0_24, %c0_25, %c0_26], %66 {strides = array<i32>} : memref<4x256x256xf32, #tpu.memory_space<vmem>>, vector<1x256x256xf32>,
    %c1 = arith.constant 1 : index
    %c0_27 = arith.constant 0 : index
    %c0_28 = arith.constant 0 : index
    %67 = vector.load %arg1[%c1, %c0_27, %c0_28] : memref<4x1x256xf32, #tpu.memory_space<vmem>>, vector<1x1x256xf32>
    %68 = vector.shape_cast %67 : vector<1x1x256xf32> to vector<1x256xf32>
    %69 = vector.shape_cast %68 : vector<1x256xf32> to vector<1x256xf32>
    %70 = vector.broadcast %69 : vector<1x256xf32> to vector<16x256xf32>
    %c255_i32_29 = arith.constant 255 : i32
    %71 = tpu.dynamic_rotate %70 by %c255_i32_29 dim 1 : vector<16x256xf32>, i32 -> vector<16x256xf32>
    %72 = arith.select %4, %71, %70 : vector<16x256xi1>, vector<16x256xf32>
    %c254_i32_30 = arith.constant 254 : i32
    %73 = tpu.dynamic_rotate %72 by %c254_i32_30 dim 1 : vector<16x256xf32>, i32 -> vector<16x256xf32>
    %74 = arith.select %8, %73, %72 : vector<16x256xi1>, vector<16x256xf32>
    %c252_i32_31 = arith.constant 252 : i32
    %75 = tpu.dynamic_rotate %74 by %c252_i32_31 dim 1 : vector<16x256xf32>, i32 -> vector<16x256xf32>
    %76 = arith.select %12, %75, %74 : vector<16x256xi1>, vector<16x256xf32>
    %c248_i32_32 = arith.constant 248 : i32
    %77 = tpu.dynamic_rotate %76 by %c248_i32_32 dim 1 : vector<16x256xf32>, i32 -> vector<16x256xf32>
    %78 = arith.select %16, %77, %76 : vector<16x256xi1>, vector<16x256xf32>
    %c0_33 = arith.constant 0 : index
    %c0_34 = arith.constant 0 : index
    %79 = vector.load %arg3[%c0_33, %c0_34] : memref<256x256xf32, #tpu.memory_space<vmem>>, vector<16x256xf32>
    tpu.vector_store %arg3[%c0_33, %c0_34], %78 {strides = array<i32>} : memref<256x256xf32, #tpu.memory_space<vmem>>, vector<16x256xf32>,
    %c240_i32_35 = arith.constant 240 : i32
    %80 = tpu.dynamic_rotate %78 by %c240_i32_35 dim 1 : vector<16x256xf32>, i32 -> vector<16x256xf32>
    %c16_36 = arith.constant 16 : index
    %c0_37 = arith.constant 0 : index
    %81 = vector.load %arg3[%c16_36, %c0_37] : memref<256x256xf32, #tpu.memory_space<vmem>>, vector<16x256xf32>
    tpu.vector_store %arg3[%c16_36, %c0_37], %80 {strides = array<i32>} : memref<256x256xf32, #tpu.memory_space<vmem>>, vector<16x256xf32>,
    %c224_i32_38 = arith.constant 224 : i32
    %82 = tpu.dynamic_rotate %78 by %c224_i32_38 dim 1 : vector<16x256xf32>, i32 -> vector<16x256xf32>
    %c32_39 = arith.constant 32 : index
    %c0_40 = arith.constant 0 : index
    %83 = vector.load %arg3[%c32_39, %c0_40] : memref<256x256xf32, #tpu.memory_space<vmem>>, vector<16x256xf32>
    tpu.vector_store %arg3[%c32_39, %c0_40], %82 {strides = array<i32>} : memref<256x256xf32, #tpu.memory_space<vmem>>, vector<16x256xf32>,
    %c208_i32_41 = arith.constant 208 : i32
    %84 = tpu.dynamic_rotate %78 by %c208_i32_41 dim 1 : vector<16x256xf32>, i32 -> vector<16x256xf32>
    %c48_42 = arith.constant 48 : index
    %c0_43 = arith.constant 0 : index
    %85 = vector.load %arg3[%c48_42, %c0_43] : memref<256x256xf32, #tpu.memory_space<vmem>>, vector<16x256xf32>
    tpu.vector_store %arg3[%c48_42, %c0_43], %84 {strides = array<i32>} : memref<256x256xf32, #tpu.memory_space<vmem>>, vector<16x256xf32>,
    %c192_i32_44 = arith.constant 192 : i32
    %86 = tpu.dynamic_rotate %78 by %c192_i32_44 dim 1 : vector<16x256xf32>, i32 -> vector<16x256xf32>
    %c64_45 = arith.constant 64 : index
    %c0_46 = arith.constant 0 : index
    %87 = vector.load %arg3[%c64_45, %c0_46] : memref<256x256xf32, #tpu.memory_space<vmem>>, vector<16x256xf32>
    tpu.vector_store %arg3[%c64_45, %c0_46], %86 {strides = array<i32>} : memref<256x256xf32, #tpu.memory_space<vmem>>, vector<16x256xf32>,
    %c176_i32_47 = arith.constant 176 : i32
    %88 = tpu.dynamic_rotate %78 by %c176_i32_47 dim 1 : vector<16x256xf32>, i32 -> vector<16x256xf32>
    %c80_48 = arith.constant 80 : index
    %c0_49 = arith.constant 0 : index
    %89 = vector.load %arg3[%c80_48, %c0_49] : memref<256x256xf32, #tpu.memory_space<vmem>>, vector<16x256xf32>
    tpu.vector_store %arg3[%c80_48, %c0_49], %88 {strides = array<i32>} : memref<256x256xf32, #tpu.memory_space<vmem>>, vector<16x256xf32>,
    %c160_i32_50 = arith.constant 160 : i32
    %90 = tpu.dynamic_rotate %78 by %c160_i32_50 dim 1 : vector<16x256xf32>, i32 -> vector<16x256xf32>
    %c96_51 = arith.constant 96 : index
    %c0_52 = arith.constant 0 : index
    %91 = vector.load %arg3[%c96_51, %c0_52] : memref<256x256xf32, #tpu.memory_space<vmem>>, vector<16x256xf32>
    tpu.vector_store %arg3[%c96_51, %c0_52], %90 {strides = array<i32>} : memref<256x256xf32, #tpu.memory_space<vmem>>, vector<16x256xf32>,
    %c144_i32_53 = arith.constant 144 : i32
    %92 = tpu.dynamic_rotate %78 by %c144_i32_53 dim 1 : vector<16x256xf32>, i32 -> vector<16x256xf32>
    %c112_54 = arith.constant 112 : index
    %c0_55 = arith.constant 0 : index
    %93 = vector.load %arg3[%c112_54, %c0_55] : memref<256x256xf32, #tpu.memory_space<vmem>>, vector<16x256xf32>
    tpu.vector_store %arg3[%c112_54, %c0_55], %92 {strides = array<i32>} : memref<256x256xf32, #tpu.memory_space<vmem>>, vector<16x256xf32>,
    %c128_i32_56 = arith.constant 128 : i32
    %94 = tpu.dynamic_rotate %78 by %c128_i32_56 dim 1 : vector<16x256xf32>, i32 -> vector<16x256xf32>
    %c128_57 = arith.constant 128 : index
    %c0_58 = arith.constant 0 : index
    %95 = vector.load %arg3[%c128_57, %c0_58] : memref<256x256xf32, #tpu.memory_space<vmem>>, vector<16x256xf32>
    tpu.vector_store %arg3[%c128_57, %c0_58], %94 {strides = array<i32>} : memref<256x256xf32, #tpu.memory_space<vmem>>, vector<16x256xf32>,
    %c112_i32_59 = arith.constant 112 : i32
    %96 = tpu.dynamic_rotate %78 by %c112_i32_59 dim 1 : vector<16x256xf32>, i32 -> vector<16x256xf32>
    %c144_60 = arith.constant 144 : index
    %c0_61 = arith.constant 0 : index
    %97 = vector.load %arg3[%c144_60, %c0_61] : memref<256x256xf32, #tpu.memory_space<vmem>>, vector<16x256xf32>
    tpu.vector_store %arg3[%c144_60, %c0_61], %96 {strides = array<i32>} : memref<256x256xf32, #tpu.memory_space<vmem>>, vector<16x256xf32>,
    %c96_i32_62 = arith.constant 96 : i32
    %98 = tpu.dynamic_rotate %78 by %c96_i32_62 dim 1 : vector<16x256xf32>, i32 -> vector<16x256xf32>
    %c160_63 = arith.constant 160 : index
    %c0_64 = arith.constant 0 : index
    %99 = vector.load %arg3[%c160_63, %c0_64] : memref<256x256xf32, #tpu.memory_space<vmem>>, vector<16x256xf32>
    tpu.vector_store %arg3[%c160_63, %c0_64], %98 {strides = array<i32>} : memref<256x256xf32, #tpu.memory_space<vmem>>, vector<16x256xf32>,
    %c80_i32_65 = arith.constant 80 : i32
    %100 = tpu.dynamic_rotate %78 by %c80_i32_65 dim 1 : vector<16x256xf32>, i32 -> vector<16x256xf32>
    %c176_66 = arith.constant 176 : index
    %c0_67 = arith.constant 0 : index
    %101 = vector.load %arg3[%c176_66, %c0_67] : memref<256x256xf32, #tpu.memory_space<vmem>>, vector<16x256xf32>
    tpu.vector_store %arg3[%c176_66, %c0_67], %100 {strides = array<i32>} : memref<256x256xf32, #tpu.memory_space<vmem>>, vector<16x256xf32>,
    %c64_i32_68 = arith.constant 64 : i32
    %102 = tpu.dynamic_rotate %78 by %c64_i32_68 dim 1 : vector<16x256xf32>, i32 -> vector<16x256xf32>
    %c192_69 = arith.constant 192 : index
    %c0_70 = arith.constant 0 : index
    %103 = vector.load %arg3[%c192_69, %c0_70] : memref<256x256xf32, #tpu.memory_space<vmem>>, vector<16x256xf32>
    tpu.vector_store %arg3[%c192_69, %c0_70], %102 {strides = array<i32>} : memref<256x256xf32, #tpu.memory_space<vmem>>, vector<16x256xf32>,
    %c48_i32_71 = arith.constant 48 : i32
    %104 = tpu.dynamic_rotate %78 by %c48_i32_71 dim 1 : vector<16x256xf32>, i32 -> vector<16x256xf32>
    %c208_72 = arith.constant 208 : index
    %c0_73 = arith.constant 0 : index
    %105 = vector.load %arg3[%c208_72, %c0_73] : memref<256x256xf32, #tpu.memory_space<vmem>>, vector<16x256xf32>
    tpu.vector_store %arg3[%c208_72, %c0_73], %104 {strides = array<i32>} : memref<256x256xf32, #tpu.memory_space<vmem>>, vector<16x256xf32>,
    %c32_i32_74 = arith.constant 32 : i32
    %106 = tpu.dynamic_rotate %78 by %c32_i32_74 dim 1 : vector<16x256xf32>, i32 -> vector<16x256xf32>
    %c224_75 = arith.constant 224 : index
    %c0_76 = arith.constant 0 : index
    %107 = vector.load %arg3[%c224_75, %c0_76] : memref<256x256xf32, #tpu.memory_space<vmem>>, vector<16x256xf32>
    tpu.vector_store %arg3[%c224_75, %c0_76], %106 {strides = array<i32>} : memref<256x256xf32, #tpu.memory_space<vmem>>, vector<16x256xf32>,
    %c16_i32_77 = arith.constant 16 : i32
    %108 = tpu.dynamic_rotate %78 by %c16_i32_77 dim 1 : vector<16x256xf32>, i32 -> vector<16x256xf32>
    %c240_78 = arith.constant 240 : index
    %c0_79 = arith.constant 0 : index
    %109 = vector.load %arg3[%c240_78, %c0_79] : memref<256x256xf32, #tpu.memory_space<vmem>>, vector<16x256xf32>
    tpu.vector_store %arg3[%c240_78, %c0_79], %108 {strides = array<i32>} : memref<256x256xf32, #tpu.memory_space<vmem>>, vector<16x256xf32>,
    %c0_80 = arith.constant 0 : index
    %c0_81 = arith.constant 0 : index
    %110 = vector.load %arg3[%c0_80, %c0_81] : memref<256x256xf32, #tpu.memory_space<vmem>>, vector<256x256xf32>
    %111 = vector.broadcast %68 : vector<1x256xf32> to vector<256x256xf32>
    %112 = arith.mulf %111, %110 : vector<256x256xf32>
    %cst_82 = arith.constant dense<0.000000e+00> : vector<256x256xf32>
    %113 = tpu.matmul %112, %110, %cst_82 {dimension_numbers = #tpu.dot_dimension_numbers<[1], [0], [0], [1], [0, 0, 1, 1], [], []>} : vector<256x256xf32>, vector<256x256xf32>, vector<256x256xf32> -> vector<256x256xf32>
    %c1_83 = arith.constant 1 : index
    %c0_84 = arith.constant 0 : index
    %c0_85 = arith.constant 0 : index
    %114 = vector.load %arg2[%c1_83, %c0_84, %c0_85] : memref<4x256x256xf32, #tpu.memory_space<vmem>>, vector<1x256x256xf32>
    %115 = vector.shape_cast %114 : vector<1x256x256xf32> to vector<256x256xf32>
    %116 = vector.shape_cast %113 : vector<256x256xf32> to vector<1x256x256xf32>
    tpu.vector_store %arg2[%c1_83, %c0_84, %c0_85], %116 {strides = array<i32>} : memref<4x256x256xf32, #tpu.memory_space<vmem>>, vector<1x256x256xf32>,
    %c2 = arith.constant 2 : index
    %c0_86 = arith.constant 0 : index
    %c0_87 = arith.constant 0 : index
    %117 = vector.load %arg1[%c2, %c0_86, %c0_87] : memref<4x1x256xf32, #tpu.memory_space<vmem>>, vector<1x1x256xf32>
    %118 = vector.shape_cast %117 : vector<1x1x256xf32> to vector<1x256xf32>
    %119 = vector.shape_cast %118 : vector<1x256xf32> to vector<1x256xf32>
    %120 = vector.broadcast %119 : vector<1x256xf32> to vector<16x256xf32>
    %c255_i32_88 = arith.constant 255 : i32
    %121 = tpu.dynamic_rotate %120 by %c255_i32_88 dim 1 : vector<16x256xf32>, i32 -> vector<16x256xf32>
    %122 = arith.select %4, %121, %120 : vector<16x256xi1>, vector<16x256xf32>
    %c254_i32_89 = arith.constant 254 : i32
    %123 = tpu.dynamic_rotate %122 by %c254_i32_89 dim 1 : vector<16x256xf32>, i32 -> vector<16x256xf32>
    %124 = arith.select %8, %123, %122 : vector<16x256xi1>, vector<16x256xf32>
    %c252_i32_90 = arith.constant 252 : i32
    %125 = tpu.dynamic_rotate %124 by %c252_i32_90 dim 1 : vector<16x256xf32>, i32 -> vector<16x256xf32>
    %126 = arith.select %12, %125, %124 : vector<16x256xi1>, vector<16x256xf32>
    %c248_i32_91 = arith.constant 248 : i32
    %127 = tpu.dynamic_rotate %126 by %c248_i32_91 dim 1 : vector<16x256xf32>, i32 -> vector<16x256xf32>
    %128 = arith.select %16, %127, %126 : vector<16x256xi1>, vector<16x256xf32>
    %c0_92 = arith.constant 0 : index
    %c0_93 = arith.constant 0 : index
    %129 = vector.load %arg3[%c0_92, %c0_93] : memref<256x256xf32, #tpu.memory_space<vmem>>, vector<16x256xf32>
    tpu.vector_store %arg3[%c0_92, %c0_93], %128 {strides = array<i32>} : memref<256x256xf32, #tpu.memory_space<vmem>>, vector<16x256xf32>,
    %c240_i32_94 = arith.constant 240 : i32
    %130 = tpu.dynamic_rotate %128 by %c240_i32_94 dim 1 : vector<16x256xf32>, i32 -> vector<16x256xf32>
    %c16_95 = arith.constant 16 : index
    %c0_96 = arith.constant 0 : index
    %131 = vector.load %arg3[%c16_95, %c0_96] : memref<256x256xf32, #tpu.memory_space<vmem>>, vector<16x256xf32>
    tpu.vector_store %arg3[%c16_95, %c0_96], %130 {strides = array<i32>} : memref<256x256xf32, #tpu.memory_space<vmem>>, vector<16x256xf32>,
    %c224_i32_97 = arith.constant 224 : i32
    %132 = tpu.dynamic_rotate %128 by %c224_i32_97 dim 1 : vector<16x256xf32>, i32 -> vector<16x256xf32>
    %c32_98 = arith.constant 32 : index
    %c0_99 = arith.constant 0 : index
    %133 = vector.load %arg3[%c32_98, %c0_99] : memref<256x256xf32, #tpu.memory_space<vmem>>, vector<16x256xf32>
    tpu.vector_store %arg3[%c32_98, %c0_99], %132 {strides = array<i32>} : memref<256x256xf32, #tpu.memory_space<vmem>>, vector<16x256xf32>,
    %c208_i32_100 = arith.constant 208 : i32
    %134 = tpu.dynamic_rotate %128 by %c208_i32_100 dim 1 : vector<16x256xf32>, i32 -> vector<16x256xf32>
    %c48_101 = arith.constant 48 : index
    %c0_102 = arith.constant 0 : index
    %135 = vector.load %arg3[%c48_101, %c0_102] : memref<256x256xf32, #tpu.memory_space<vmem>>, vector<16x256xf32>
    tpu.vector_store %arg3[%c48_101, %c0_102], %134 {strides = array<i32>} : memref<256x256xf32, #tpu.memory_space<vmem>>, vector<16x256xf32>,
    %c192_i32_103 = arith.constant 192 : i32
    %136 = tpu.dynamic_rotate %128 by %c192_i32_103 dim 1 : vector<16x256xf32>, i32 -> vector<16x256xf32>
    %c64_104 = arith.constant 64 : index
    %c0_105 = arith.constant 0 : index
    %137 = vector.load %arg3[%c64_104, %c0_105] : memref<256x256xf32, #tpu.memory_space<vmem>>, vector<16x256xf32>
    tpu.vector_store %arg3[%c64_104, %c0_105], %136 {strides = array<i32>} : memref<256x256xf32, #tpu.memory_space<vmem>>, vector<16x256xf32>,
    %c176_i32_106 = arith.constant 176 : i32
    %138 = tpu.dynamic_rotate %128 by %c176_i32_106 dim 1 : vector<16x256xf32>, i32 -> vector<16x256xf32>
    %c80_107 = arith.constant 80 : index
    %c0_108 = arith.constant 0 : index
    %139 = vector.load %arg3[%c80_107, %c0_108] : memref<256x256xf32, #tpu.memory_space<vmem>>, vector<16x256xf32>
    tpu.vector_store %arg3[%c80_107, %c0_108], %138 {strides = array<i32>} : memref<256x256xf32, #tpu.memory_space<vmem>>, vector<16x256xf32>,
    %c160_i32_109 = arith.constant 160 : i32
    %140 = tpu.dynamic_rotate %128 by %c160_i32_109 dim 1 : vector<16x256xf32>, i32 -> vector<16x256xf32>
    %c96_110 = arith.constant 96 : index
    %c0_111 = arith.constant 0 : index
    %141 = vector.load %arg3[%c96_110, %c0_111] : memref<256x256xf32, #tpu.memory_space<vmem>>, vector<16x256xf32>
    tpu.vector_store %arg3[%c96_110, %c0_111], %140 {strides = array<i32>} : memref<256x256xf32, #tpu.memory_space<vmem>>, vector<16x256xf32>,
    %c144_i32_112 = arith.constant 144 : i32
    %142 = tpu.dynamic_rotate %128 by %c144_i32_112 dim 1 : vector<16x256xf32>, i32 -> vector<16x256xf32>
    %c112_113 = arith.constant 112 : index
    %c0_114 = arith.constant 0 : index
    %143 = vector.load %arg3[%c112_113, %c0_114] : memref<256x256xf32, #tpu.memory_space<vmem>>, vector<16x256xf32>
    tpu.vector_store %arg3[%c112_113, %c0_114], %142 {strides = array<i32>} : memref<256x256xf32, #tpu.memory_space<vmem>>, vector<16x256xf32>,
    %c128_i32_115 = arith.constant 128 : i32
    %144 = tpu.dynamic_rotate %128 by %c128_i32_115 dim 1 : vector<16x256xf32>, i32 -> vector<16x256xf32>
    %c128_116 = arith.constant 128 : index
    %c0_117 = arith.constant 0 : index
    %145 = vector.load %arg3[%c128_116, %c0_117] : memref<256x256xf32, #tpu.memory_space<vmem>>, vector<16x256xf32>
    tpu.vector_store %arg3[%c128_116, %c0_117], %144 {strides = array<i32>} : memref<256x256xf32, #tpu.memory_space<vmem>>, vector<16x256xf32>,
    %c112_i32_118 = arith.constant 112 : i32
    %146 = tpu.dynamic_rotate %128 by %c112_i32_118 dim 1 : vector<16x256xf32>, i32 -> vector<16x256xf32>
    %c144_119 = arith.constant 144 : index
    %c0_120 = arith.constant 0 : index
    %147 = vector.load %arg3[%c144_119, %c0_120] : memref<256x256xf32, #tpu.memory_space<vmem>>, vector<16x256xf32>
    tpu.vector_store %arg3[%c144_119, %c0_120], %146 {strides = array<i32>} : memref<256x256xf32, #tpu.memory_space<vmem>>, vector<16x256xf32>,
    %c96_i32_121 = arith.constant 96 : i32
    %148 = tpu.dynamic_rotate %128 by %c96_i32_121 dim 1 : vector<16x256xf32>, i32 -> vector<16x256xf32>
    %c160_122 = arith.constant 160 : index
    %c0_123 = arith.constant 0 : index
    %149 = vector.load %arg3[%c160_122, %c0_123] : memref<256x256xf32, #tpu.memory_space<vmem>>, vector<16x256xf32>
    tpu.vector_store %arg3[%c160_122, %c0_123], %148 {strides = array<i32>} : memref<256x256xf32, #tpu.memory_space<vmem>>, vector<16x256xf32>,
    %c80_i32_124 = arith.constant 80 : i32
    %150 = tpu.dynamic_rotate %128 by %c80_i32_124 dim 1 : vector<16x256xf32>, i32 -> vector<16x256xf32>
    %c176_125 = arith.constant 176 : index
    %c0_126 = arith.constant 0 : index
    %151 = vector.load %arg3[%c176_125, %c0_126] : memref<256x256xf32, #tpu.memory_space<vmem>>, vector<16x256xf32>
    tpu.vector_store %arg3[%c176_125, %c0_126], %150 {strides = array<i32>} : memref<256x256xf32, #tpu.memory_space<vmem>>, vector<16x256xf32>,
    %c64_i32_127 = arith.constant 64 : i32
    %152 = tpu.dynamic_rotate %128 by %c64_i32_127 dim 1 : vector<16x256xf32>, i32 -> vector<16x256xf32>
    %c192_128 = arith.constant 192 : index
    %c0_129 = arith.constant 0 : index
    %153 = vector.load %arg3[%c192_128, %c0_129] : memref<256x256xf32, #tpu.memory_space<vmem>>, vector<16x256xf32>
    tpu.vector_store %arg3[%c192_128, %c0_129], %152 {strides = array<i32>} : memref<256x256xf32, #tpu.memory_space<vmem>>, vector<16x256xf32>,
    %c48_i32_130 = arith.constant 48 : i32
    %154 = tpu.dynamic_rotate %128 by %c48_i32_130 dim 1 : vector<16x256xf32>, i32 -> vector<16x256xf32>
    %c208_131 = arith.constant 208 : index
    %c0_132 = arith.constant 0 : index
    %155 = vector.load %arg3[%c208_131, %c0_132] : memref<256x256xf32, #tpu.memory_space<vmem>>, vector<16x256xf32>
    tpu.vector_store %arg3[%c208_131, %c0_132], %154 {strides = array<i32>} : memref<256x256xf32, #tpu.memory_space<vmem>>, vector<16x256xf32>,
    %c32_i32_133 = arith.constant 32 : i32
    %156 = tpu.dynamic_rotate %128 by %c32_i32_133 dim 1 : vector<16x256xf32>, i32 -> vector<16x256xf32>
    %c224_134 = arith.constant 224 : index
    %c0_135 = arith.constant 0 : index
    %157 = vector.load %arg3[%c224_134, %c0_135] : memref<256x256xf32, #tpu.memory_space<vmem>>, vector<16x256xf32>
    tpu.vector_store %arg3[%c224_134, %c0_135], %156 {strides = array<i32>} : memref<256x256xf32, #tpu.memory_space<vmem>>, vector<16x256xf32>,
    %c16_i32_136 = arith.constant 16 : i32
    %158 = tpu.dynamic_rotate %128 by %c16_i32_136 dim 1 : vector<16x256xf32>, i32 -> vector<16x256xf32>
    %c240_137 = arith.constant 240 : index
    %c0_138 = arith.constant 0 : index
    %159 = vector.load %arg3[%c240_137, %c0_138] : memref<256x256xf32, #tpu.memory_space<vmem>>, vector<16x256xf32>
    tpu.vector_store %arg3[%c240_137, %c0_138], %158 {strides = array<i32>} : memref<256x256xf32, #tpu.memory_space<vmem>>, vector<16x256xf32>,
    %c0_139 = arith.constant 0 : index
    %c0_140 = arith.constant 0 : index
    %160 = vector.load %arg3[%c0_139, %c0_140] : memref<256x256xf32, #tpu.memory_space<vmem>>, vector<256x256xf32>
    %161 = vector.broadcast %118 : vector<1x256xf32> to vector<256x256xf32>
    %162 = arith.mulf %161, %160 : vector<256x256xf32>
    %cst_141 = arith.constant dense<0.000000e+00> : vector<256x256xf32>
    %163 = tpu.matmul %162, %160, %cst_141 {dimension_numbers = #tpu.dot_dimension_numbers<[1], [0], [0], [1], [0, 0, 1, 1], [], []>} : vector<256x256xf32>, vector<256x256xf32>, vector<256x256xf32> -> vector<256x256xf32>
    %c2_142 = arith.constant 2 : index
    %c0_143 = arith.constant 0 : index
    %c0_144 = arith.constant 0 : index
    %164 = vector.load %arg2[%c2_142, %c0_143, %c0_144] : memref<4x256x256xf32, #tpu.memory_space<vmem>>, vector<1x256x256xf32>
    %165 = vector.shape_cast %164 : vector<1x256x256xf32> to vector<256x256xf32>
    %166 = vector.shape_cast %163 : vector<256x256xf32> to vector<1x256x256xf32>
    tpu.vector_store %arg2[%c2_142, %c0_143, %c0_144], %166 {strides = array<i32>} : memref<4x256x256xf32, #tpu.memory_space<vmem>>, vector<1x256x256xf32>,
    %c3 = arith.constant 3 : index
    %c0_145 = arith.constant 0 : index
    %c0_146 = arith.constant 0 : index
    %167 = vector.load %arg1[%c3, %c0_145, %c0_146] : memref<4x1x256xf32, #tpu.memory_space<vmem>>, vector<1x1x256xf32>
    %168 = vector.shape_cast %167 : vector<1x1x256xf32> to vector<1x256xf32>
    %169 = vector.shape_cast %168 : vector<1x256xf32> to vector<1x256xf32>
    %170 = vector.broadcast %169 : vector<1x256xf32> to vector<16x256xf32>
    %c255_i32_147 = arith.constant 255 : i32
    %171 = tpu.dynamic_rotate %170 by %c255_i32_147 dim 1 : vector<16x256xf32>, i32 -> vector<16x256xf32>
    %172 = arith.select %4, %171, %170 : vector<16x256xi1>, vector<16x256xf32>
    %c254_i32_148 = arith.constant 254 : i32
    %173 = tpu.dynamic_rotate %172 by %c254_i32_148 dim 1 : vector<16x256xf32>, i32 -> vector<16x256xf32>
    %174 = arith.select %8, %173, %172 : vector<16x256xi1>, vector<16x256xf32>
    %c252_i32_149 = arith.constant 252 : i32
    %175 = tpu.dynamic_rotate %174 by %c252_i32_149 dim 1 : vector<16x256xf32>, i32 -> vector<16x256xf32>
    %176 = arith.select %12, %175, %174 : vector<16x256xi1>, vector<16x256xf32>
    %c248_i32_150 = arith.constant 248 : i32
    %177 = tpu.dynamic_rotate %176 by %c248_i32_150 dim 1 : vector<16x256xf32>, i32 -> vector<16x256xf32>
    %178 = arith.select %16, %177, %176 : vector<16x256xi1>, vector<16x256xf32>
    %c0_151 = arith.constant 0 : index
    %c0_152 = arith.constant 0 : index
    %179 = vector.load %arg3[%c0_151, %c0_152] : memref<256x256xf32, #tpu.memory_space<vmem>>, vector<16x256xf32>
    tpu.vector_store %arg3[%c0_151, %c0_152], %178 {strides = array<i32>} : memref<256x256xf32, #tpu.memory_space<vmem>>, vector<16x256xf32>,
    %c240_i32_153 = arith.constant 240 : i32
    %180 = tpu.dynamic_rotate %178 by %c240_i32_153 dim 1 : vector<16x256xf32>, i32 -> vector<16x256xf32>
    %c16_154 = arith.constant 16 : index
    %c0_155 = arith.constant 0 : index
    %181 = vector.load %arg3[%c16_154, %c0_155] : memref<256x256xf32, #tpu.memory_space<vmem>>, vector<16x256xf32>
    tpu.vector_store %arg3[%c16_154, %c0_155], %180 {strides = array<i32>} : memref<256x256xf32, #tpu.memory_space<vmem>>, vector<16x256xf32>,
    %c224_i32_156 = arith.constant 224 : i32
    %182 = tpu.dynamic_rotate %178 by %c224_i32_156 dim 1 : vector<16x256xf32>, i32 -> vector<16x256xf32>
    %c32_157 = arith.constant 32 : index
    %c0_158 = arith.constant 0 : index
    %183 = vector.load %arg3[%c32_157, %c0_158] : memref<256x256xf32, #tpu.memory_space<vmem>>, vector<16x256xf32>
    tpu.vector_store %arg3[%c32_157, %c0_158], %182 {strides = array<i32>} : memref<256x256xf32, #tpu.memory_space<vmem>>, vector<16x256xf32>,
    %c208_i32_159 = arith.constant 208 : i32
    %184 = tpu.dynamic_rotate %178 by %c208_i32_159 dim 1 : vector<16x256xf32>, i32 -> vector<16x256xf32>
    %c48_160 = arith.constant 48 : index
    %c0_161 = arith.constant 0 : index
    %185 = vector.load %arg3[%c48_160, %c0_161] : memref<256x256xf32, #tpu.memory_space<vmem>>, vector<16x256xf32>
    tpu.vector_store %arg3[%c48_160, %c0_161], %184 {strides = array<i32>} : memref<256x256xf32, #tpu.memory_space<vmem>>, vector<16x256xf32>,
    %c192_i32_162 = arith.constant 192 : i32
    %186 = tpu.dynamic_rotate %178 by %c192_i32_162 dim 1 : vector<16x256xf32>, i32 -> vector<16x256xf32>
    %c64_163 = arith.constant 64 : index
    %c0_164 = arith.constant 0 : index
    %187 = vector.load %arg3[%c64_163, %c0_164] : memref<256x256xf32, #tpu.memory_space<vmem>>, vector<16x256xf32>
    tpu.vector_store %arg3[%c64_163, %c0_164], %186 {strides = array<i32>} : memref<256x256xf32, #tpu.memory_space<vmem>>, vector<16x256xf32>,
    %c176_i32_165 = arith.constant 176 : i32
    %188 = tpu.dynamic_rotate %178 by %c176_i32_165 dim 1 : vector<16x256xf32>, i32 -> vector<16x256xf32>
    %c80_166 = arith.constant 80 : index
    %c0_167 = arith.constant 0 : index
    %189 = vector.load %arg3[%c80_166, %c0_167] : memref<256x256xf32, #tpu.memory_space<vmem>>, vector<16x256xf32>
    tpu.vector_store %arg3[%c80_166, %c0_167], %188 {strides = array<i32>} : memref<256x256xf32, #tpu.memory_space<vmem>>, vector<16x256xf32>,
    %c160_i32_168 = arith.constant 160 : i32
    %190 = tpu.dynamic_rotate %178 by %c160_i32_168 dim 1 : vector<16x256xf32>, i32 -> vector<16x256xf32>
    %c96_169 = arith.constant 96 : index
    %c0_170 = arith.constant 0 : index
    %191 = vector.load %arg3[%c96_169, %c0_170] : memref<256x256xf32, #tpu.memory_space<vmem>>, vector<16x256xf32>
    tpu.vector_store %arg3[%c96_169, %c0_170], %190 {strides = array<i32>} : memref<256x256xf32, #tpu.memory_space<vmem>>, vector<16x256xf32>,
    %c144_i32_171 = arith.constant 144 : i32
    %192 = tpu.dynamic_rotate %178 by %c144_i32_171 dim 1 : vector<16x256xf32>, i32 -> vector<16x256xf32>
    %c112_172 = arith.constant 112 : index
    %c0_173 = arith.constant 0 : index
    %193 = vector.load %arg3[%c112_172, %c0_173] : memref<256x256xf32, #tpu.memory_space<vmem>>, vector<16x256xf32>
    tpu.vector_store %arg3[%c112_172, %c0_173], %192 {strides = array<i32>} : memref<256x256xf32, #tpu.memory_space<vmem>>, vector<16x256xf32>,
    %c128_i32_174 = arith.constant 128 : i32
    %194 = tpu.dynamic_rotate %178 by %c128_i32_174 dim 1 : vector<16x256xf32>, i32 -> vector<16x256xf32>
    %c128_175 = arith.constant 128 : index
    %c0_176 = arith.constant 0 : index
    %195 = vector.load %arg3[%c128_175, %c0_176] : memref<256x256xf32, #tpu.memory_space<vmem>>, vector<16x256xf32>
    tpu.vector_store %arg3[%c128_175, %c0_176], %194 {strides = array<i32>} : memref<256x256xf32, #tpu.memory_space<vmem>>, vector<16x256xf32>,
    %c112_i32_177 = arith.constant 112 : i32
    %196 = tpu.dynamic_rotate %178 by %c112_i32_177 dim 1 : vector<16x256xf32>, i32 -> vector<16x256xf32>
    %c144_178 = arith.constant 144 : index
    %c0_179 = arith.constant 0 : index
    %197 = vector.load %arg3[%c144_178, %c0_179] : memref<256x256xf32, #tpu.memory_space<vmem>>, vector<16x256xf32>
    tpu.vector_store %arg3[%c144_178, %c0_179], %196 {strides = array<i32>} : memref<256x256xf32, #tpu.memory_space<vmem>>, vector<16x256xf32>,
    %c96_i32_180 = arith.constant 96 : i32
    %198 = tpu.dynamic_rotate %178 by %c96_i32_180 dim 1 : vector<16x256xf32>, i32 -> vector<16x256xf32>
    %c160_181 = arith.constant 160 : index
    %c0_182 = arith.constant 0 : index
    %199 = vector.load %arg3[%c160_181, %c0_182] : memref<256x256xf32, #tpu.memory_space<vmem>>, vector<16x256xf32>
    tpu.vector_store %arg3[%c160_181, %c0_182], %198 {strides = array<i32>} : memref<256x256xf32, #tpu.memory_space<vmem>>, vector<16x256xf32>,
    %c80_i32_183 = arith.constant 80 : i32
    %200 = tpu.dynamic_rotate %178 by %c80_i32_183 dim 1 : vector<16x256xf32>, i32 -> vector<16x256xf32>
    %c176_184 = arith.constant 176 : index
    %c0_185 = arith.constant 0 : index
    %201 = vector.load %arg3[%c176_184, %c0_185] : memref<256x256xf32, #tpu.memory_space<vmem>>, vector<16x256xf32>
    tpu.vector_store %arg3[%c176_184, %c0_185], %200 {strides = array<i32>} : memref<256x256xf32, #tpu.memory_space<vmem>>, vector<16x256xf32>,
    %c64_i32_186 = arith.constant 64 : i32
    %202 = tpu.dynamic_rotate %178 by %c64_i32_186 dim 1 : vector<16x256xf32>, i32 -> vector<16x256xf32>
    %c192_187 = arith.constant 192 : index
    %c0_188 = arith.constant 0 : index
    %203 = vector.load %arg3[%c192_187, %c0_188] : memref<256x256xf32, #tpu.memory_space<vmem>>, vector<16x256xf32>
    tpu.vector_store %arg3[%c192_187, %c0_188], %202 {strides = array<i32>} : memref<256x256xf32, #tpu.memory_space<vmem>>, vector<16x256xf32>,
    %c48_i32_189 = arith.constant 48 : i32
    %204 = tpu.dynamic_rotate %178 by %c48_i32_189 dim 1 : vector<16x256xf32>, i32 -> vector<16x256xf32>
    %c208_190 = arith.constant 208 : index
    %c0_191 = arith.constant 0 : index
    %205 = vector.load %arg3[%c208_190, %c0_191] : memref<256x256xf32, #tpu.memory_space<vmem>>, vector<16x256xf32>
    tpu.vector_store %arg3[%c208_190, %c0_191], %204 {strides = array<i32>} : memref<256x256xf32, #tpu.memory_space<vmem>>, vector<16x256xf32>,
    %c32_i32_192 = arith.constant 32 : i32
    %206 = tpu.dynamic_rotate %178 by %c32_i32_192 dim 1 : vector<16x256xf32>, i32 -> vector<16x256xf32>
    %c224_193 = arith.constant 224 : index
    %c0_194 = arith.constant 0 : index
    %207 = vector.load %arg3[%c224_193, %c0_194] : memref<256x256xf32, #tpu.memory_space<vmem>>, vector<16x256xf32>
    tpu.vector_store %arg3[%c224_193, %c0_194], %206 {strides = array<i32>} : memref<256x256xf32, #tpu.memory_space<vmem>>, vector<16x256xf32>,
    %c16_i32_195 = arith.constant 16 : i32
    %208 = tpu.dynamic_rotate %178 by %c16_i32_195 dim 1 : vector<16x256xf32>, i32 -> vector<16x256xf32>
    %c240_196 = arith.constant 240 : index
    %c0_197 = arith.constant 0 : index
    %209 = vector.load %arg3[%c240_196, %c0_197] : memref<256x256xf32, #tpu.memory_space<vmem>>, vector<16x256xf32>
    tpu.vector_store %arg3[%c240_196, %c0_197], %208 {strides = array<i32>} : memref<256x256xf32, #tpu.memory_space<vmem>>, vector<16x256xf32>,
    %c0_198 = arith.constant 0 : index
    %c0_199 = arith.constant 0 : index
    %210 = vector.load %arg3[%c0_198, %c0_199] : memref<256x256xf32, #tpu.memory_space<vmem>>, vector<256x256xf32>
    %211 = vector.broadcast %168 : vector<1x256xf32> to vector<256x256xf32>
    %212 = arith.mulf %211, %210 : vector<256x256xf32>
    %cst_200 = arith.constant dense<0.000000e+00> : vector<256x256xf32>
    %213 = tpu.matmul %212, %210, %cst_200 {dimension_numbers = #tpu.dot_dimension_numbers<[1], [0], [0], [1], [0, 0, 1, 1], [], []>} : vector<256x256xf32>, vector<256x256xf32>, vector<256x256xf32> -> vector<256x256xf32>
    %c3_201 = arith.constant 3 : index
    %c0_202 = arith.constant 0 : index
    %c0_203 = arith.constant 0 : index
    %214 = vector.load %arg2[%c3_201, %c0_202, %c0_203] : memref<4x256x256xf32, #tpu.memory_space<vmem>>, vector<1x256x256xf32>
    %215 = vector.shape_cast %214 : vector<1x256x256xf32> to vector<256x256xf32>
    %216 = vector.shape_cast %213 : vector<256x256xf32> to vector<1x256x256xf32>
    tpu.vector_store %arg2[%c3_201, %c0_202, %c0_203], %216 {strides = array<i32>} : memref<4x256x256xf32, #tpu.memory_space<vmem>>, vector<1x256x256xf32>,
    return
  }
  func.func @transform_0(%arg0: i32) -> (i32, i32, i32) {
    %c0_i32 = arith.constant 0 : i32
    %c0_i32_0 = arith.constant 0 : i32
    %c0_i32_1 = arith.constant 0 : i32
    return %arg0, %c0_i32, %c0_i32_0 : i32, i32, i32
  }
  func.func @transform_1(%arg0: i32) -> (i32, i32, i32) {
    %c0_i32 = arith.constant 0 : i32
    %c0_i32_0 = arith.constant 0 : i32
    %c0_i32_1 = arith.constant 0 : i32
    return %arg0, %c0_i32, %c0_i32_0 : i32, i32, i32
  }
}

</mosaic_0001>

<bundles_post_ra>
// kernel: tpu_custom_call.1
= control target key start
LH: loop header
LB: loop body
LE: loop exit
PB: predicated region body
PF: predicated region fallthrough
CT: control target
= control target key end

     0   :  { %6 = vsyncpa [#allocation4], 0  ;;  %s6445_s0 = inlined_call_operand.hbm [shape: f32[8,1,256], index: 0, kind: input, shape index: {}]   ;;  %s6446_s1 = inlined_call_operand.hbm [shape: f32[8,256,256], index: 1, kind: output, shape index: {}]  }
   0x1   :  { %8 = vsyncpa [#allocation4 + $0x1], 0 }
   0x2   :  { %9 = vsyncpa [#allocation5], 0 }
   0x3   :  { %11 = vsyncpa [#allocation5 + $0x1], 0  ;;  %s4086_s6 = smov 0   ;;  %s4088_s7 = smov 0  }
   0x4   :  { %s4090_s8 = smov 0   ;;  %s4092_s9 = smov 0  }
   0x5 LB: > { %s4107_s10 = sadd.s32 4294967295, %s4060_s9   ;;  %s3691_s11 = sadd.s32 4294967294, %s4060_s9   ;;  %s4060_s9 = sphi %s4092_s9, %s6513_s9   ;;  %s4056_s8 = sphi %s4090_s8, %s6512_s8   ;;  %s4052_s7 = sphi %s4088_s7, %s6511_s7   ;;  %s4048_s6 = sphi %s4086_s6, %s6510_s6  }
   0x6   : > { %s4111_s12 = sadd.s32 1, %s4060_s9   ;;  %s24_s13 = sadd.s32 1, %s4056_s8 }
   0x7   : > { %s21_s14 = ssub.s32 %s4060_s9, %s4111_s12  ;;  %p31_p0 = scmp.ne.s32.totalorder %s4056_s8, %s4052_s7 }
   0x8   : > { %p22_p1 = scmp.eq.s32.totalorder %s21_s14, 0  ;;  %p32_p2 = scmp.eq.s32.totalorder %s4060_s9, 0 }
   0x9   : > { %p37_p3 = scmp.ne.s32.totalorder %s4052_s7, %s4048_s6  ;;  %p38_p4 = scmp.eq.s32.totalorder %s4107_s10, 0 }
   0xa   : > { %s4123_s15 = scalar_select %p22_p1, %s4056_s8, %s24_s13  }
   0xb   : > { %p4125_p5 = por %p32_p2, %p31_p0  ;;  %p4129_p6 = por %p38_p4, %p37_p3 }
   0xc   : > { %p61_p7 = scmp.eq.s32.totalorder %s4107_s10, 1  ;;  %p67_p8 = scmp.eq.s32.totalorder %s3691_s11, 1 }
   0xd   : > { %p3916_p10 = scmp.lt.s32.totalorder %s4060_s9, 2  ;;  %s87_s20 = sand.u32 1, %s4056_s8  }
   0xe   : > { %p4136_p11 = por %p61_p7, %p31_p0  ;;  %p4140_p12 = por %p67_p8, %p37_p3 }
   0xf   : > { %s3901_s21 = sshll.u32 %s4060_s9, 3  ;;  %s3694_s22 = sshll.u32 %s87_s20, 3 }
  0x10   : > { %s96_s25 = scalar_lea.hbm %s6445_s0, %s3901_s21  ;;  %s91_s27 = scalar_lea.vmem [#allocation3], %s3694_s22 }
  0x11   : > { %s97_s26 = sshll.u32 %s96_s25, 4  ;;  %s99_s28 = sshll.u32 %s91_s27, 4  ;;  %s98_s26 = int_to_ptr.hbm [resolvable:$true] %s97_s26  ;;  %s100_s28 = int_to_ptr.vmem [resolvable:$true] %s99_s28 }
  0x12   : > { %p4151_p13 = pnand %p3916_p10, %p4125_p5  ;;  %p3697_p0 = scmp.ge.s32.totalorder %s4060_s9, 1 }
  0x13   : > { %p107_p1 = scmp.lt.s32.totalorder %s4060_s9, 3  ;;  %s88_s30 = scalar_lea.sflag [#allocation4], %s87_s20 }
  0x14   : > { %s3964_s2 = sshra.s32 %s98_s26, 4  ;;  %p3968_p3 = pneg %p4151_p13  ;;  %s3965_s2 = int_to_ptr.hbm [resolvable:$true] %s3964_s2 }
  0x15   : > { %s3966_s3 = scalar_lea.hbm %s3965_s2, 8  ;;  %s3971_s11 = scalar_lea.hbm %s6445_s0, 16 }
  0x16   : > { %p3967_p2 = scmp.ne.s32.totalorder %s3965_s2, %s3966_s3  ;;  %p3972_p5 = scmp.lt.s32.totalorder %s3965_s2, %s6445_s0 }
  0x17   : > { %p3973_p8 = scmp.lt.s32.totalorder %s3971_s11, %s3966_s3 }
  0x18   : > { %p3969_p4 = pnand %p3968_p3, %p3967_p2 }
  0x19   : > { %p3974_p10 = por %p3973_p8, %p3972_p5 }
  0x1a   : > { %p3970_p7 = pneg %p3969_p4 }
  0x1c   : > { %p3975_p9 = pnand %p3974_p10, %p3970_p7 }
  0x1e   : > { %3978 = shalt.err (!%p3975_p9)
}
  0x1f   : > { %s4062_s16 = smov 32   ;;  %s4063_s20 = smov 2  }
  0x20   : > { %3911 = dma.hbm_to_vmem [thread:$0]  (!%p4151_p13), %s98_s26, 128, %s100_s28, %s88_s30, %s4062_s16, %s4062_s16, %s4063_s20  }
  0x21   : > { %p108_p2 = pnand %p3697_p0, %p107_p1 }
  0x22   : > { %s4172_s21 = sand.u32 (!%p108_p2), 1, %s4052_s7  }
  0x23   : > { %111 = sbr.rel (%p108_p2) target bundleno = 2714 (0xa9a), region = 24  ;;  %s3698_s22 = sshll.u32 (!%p108_p2), %s4172_s21, 3 }
  0x24   : > { %s114_s23 = scalar_lea.sflag (!%p108_p2), [#allocation4], %s4172_s21  ;;  %s4176_s24 = scalar_lea.vmem (!%p108_p2), [#allocation3], %s3698_s22 }
  0x28   : > { %4039 = dma.done.wait (%p4129_p6), %s114_s23, 128  }
  0x29   : > { %4041 = vsyncadd (%p4129_p6), %s114_s23, 4294967168  ;;  %v158_v0 = vld [vmem:[%s4176_s24] sm:$0x3]  ;;  %s4064_s25 = smov 127   ;;  %v139_v3 = vlaneseq  ;;  %s4065_s17 = smov 126  }
  0x2a   : > { %v4183_v1 = vperm.slane %v158_v0, 0  ;;  %v4187_v2 = vperm.slane %v158_v0, 1  ;;  %s4066_s26 = smov 124   ;;  %s4067_s27 = smov 120   ;;  %v3700_v55 = vld [vmem:[%s4176_s24 + $0x2] sm:$0x3] }
  0x2b   : > { %v140_v4 = vshrl.u32 %v139_v3, 7  ;;  %v4191_v7 = vand.u32 127, %v139_v3  ;;  %s4068_s28 = smov 32   ;;  %s4069_s29 = smov 16   ;;  %v4346_v56 = vperm.slane %v3700_v55, 0  ;;  %v4348_v57 = vperm.slane %v3700_v55, 1 }
  0x2c   : > { %164 = vrot.lane.b32.xlu0 %v4183_v1, %s4064_s25  ;;  %s4070_s30 = smov 48   ;;  %s4071_s2 = smov 80  }
  0x2d   : > { %v141_v5 = vadd.s32 8, %v140_v4  ;;  %v142_v9 = vand.u32 1, %v140_v4  ;;  %vm170_vm0 = vcmp.lt.s32.totalorder %v4191_v7, 127  ;;  %vm185_vm3 = vcmp.lt.s32.totalorder %v4191_v7, 126  ;;  %s4072_s3 = smov 64   ;;  %s4073_s4 = smov 96  }
  0x2e   : > { %v146_v25 = vand.u32 2, %v140_v4  ;;  %vm202_vm6 = vcmp.lt.s32.totalorder %v4191_v7, 124  ;;  %v150_v43 = vand.u32 4, %v140_v4  ;;  %vm219_vm9 = vcmp.lt.s32.totalorder %v4191_v7, 120  ;;  %s4074_s5 = smov 112   ;;  %s3699_s11 = sshll.u32 %s4172_s21, 11 }
  0x2f   : > { %v143_v8 = vand.u32 1, %v141_v5  ;;  %vm4198_vm2 = vcmp.ne.s32.totalorder %v142_v9, 0  ;;  %v147_v20 = vand.u32 2, %v141_v5  ;;  %v151_v36 = vand.u32 4, %v141_v5  ;;  %s4682_s13 = scalar_lea.vmem [#allocation6], %s3699_s11  ;;  %s3903_s14 = sshll.u32 %s4107_s10, 11 }
  0x30   : > { %vm4234_vm5 = vcmp.ne.s32.totalorder %v146_v25, 0  ;;  %vm4266_vm8 = vcmp.ne.s32.totalorder %v150_v43, 0  ;;  %vm6451_vm10 = vcmp.lt.s32.totalorder %v4191_v7, 16  ;;  %vm6449_vm11 = vcmp.lt.s32.totalorder %v4191_v7, 32  ;;  %s3614_s22 = scalar_lea.hbm %s6446_s1, %s3903_s14  ;;  %s3615_s23 = sshll.u32 %s4682_s13, 4  ;;  %s3616_s23 = int_to_ptr.vmem [resolvable:$true] %s3615_s23 }
  0x31   : > { %vm4194_vm1 = vcmp.ne.s32.totalorder %v143_v8, 0  ;;  %vm4223_vm4 = vcmp.ne.s32.totalorder %v147_v20, 0  ;;  %vm4252_vm7 = vcmp.ne.s32.totalorder %v151_v36, 0  ;;  %vm6448_vm12 = vcmp.lt.s32.totalorder %v4191_v7, 48  ;;  %s3602_s10 = scalar_lea.sflag [#allocation5], %s4172_s21 }
  0x32   : > { %vm6450_vm13 = vcmp.lt.s32.totalorder %v4191_v7, 64  ;;  %vm6447_vm14 = vcmp.lt.s32.totalorder %v4191_v7, 80  ;;  %vm257_vm15 = vcmp.lt.s32.totalorder %v4191_v7, 96 }
  0x34   : > { %166 = vrot.lane.b32.xlu0 %v4187_v2, %s4064_s25 }
  0x9e   : > { %v165_v6 = vpop.permute.xlu0 %164 }
  0xa6   : > { %v167_v12 = vpop.permute.xlu0 %166 }
  0xa7   : > { %v171_v13 = vsel %vm170_vm0, %v165_v6, %v167_v12  ;;  %v172_v16 = vsel %vm170_vm0, %v167_v12, %v165_v6 }
  0xa8   : > { %v175_v14 = vsel %vm4194_vm1, %v171_v13, %v4183_v1  ;;  %v173_v15 = vsel %vm4198_vm2, %v171_v13, %v4183_v1  ;;  %v176_v17 = vsel %vm4194_vm1, %v172_v16, %v4187_v2  ;;  %v174_v18 = vsel %vm4198_vm2, %v172_v16, %v4187_v2 }
  0xa9   : > { %179 = vrot.lane.b32.xlu1 %v175_v14, %s4065_s17  ;;  %177 = vrot.lane.b32.xlu0 %v173_v15, %s4065_s17 }
  0xb1   : > { %183 = vrot.lane.b32.xlu1 %v176_v17, %s4065_s17 }
  0xb9   : > { %181 = vrot.lane.b32.xlu1 %v174_v18, %s4065_s17 }
 0x11b   : > { %v180_v19 = vpop.permute.xlu1 %179  ;;  %v178_v28 = vpop.permute.xlu0 %177 }
 0x123   : > { %v184_v22 = vpop.permute.xlu1 %183 }
 0x124   : > { %v187_v23 = vsel %vm185_vm3, %v180_v19, %v184_v22  ;;  %v189_v26 = vsel %vm185_vm3, %v184_v22, %v180_v19 }
 0x125   : > { %v192_v24 = vsel %vm4223_vm4, %v187_v23, %v175_v14  ;;  %v193_v31 = vsel %vm4223_vm4, %v189_v26, %v176_v17 }
 0x126   : > { %196 = vrot.lane.b32.xlu2 %v192_v24, %s4066_s26 }
 0x12b   : > { %v182_v29 = vpop.permute.xlu1 %181 }
 0x12c   : > { %v186_v30 = vsel %vm185_vm3, %v178_v28, %v182_v29  ;;  %v188_v33 = vsel %vm185_vm3, %v182_v29, %v178_v28 }
 0x12d   : > { %v190_v32 = vsel %vm4234_vm5, %v186_v30, %v173_v15  ;;  %v191_v34 = vsel %vm4234_vm5, %v188_v33, %v174_v18 }
 0x12e   : > { %200 = vrot.lane.b32.xlu2 %v193_v31, %s4066_s26  ;;  %194 = vrot.lane.b32.xlu1 %v190_v32, %s4066_s26 }
 0x136   : > { %198 = vrot.lane.b32.xlu2 %v191_v34, %s4066_s26 }
 0x180   : > { %v197_v35 = vpop.permute.xlu2 %196 }
 0x188   : > { %v201_v38 = vpop.permute.xlu2 %200 }
 0x189   : > { %v204_v39 = vsel %vm202_vm6, %v197_v35, %v201_v38  ;;  %v206_v40 = vsel %vm202_vm6, %v201_v38, %v197_v35 }
 0x18a   : > { %v210_v41 = vsel %vm4252_vm7, %v206_v40, %v193_v31  ;;  %v209_v42 = vsel %vm4252_vm7, %v204_v39, %v192_v24 }
 0x18b   : > { %217 = vrot.lane.b32.xlu0 %v210_v41, %s4067_s27  ;;  %213 = vrot.lane.b32.xlu2 %v209_v42, %s4067_s27 }
 0x190   : > { %v199_v45 = vpop.permute.xlu2 %198 }
 0x1a0   : > { %v195_v46 = vpop.permute.xlu1 %194 }
 0x1a1   : > { %v203_v47 = vsel %vm202_vm6, %v195_v46, %v199_v45  ;;  %v205_v48 = vsel %vm202_vm6, %v199_v45, %v195_v46 }
 0x1a2   : > { %v4276_v49 = vsel %vm4266_vm8, %v203_v47, %v190_v32  ;;  %v4280_v50 = vsel %vm4266_vm8, %v205_v48, %v191_v34 }
 0x1a3   : > { %321 = vrot.lane.b32.xlu1 %v4280_v50, %s4068_s28  ;;  %338 = vrot.lane.b32.xlu0 %v4280_v50, %s4069_s29 }
 0x1a4   : > { %334 = vrot.lane.b32.xlu2 %v4276_v49, %s4069_s29 }
 0x1ab   : > { %300 = vrot.lane.b32.xlu1 %v4276_v49, %s4070_s30  ;;  %317 = vrot.lane.b32.xlu0 %v4276_v49, %s4068_s28 }
 0x1ac   : > { %304 = vrot.lane.b32.xlu2 %v4280_v50, %s4070_s30 }
 0x1b3   : > { %270 = vrot.lane.b32.xlu1 %v4280_v50, %s4071_s2  ;;  %287 = vrot.lane.b32.xlu0 %v4280_v50, %s4072_s3 }
 0x1b4   : > { %283 = vrot.lane.b32.xlu2 %v4276_v49, %s4072_s3 }
 0x1bb   : > { %249 = vrot.lane.b32.xlu1 %v4276_v49, %s4073_s4  ;;  %266 = vrot.lane.b32.xlu0 %v4276_v49, %s4071_s2 }
 0x1bc   : > { %253 = vrot.lane.b32.xlu2 %v4280_v50, %s4073_s4 }
 0x1e5   : > { %v214_v51 = vpop.permute.xlu2 %213 }
 0x1fd   : > { %v218_v52 = vpop.permute.xlu0 %217 }
 0x1fe   : > { %v4309_v53 = vsel %vm219_vm9, %v214_v51, %v218_v52  ;;  %v4313_v54 = vsel %vm219_vm9, %v218_v52, %v214_v51  ;;  %v335_v58 = vpop.permute.xlu2 %334 }
 0x1ff   : > { %323 = vrot.lane.b32.xlu2 %v4313_v54, %s4068_s28  ;;  %340 = vrot.lane.b32.xlu1 %v4313_v54, %s4069_s29 }
 0x200   : > { %336 = vrot.lane.b32.xlu0 %v4309_v53, %s4069_s29 }
 0x206   : > { %v305_v59 = vpop.permute.xlu2 %304 }
 0x207   : > { %302 = vrot.lane.b32.xlu2 %v4309_v53, %s4070_s30  ;;  %319 = vrot.lane.b32.xlu1 %v4309_v53, %s4068_s28 }
 0x208   : > { %306 = vrot.lane.b32.xlu0 %v4313_v54, %s4070_s30 }
 0x20e   : > { %v4356_v62 = vpop.permute.xlu2 %283 }
 0x20f   : > { %272 = vrot.lane.b32.xlu2 %v4313_v54, %s4071_s2  ;;  %289 = vrot.lane.b32.xlu1 %v4313_v54, %s4072_s3 }
 0x210   : > { %285 = vrot.lane.b32.xlu0 %v4309_v53, %s4072_s3 }
 0x215   : > { %v322_v60 = vpop.permute.xlu1 %321  ;;  %v339_v61 = vpop.permute.xlu0 %338 }
 0x216   : > { %v4358_v3 = vpop.permute.xlu2 %253  ;;  %v4381_v17 = vsel %vm6451_vm10, %v335_v58, %v339_v61  ;;  %v4385_v18 = vsel %vm6451_vm10, %v339_v61, %v335_v58 }
 0x217   : > { %251 = vrot.lane.b32.xlu2 %v4309_v53, %s4073_s4  ;;  %268 = vrot.lane.b32.xlu1 %v4309_v53, %s4071_s2 }
 0x218   : > { %255 = vrot.lane.b32.xlu0 %v4313_v54, %s4073_s4 }
 0x21d   : > { %v301_v63 = vpop.permute.xlu1 %300  ;;  %v318_v0 = vpop.permute.xlu0 %317 }
 0x21e   : > { %v4404_v25 = vsel %vm6449_vm11, %v318_v0, %v322_v60  ;;  %v4408_v26 = vsel %vm6449_vm11, %v322_v60, %v318_v0  ;;  %v4429_v30 = vsel %vm6448_vm12, %v301_v63, %v305_v59  ;;  %v4433_v31 = vsel %vm6448_vm12, %v305_v59, %v301_v63 }
 0x21f   : > { %232 = vrot.lane.b32.xlu2 %v4276_v49, %s4074_s5  ;;  %238 = vrot.lane.b32.xlu1 %v4313_v54, %s4074_s5 }
 0x220   : > { %234 = vrot.lane.b32.xlu0 %v4309_v53, %s4074_s5 }
 0x225   : > { %v4360_v4 = vpop.permute.xlu1 %270  ;;  %v288_v5 = vpop.permute.xlu0 %287 }
 0x226   : > { %v4455_v36 = vsel %vm6450_vm13, %v4356_v62, %v288_v5  ;;  %v4460_v38 = vsel %vm6450_vm13, %v288_v5, %v4356_v62 }
 0x227   : > { %1034 = vrot.lane.b32.xlu1 %v4346_v56, %s4064_s25  ;;  %1036 = vrot.lane.b32.xlu2 %v4348_v57, %s4064_s25 }
 0x228   : > { %236 = vrot.lane.b32.xlu0 %v4280_v50, %s4074_s5 }
 0x22d   : > { %v4362_v8 = vpop.permute.xlu1 %249  ;;  %v4364_v9 = vpop.permute.xlu0 %266 }
 0x22e   : > { %v4483_v45 = vsel %vm6447_vm14, %v4364_v9, %v4360_v4  ;;  %v4489_v46 = vsel %vm6447_vm14, %v4360_v4, %v4364_v9  ;;  %v4512_v52 = vsel %vm257_vm15, %v4362_v8, %v4358_v3  ;;  %v4518_v55 = vsel %vm257_vm15, %v4358_v3, %v4362_v8 }
 0x259   : > { %v324_v6 = vpop.permute.xlu2 %323 }
 0x261   : > { %v303_v12 = vpop.permute.xlu2 %302 }
 0x269   : > { %v273_v24 = vpop.permute.xlu2 %272 }
 0x271   : > { %v341_v13 = vpop.permute.xlu1 %340  ;;  %v252_v39 = vpop.permute.xlu2 %251 }
 0x272   : > { %v337_v14 = vpop.permute.xlu0 %336 }
 0x273   : > { %v4369_v15 = vsel %vm6451_vm10, %v337_v14, %v341_v13  ;;  %v4373_v16 = vsel %vm6451_vm10, %v341_v13, %v337_v14  ;;  %v448_v13 = vmul.f32 %v4280_v50, %v4187_v2 }
 0x274   : > { %511 = vmatpush.msra.mxu0 %v4369_v15  ;;  %624 = vmatpush.msra.mxu1 %v4373_v16 }
 0x275   : > { %737 = vmatpush.msra.mxu2 %v4373_v16  ;;  %850 = vmatpush.msra.mxu3 %v4369_v15 }
 0x276   : > { %512 = vmatpush.msra.mxu0 %v4381_v17  ;;  %625 = vmatpush.msra.mxu1 %v4385_v18 }
 0x277   : > { %738 = vmatpush.msra.mxu2 %v4385_v18  ;;  %851 = vmatpush.msra.mxu3 %v4381_v17 }
 0x279   : > { %v320_v19 = vpop.permute.xlu1 %319  ;;  %v233_v51 = vpop.permute.xlu2 %232 }
 0x27a   : > { %v4394_v20 = vsel %vm6449_vm11, %v320_v19, %v324_v6  ;;  %v4398_v22 = vsel %vm6449_vm11, %v324_v6, %v320_v19  ;;  %v307_v23 = vpop.permute.xlu0 %306  ;;  %v449_v19 = vmul.f32 %v4309_v53, %v4183_v1 }
 0x27b   : > { %513 = vmatpush.msra.mxu0 %v4394_v20  ;;  %626 = vmatpush.msra.mxu1 %v4398_v22  ;;  %v4417_v28 = vsel %vm6448_vm12, %v303_v12, %v307_v23  ;;  %v4421_v29 = vsel %vm6448_vm12, %v307_v23, %v303_v12  ;;  %v447_v12 = vmul.f32 %v4276_v49, %v4183_v1 }
 0x27c   : > { %739 = vmatpush.msra.mxu2 %v4398_v22  ;;  %852 = vmatpush.msra.mxu3 %v4394_v20  ;;  %v450_v23 = vmul.f32 %v4313_v54, %v4187_v2 }
 0x27d   : > { %514 = vmatpush.msra.mxu0 %v4404_v25  ;;  %627 = vmatpush.msra.mxu1 %v4408_v26 }
 0x27e   : > { %740 = vmatpush.msra.mxu2 %v4408_v26  ;;  %853 = vmatpush.msra.mxu3 %v4404_v25 }
 0x27f   : > { %515 = vmatpush.msra.mxu0 %v4417_v28  ;;  %628 = vmatpush.msra.mxu1 %v4421_v29 }
 0x280   : > { %741 = vmatpush.msra.mxu2 %v4421_v29  ;;  %854 = vmatpush.msra.mxu3 %v4417_v28 }
 0x281   : > { %v290_v32 = vpop.permute.xlu1 %289  ;;  %516 = vmatpush.msra.mxu0 %v4429_v30  ;;  %629 = vmatpush.msra.mxu1 %v4433_v31  ;;  %v1037_v62 = vpop.permute.xlu2 %1036 }
 0x282   : > { %742 = vmatpush.msra.mxu2 %v4433_v31  ;;  %855 = vmatpush.msra.mxu3 %v4429_v30  ;;  %v286_v33 = vpop.permute.xlu0 %285 }
 0x283   : > { %v4444_v34 = vsel %vm6450_vm13, %v286_v33, %v290_v32  ;;  %v4448_v35 = vsel %vm6450_vm13, %v290_v32, %v286_v33 }
 0x284   : > { %517 = vmatpush.msra.mxu0 %v4444_v34  ;;  %630 = vmatpush.msra.mxu1 %v4448_v35 }
 0x285   : > { %743 = vmatpush.msra.mxu2 %v4448_v35  ;;  %856 = vmatpush.msra.mxu3 %v4444_v34 }
 0x286   : > { %518 = vmatpush.msra.mxu0 %v4455_v36  ;;  %631 = vmatpush.msra.mxu1 %v4460_v38 }
 0x287   : > { %744 = vmatpush.msra.mxu2 %v4460_v38  ;;  %857 = vmatpush.msra.mxu3 %v4455_v36 }
 0x289   : > { %v269_v40 = vpop.permute.xlu1 %268 }
 0x28a   : > { %v4471_v41 = vsel %vm6447_vm14, %v269_v40, %v273_v24  ;;  %v4475_v42 = vsel %vm6447_vm14, %v273_v24, %v269_v40  ;;  %v256_v43 = vpop.permute.xlu0 %255  ;;  %vm240_vm14 = vcmp.lt.s32.totalorder %v4191_v7, 112  ;;  %v455_v40 = vmul.f32 %v4512_v52, %v4183_v1 }
 0x28b   : > { %519 = vmatpush.msra.mxu0 %v4471_v41  ;;  %632 = vmatpush.msra.mxu1 %v4475_v42  ;;  %v4498_v47 = vsel %vm257_vm15, %v252_v39, %v256_v43  ;;  %v4502_v48 = vsel %vm257_vm15, %v256_v43, %v252_v39  ;;  %v456_v43 = vmul.f32 %v4518_v55, %v4187_v2 }
 0x28c   : > { %745 = vmatpush.msra.mxu2 %v4475_v42  ;;  %858 = vmatpush.msra.mxu3 %v4471_v41 }
 0x28d   : > { %520 = vmatpush.msra.mxu0 %v4483_v45  ;;  %633 = vmatpush.msra.mxu1 %v4489_v46 }
 0x28e   : > { %746 = vmatpush.msra.mxu2 %v4489_v46  ;;  %859 = vmatpush.msra.mxu3 %v4483_v45 }
 0x28f   : > { %521 = vmatpush.msra.mxu0 %v4498_v47  ;;  %634 = vmatpush.msra.mxu1 %v4502_v48 }
 0x290   : > { %747 = vmatpush.msra.mxu2 %v4502_v48  ;;  %860 = vmatpush.msra.mxu3 %v4498_v47 }
 0x291   : > { %v239_v58 = vpop.permute.xlu1 %238  ;;  %522 = vmatpush.msra.mxu0 %v4512_v52  ;;  %635 = vmatpush.msra.mxu1 %v4518_v55 }
 0x292   : > { %748 = vmatpush.msra.mxu2 %v4518_v55  ;;  %861 = vmatpush.msra.mxu3 %v4512_v52  ;;  %v235_v59 = vpop.permute.xlu0 %234 }
 0x293   : > { %v4529_v60 = vsel %vm240_vm14, %v235_v59, %v239_v58  ;;  %v4533_v61 = vsel %vm240_vm14, %v239_v58, %v235_v59  ;;  %v458_v58 = vmul.f32 %v4502_v48, %v4187_v2  ;;  %v459_v59 = vmul.f32 %v4483_v45, %v4183_v1 }
 0x294   : > { %523 = vmatpush.msra.mxu0 %v4529_v60  ;;  %636 = vmatpush.msra.mxu1 %v4533_v61  ;;  %v453_v33 = vmul.f32 %v4529_v60, %v4183_v1  ;;  %v454_v39 = vmul.f32 %v4533_v61, %v4187_v2 }
 0x295   : > { %749 = vmatpush.msra.mxu2 %v4533_v61  ;;  %862 = vmatpush.msra.mxu3 %v4529_v60 }
 0x299   : > { %v1035_v63 = vpop.permute.xlu1 %1034 }
 0x29a   : > { %v1038_v0 = vsel %vm170_vm0, %v1035_v63, %v1037_v62  ;;  %v4543_v3 = vsel %vm170_vm0, %v1037_v62, %v1035_v63  ;;  %v237_v4 = vpop.permute.xlu0 %236  ;;  %v460_v62 = vmul.f32 %v4489_v46, %v4187_v2  ;;  %v461_v63 = vmul.f32 %v4471_v41, %v4183_v1 }
 0x29b   : > { %v4547_v5 = vsel %vm240_vm14, %v233_v51, %v237_v4  ;;  %v4551_v6 = vsel %vm240_vm14, %v237_v4, %v233_v51  ;;  %v4557_v8 = vsel %vm4194_vm1, %v4543_v3, %v4348_v57  ;;  %v4562_v9 = vsel %vm4194_vm1, %v1038_v0, %v4346_v56 }
 0x29c   : > { %524 = vmatpush.msra.mxu0 %v4547_v5  ;;  %637 = vmatpush.msra.mxu1 %v4551_v6  ;;  %v4587_v14 = vsel %vm4198_vm2, %v1038_v0, %v4346_v56  ;;  %v451_v24 = vmul.f32 %v4547_v5, %v4183_v1  ;;  %v452_v32 = vmul.f32 %v4551_v6, %v4187_v2 }
 0x29d   : > { %750 = vmatpush.msra.mxu2 %v4551_v6  ;;  %863 = vmatpush.msra.mxu3 %v4547_v5  ;;  %v457_v51 = vmul.f32 %v4498_v47, %v4183_v1  ;;  %v462_v0 = vmul.f32 %v4475_v42, %v4187_v2  ;;  %v463_v4 = vmul.f32 %v4455_v36, %v4183_v1 }
 0x29e   : > { %1050 = vrot.lane.b32.xlu1 %v4557_v8, %s4065_s17  ;;  %1046 = vrot.lane.b32.xlu0 %v4562_v9, %s4065_s17 }
 0x29f   : > { %525 = vmatpush.msra.mxu0 %v4309_v53  ;;  %638 = vmatpush.msra.mxu1 %v4313_v54 }
 0x2a0   : > { %751 = vmatpush.msra.mxu2 %v4313_v54  ;;  %864 = vmatpush.msra.mxu3 %v4309_v53 }
 0x2a1   : > { %526 = vmatpush.msra.mxu0 %v4276_v49  ;;  %639 = vmatpush.msra.mxu1 %v4280_v50 }
 0x2a2   : > { %752 = vmatpush.msra.mxu2 %v4280_v50  ;;  %865 = vmatpush.msra.mxu3 %v4276_v49 }
 0x2a3   : > { %527 = vmatmul.f32.vlgmr.msra.gmra.mxu0 %v447_v12  ;;  %640 = vmatmul.f32.vlgmr.msra.gmra.mxu1 %v448_v13 }
 0x2a4   : > { %753 = vmatmul.f32.vlgmr.msra.gmra.mxu2 %v447_v12  ;;  %866 = vmatmul.f32.vlgmr.msra.gmra.mxu3 %v448_v13  ;;  %v464_v12 = vmul.f32 %v4460_v38, %v4187_v2  ;;  %v465_v13 = vmul.f32 %v4444_v34, %v4183_v1 }
 0x2a6   : > { %1044 = vrot.lane.b32.xlu1 %v4587_v14, %s4065_s17 }
 0x2ab   : > { %530 = vmatmul.f32.gmra.mxu0 %v449_v19  ;;  %643 = vmatmul.f32.gmra.mxu1 %v450_v23 }
 0x2ac   : > { %756 = vmatmul.f32.gmra.mxu2 %v449_v19  ;;  %869 = vmatmul.f32.gmra.mxu3 %v450_v23  ;;  %v466_v19 = vmul.f32 %v4448_v35, %v4187_v2  ;;  %v467_v23 = vmul.f32 %v4429_v30, %v4183_v1 }
 0x2b3   : > { %533 = vmatmul.f32.gmra.mxu0 %v451_v24  ;;  %646 = vmatmul.f32.gmra.mxu1 %v452_v32 }
 0x2b4   : > { %759 = vmatmul.f32.gmra.mxu2 %v451_v24  ;;  %872 = vmatmul.f32.gmra.mxu3 %v452_v32  ;;  %v468_v24 = vmul.f32 %v4433_v31, %v4187_v2  ;;  %v469_v32 = vmul.f32 %v4417_v28, %v4183_v1 }
 0x2bb   : > { %536 = vmatmul.f32.gmra.mxu0 %v453_v33  ;;  %649 = vmatmul.f32.gmra.mxu1 %v454_v39 }
 0x2bc   : > { %762 = vmatmul.f32.gmra.mxu2 %v453_v33  ;;  %875 = vmatmul.f32.gmra.mxu3 %v454_v39  ;;  %v470_v33 = vmul.f32 %v4421_v29, %v4187_v2  ;;  %v471_v39 = vmul.f32 %v4404_v25, %v4183_v1 }
 0x2c3   : > { %539 = vmatmul.f32.gmra.mxu0 %v455_v40  ;;  %652 = vmatmul.f32.gmra.mxu1 %v456_v43 }
 0x2c4   : > { %765 = vmatmul.f32.gmra.mxu2 %v455_v40  ;;  %878 = vmatmul.f32.gmra.mxu3 %v456_v43  ;;  %v472_v40 = vmul.f32 %v4408_v26, %v4187_v2  ;;  %v473_v43 = vmul.f32 %v4394_v20, %v4183_v1 }
 0x2cb   : > { %542 = vmatmul.f32.gmra.mxu0 %v457_v51  ;;  %655 = vmatmul.f32.gmra.mxu1 %v458_v58 }
 0x2cc   : > { %768 = vmatmul.f32.gmra.mxu2 %v457_v51  ;;  %881 = vmatmul.f32.gmra.mxu3 %v458_v58  ;;  %v474_v51 = vmul.f32 %v4398_v22, %v4187_v2 }
 0x2d3   : > { %545 = vmatmul.f32.gmra.mxu0 %v459_v59  ;;  %658 = vmatmul.f32.gmra.mxu1 %v460_v62 }
 0x2d4   : > { %771 = vmatmul.f32.gmra.mxu2 %v459_v59  ;;  %884 = vmatmul.f32.gmra.mxu3 %v460_v62 }
 0x2db   : > { %548 = vmatmul.f32.gmra.mxu0 %v461_v63  ;;  %661 = vmatmul.f32.gmra.mxu1 %v462_v0 }
 0x2dc   : > { %774 = vmatmul.f32.gmra.mxu2 %v461_v63  ;;  %887 = vmatmul.f32.gmra.mxu3 %v462_v0  ;;  %v475_v0 = vmul.f32 %v4381_v17, %v4183_v1 }
 0x2e3   : > { %551 = vmatmul.f32.gmra.mxu0 %v463_v4  ;;  %664 = vmatmul.f32.gmra.mxu1 %v464_v12 }
 0x2e4   : > { %777 = vmatmul.f32.gmra.mxu2 %v463_v4  ;;  %890 = vmatmul.f32.gmra.mxu3 %v464_v12  ;;  %v476_v4 = vmul.f32 %v4385_v18, %v4187_v2 }
 0x2eb   : > { %554 = vmatmul.f32.gmra.mxu0 %v465_v13  ;;  %667 = vmatmul.f32.gmra.mxu1 %v466_v19 }
 0x2ec   : > { %780 = vmatmul.f32.gmra.mxu2 %v465_v13  ;;  %893 = vmatmul.f32.gmra.mxu3 %v466_v19  ;;  %v478_v19 = vmul.f32 %v4373_v16, %v4187_v2 }
 0x2f3   : > { %557 = vmatmul.f32.gmra.mxu0 %v467_v23  ;;  %670 = vmatmul.f32.gmra.mxu1 %v468_v24 }
 0x2f4   : > { %783 = vmatmul.f32.gmra.mxu2 %v467_v23  ;;  %896 = vmatmul.f32.gmra.mxu3 %v468_v24 }
 0x2fb   : > { %560 = vmatmul.f32.gmra.mxu0 %v469_v32  ;;  %673 = vmatmul.f32.gmra.mxu1 %v470_v33 }
 0x2fc   : > { %786 = vmatmul.f32.gmra.mxu2 %v469_v32  ;;  %899 = vmatmul.f32.gmra.mxu3 %v470_v33  ;;  %v479_v33 = vmul.f32 %v4280_v50, %v4183_v1  ;;  %v481_v50 = vmul.f32 %v4313_v54, %v4183_v1  ;;  %v483_v54 = vmul.f32 %v4551_v6, %v4183_v1 }
 0x2fd   : > { %v485_v6 = vmul.f32 %v4533_v61, %v4183_v1  ;;  %v487_v61 = vmul.f32 %v4518_v55, %v4183_v1  ;;  %v489_v55 = vmul.f32 %v4502_v48, %v4183_v1  ;;  %v491_v48 = vmul.f32 %v4489_v46, %v4183_v1 }
 0x2fe   : > { %v493_v46 = vmul.f32 %v4475_v42, %v4183_v1  ;;  %v495_v42 = vmul.f32 %v4460_v38, %v4183_v1  ;;  %v497_v38 = vmul.f32 %v4448_v35, %v4183_v1  ;;  %v499_v35 = vmul.f32 %v4433_v31, %v4183_v1 }
 0x303   : > { %563 = vmatmul.f32.gmra.mxu0 %v471_v39  ;;  %676 = vmatmul.f32.gmra.mxu1 %v472_v40 }
 0x304   : > { %789 = vmatmul.f32.gmra.mxu2 %v471_v39  ;;  %902 = vmatmul.f32.gmra.mxu3 %v472_v40  ;;  %v480_v39 = vmul.f32 %v4276_v49, %v4187_v2  ;;  %v482_v49 = vmul.f32 %v4309_v53, %v4187_v2  ;;  %v484_v53 = vmul.f32 %v4547_v5, %v4187_v2 }
 0x305   : > { %v486_v5 = vmul.f32 %v4529_v60, %v4187_v2  ;;  %v488_v60 = vmul.f32 %v4512_v52, %v4187_v2  ;;  %v490_v52 = vmul.f32 %v4498_v47, %v4187_v2  ;;  %v492_v47 = vmul.f32 %v4483_v45, %v4187_v2 }
 0x306   : > { %v494_v45 = vmul.f32 %v4471_v41, %v4187_v2  ;;  %v496_v41 = vmul.f32 %v4455_v36, %v4187_v2  ;;  %v498_v36 = vmul.f32 %v4444_v34, %v4187_v2 }
 0x30b   : > { %566 = vmatmul.f32.gmra.mxu0 %v473_v43  ;;  %679 = vmatmul.f32.gmra.mxu1 %v474_v51 }
 0x30c   : > { %792 = vmatmul.f32.gmra.mxu2 %v473_v43  ;;  %905 = vmatmul.f32.gmra.mxu3 %v474_v51 }
 0x310   : > { %v1051_v58 = vpop.permute.xlu1 %1050  ;;  %v1047_v59 = vpop.permute.xlu0 %1046 }
 0x311   : > { %v1053_v62 = vsel %vm185_vm3, %v1047_v59, %v1051_v58  ;;  %v1055_v63 = vsel %vm185_vm3, %v1051_v58, %v1047_v59 }
 0x312   : > { %v4654_v12 = vsel %vm4223_vm4, %v1055_v63, %v4557_v8  ;;  %v4659_v13 = vsel %vm4223_vm4, %v1053_v62, %v4562_v9  ;;  %v477_v8 = vmul.f32 %v4369_v15, %v4183_v1  ;;  %v4673_v9 = vsel %vm4198_vm2, %v4543_v3, %v4348_v57 }
 0x313   : > { %569 = vmatmul.f32.gmra.mxu0 %v475_v0  ;;  %682 = vmatmul.f32.gmra.mxu1 %v476_v4 }
 0x314   : > { %795 = vmatmul.f32.gmra.mxu2 %v475_v0  ;;  %908 = vmatmul.f32.gmra.mxu3 %v476_v4 }
 0x315   : > { %1066 = vrot.lane.b32.xlu0 %v4654_v12, %s4066_s26  ;;  %1062 = vrot.lane.b32.xlu2 %v4659_v13, %s4066_s26 }
 0x31b   : > { %572 = vmatmul.f32.gmra.mxu0 %v477_v8  ;;  %685 = vmatmul.f32.gmra.mxu1 %v478_v19 }
 0x31c   : > { %798 = vmatmul.f32.gmra.mxu2 %v477_v8  ;;  %911 = vmatmul.f32.gmra.mxu3 %v478_v19 }
 0x31d   : > { %1048 = vrot.lane.b32.xlu2 %v4673_v9, %s4065_s17 }
 0x320   : > { %v528_v23 = vpop.f32.mrf.mxu0  ;;  %v641_v24 = vpop.f32.mrf.mxu1 }
 0x321   : > { %v642_v32 = vadd.f32 %v641_v24, %v528_v23 }
 0x323   : > { %963 = vst [vmem:[%s4682_s13] sm:$0xff] %v642_v32  ;;  %575 = vmatmul.f32.gmra.mxu0 %v479_v33  ;;  %688 = vmatmul.f32.gmra.mxu1 %v480_v39 }
 0x324   : > { %801 = vmatmul.f32.gmra.mxu2 %v479_v33  ;;  %914 = vmatmul.f32.gmra.mxu3 %v480_v39 }
 0x327   : > { %v754_v3 = vpop.f32.mrf.mxu2  ;;  %v867_v40 = vpop.f32.mrf.mxu3 }
 0x328   : > { %v868_v43 = vadd.f32 %v867_v40, %v754_v3  ;;  %v531_v51 = vpop.f32.mrf.mxu0  ;;  %v644_v58 = vpop.f32.mrf.mxu1 }
 0x329   : > { %v645_v59 = vadd.f32 %v644_v58, %v531_v51 }
 0x32a   : > { %964 = vst [vmem:[%s4682_s13 + $0x8] sm:$0xff] %v868_v43 }
 0x32b   : > { %965 = vst [vmem:[%s4682_s13 + $0x10] sm:$0xff] %v645_v59  ;;  %578 = vmatmul.f32.gmra.mxu0 %v481_v50  ;;  %691 = vmatmul.f32.gmra.mxu1 %v482_v49 }
 0x32c   : > { %804 = vmatmul.f32.gmra.mxu2 %v481_v50  ;;  %917 = vmatmul.f32.gmra.mxu3 %v482_v49 }
 0x32f   : > { %v757_v62 = vpop.f32.mrf.mxu2  ;;  %v870_v63 = vpop.f32.mrf.mxu3 }
 0x330   : > { %v871_v0 = vadd.f32 %v870_v63, %v757_v62  ;;  %v534_v4 = vpop.f32.mrf.mxu0  ;;  %v647_v8 = vpop.f32.mrf.mxu1 }
 0x331   : > { %v648_v19 = vadd.f32 %v647_v8, %v534_v4 }
 0x332   : > { %966 = vst [vmem:[%s4682_s13 + $0x18] sm:$0xff] %v871_v0 }
 0x333   : > { %967 = vst [vmem:[%s4682_s13 + $0x20] sm:$0xff] %v648_v19  ;;  %581 = vmatmul.f32.gmra.mxu0 %v483_v54  ;;  %694 = vmatmul.f32.gmra.mxu1 %v484_v53 }
 0x334   : > { %807 = vmatmul.f32.gmra.mxu2 %v483_v54  ;;  %920 = vmatmul.f32.gmra.mxu3 %v484_v53 }
 0x337   : > { %v760_v23 = vpop.f32.mrf.mxu2  ;;  %v873_v24 = vpop.f32.mrf.mxu3 }
 0x338   : > { %v874_v32 = vadd.f32 %v873_v24, %v760_v23  ;;  %v537_v33 = vpop.f32.mrf.mxu0  ;;  %v650_v39 = vpop.f32.mrf.mxu1 }
 0x339   : > { %v651_v3 = vadd.f32 %v650_v39, %v537_v33 }
 0x33a   : > { %968 = vst [vmem:[%s4682_s13 + $0x28] sm:$0xff] %v874_v32 }
 0x33b   : > { %969 = vst [vmem:[%s4682_s13 + $0x30] sm:$0xff] %v651_v3  ;;  %584 = vmatmul.f32.gmra.mxu0 %v485_v6  ;;  %697 = vmatmul.f32.gmra.mxu1 %v486_v5 }
 0x33c   : > { %810 = vmatmul.f32.gmra.mxu2 %v485_v6  ;;  %923 = vmatmul.f32.gmra.mxu3 %v486_v5 }
 0x33f   : > { %v763_v40 = vpop.f32.mrf.mxu2  ;;  %v876_v43 = vpop.f32.mrf.mxu3 }
 0x340   : > { %v877_v51 = vadd.f32 %v876_v43, %v763_v40  ;;  %v540_v58 = vpop.f32.mrf.mxu0  ;;  %v653_v59 = vpop.f32.mrf.mxu1 }
 0x341   : > { %v654_v50 = vadd.f32 %v653_v59, %v540_v58 }
 0x342   : > { %970 = vst [vmem:[%s4682_s13 + $0x38] sm:$0xff] %v877_v51 }
 0x343   : > { %971 = vst [vmem:[%s4682_s13 + $0x40] sm:$0xff] %v654_v50  ;;  %587 = vmatmul.f32.gmra.mxu0 %v487_v61  ;;  %700 = vmatmul.f32.gmra.mxu1 %v488_v60 }
 0x344   : > { %813 = vmatmul.f32.gmra.mxu2 %v487_v61  ;;  %926 = vmatmul.f32.gmra.mxu3 %v488_v60 }
 0x347   : > { %v766_v49 = vpop.f32.mrf.mxu2  ;;  %v879_v62 = vpop.f32.mrf.mxu3 }
 0x348   : > { %v880_v63 = vadd.f32 %v879_v62, %v766_v49  ;;  %v543_v0 = vpop.f32.mrf.mxu0  ;;  %v656_v4 = vpop.f32.mrf.mxu1 }
 0x349   : > { %v657_v8 = vadd.f32 %v656_v4, %v543_v0 }
 0x34a   : > { %972 = vst [vmem:[%s4682_s13 + $0x48] sm:$0xff] %v880_v63 }
 0x34b   : > { %973 = vst [vmem:[%s4682_s13 + $0x50] sm:$0xff] %v657_v8  ;;  %590 = vmatmul.f32.gmra.mxu0 %v489_v55  ;;  %703 = vmatmul.f32.gmra.mxu1 %v490_v52 }
 0x34c   : > { %816 = vmatmul.f32.gmra.mxu2 %v489_v55  ;;  %929 = vmatmul.f32.gmra.mxu3 %v490_v52 }
 0x34f   : > { %v769_v19 = vpop.f32.mrf.mxu2  ;;  %v882_v54 = vpop.f32.mrf.mxu3 }
 0x350   : > { %v883_v53 = vadd.f32 %v882_v54, %v769_v19  ;;  %v546_v23 = vpop.f32.mrf.mxu0  ;;  %v659_v24 = vpop.f32.mrf.mxu1 }
 0x351   : > { %v660_v32 = vadd.f32 %v659_v24, %v546_v23  ;;  %v500_v23 = vmul.f32 %v4429_v30, %v4187_v2  ;;  %v1045_v24 = vpop.permute.xlu1 %1044  ;;  %v501_v30 = vmul.f32 %v4421_v29, %v4183_v1 }
 0x352   : > { %974 = vst [vmem:[%s4682_s13 + $0x58] sm:$0xff] %v883_v53 }
 0x353   : > { %975 = vst [vmem:[%s4682_s13 + $0x60] sm:$0xff] %v660_v32  ;;  %593 = vmatmul.f32.gmra.mxu0 %v491_v48  ;;  %706 = vmatmul.f32.gmra.mxu1 %v492_v47 }
 0x354   : > { %819 = vmatmul.f32.gmra.mxu2 %v491_v48  ;;  %932 = vmatmul.f32.gmra.mxu3 %v492_v47 }
 0x357   : > { %v772_v33 = vpop.f32.mrf.mxu2  ;;  %v885_v39 = vpop.f32.mrf.mxu3 }
 0x358   : > { %v886_v3 = vadd.f32 %v885_v39, %v772_v33  ;;  %v549_v6 = vpop.f32.mrf.mxu0  ;;  %v662_v5 = vpop.f32.mrf.mxu1 }
 0x359   : > { %v663_v40 = vadd.f32 %v662_v5, %v549_v6 }
 0x35a   : > { %976 = vst [vmem:[%s4682_s13 + $0x68] sm:$0xff] %v886_v3 }
 0x35b   : > { %977 = vst [vmem:[%s4682_s13 + $0x70] sm:$0xff] %v663_v40  ;;  %596 = vmatmul.f32.gmra.mxu0 %v493_v46  ;;  %709 = vmatmul.f32.gmra.mxu1 %v494_v45  ;;  %v502_v40 = vmul.f32 %v4417_v28, %v4187_v2  ;;  %v504_v28 = vmul.f32 %v4404_v25, %v4187_v2 }
 0x35c   : > { %822 = vmatmul.f32.gmra.mxu2 %v493_v46  ;;  %935 = vmatmul.f32.gmra.mxu3 %v494_v45  ;;  %v505_v25 = vmul.f32 %v4398_v22, %v4183_v1 }
 0x35f   : > { %v775_v43 = vpop.f32.mrf.mxu2  ;;  %v888_v51 = vpop.f32.mrf.mxu3 }
 0x360   : > { %v889_v58 = vadd.f32 %v888_v51, %v775_v43  ;;  %v552_v59 = vpop.f32.mrf.mxu0  ;;  %v665_v50 = vpop.f32.mrf.mxu1 }
 0x361   : > { %v666_v61 = vadd.f32 %v665_v50, %v552_v59 }
 0x362   : > { %978 = vst [vmem:[%s4682_s13 + $0x78] sm:$0xff] %v889_v58 }
 0x363   : > { %979 = vst [vmem:[%s4682_s13 + $0x80] sm:$0xff] %v666_v61  ;;  %599 = vmatmul.f32.gmra.mxu0 %v495_v42  ;;  %712 = vmatmul.f32.gmra.mxu1 %v496_v41 }
 0x364   : > { %825 = vmatmul.f32.gmra.mxu2 %v495_v42  ;;  %938 = vmatmul.f32.gmra.mxu3 %v496_v41 }
 0x367   : > { %v778_v60 = vpop.f32.mrf.mxu2  ;;  %v891_v49 = vpop.f32.mrf.mxu3 }
 0x368   : > { %v892_v62 = vadd.f32 %v891_v49, %v778_v60  ;;  %v555_v63 = vpop.f32.mrf.mxu0  ;;  %v668_v0 = vpop.f32.mrf.mxu1 }
 0x369   : > { %v669_v4 = vadd.f32 %v668_v0, %v555_v63 }
 0x36a   : > { %980 = vst [vmem:[%s4682_s13 + $0x88] sm:$0xff] %v892_v62 }
 0x36b   : > { %981 = vst [vmem:[%s4682_s13 + $0x90] sm:$0xff] %v669_v4  ;;  %602 = vmatmul.f32.gmra.mxu0 %v497_v38  ;;  %715 = vmatmul.f32.gmra.mxu1 %v498_v36  ;;  %v506_v4 = vmul.f32 %v4394_v20, %v4187_v2 }
 0x36c   : > { %828 = vmatmul.f32.gmra.mxu2 %v497_v38  ;;  %941 = vmatmul.f32.gmra.mxu3 %v498_v36 }
 0x36f   : > { %v781_v8 = vpop.f32.mrf.mxu2  ;;  %v894_v55 = vpop.f32.mrf.mxu3 }
 0x370   : > { %v895_v52 = vadd.f32 %v894_v55, %v781_v8  ;;  %v1063_v19 = vpop.permute.xlu2 %1062  ;;  %v558_v54 = vpop.f32.mrf.mxu0 }
 0x371   : > { %v671_v53 = vpop.f32.mrf.mxu1 }
 0x372   : > { %982 = vst [vmem:[%s4682_s13 + $0x98] sm:$0xff] %v895_v52  ;;  %v672_v34 = vadd.f32 %v671_v53, %v558_v54  ;;  %v507_v52 = vmul.f32 %v4385_v18, %v4183_v1 }
 0x373   : > { %605 = vmatmul.f32.gmra.mxu0 %v499_v35  ;;  %718 = vmatmul.f32.gmra.mxu1 %v500_v23 }
 0x374   : > { %983 = vst [vmem:[%s4682_s13 + $0xa0] sm:$0xff] %v672_v34  ;;  %831 = vmatmul.f32.gmra.mxu2 %v499_v35  ;;  %944 = vmatmul.f32.gmra.mxu3 %v500_v23  ;;  %v510_v34 = vmul.f32 %v4369_v15, %v4187_v2 }
 0x377   : > { %v784_v32 = vpop.f32.mrf.mxu2  ;;  %v897_v48 = vpop.f32.mrf.mxu3 }
 0x378   : > { %v898_v47 = vadd.f32 %v897_v48, %v784_v32  ;;  %v1049_v33 = vpop.permute.xlu2 %1048  ;;  %v561_v39 = vpop.f32.mrf.mxu0 }
 0x379   : > { %v1052_v31 = vsel %vm185_vm3, %v1045_v24, %v1049_v33  ;;  %v674_v3 = vpop.f32.mrf.mxu1  ;;  %v1054_v22 = vsel %vm185_vm3, %v1049_v33, %v1045_v24 }
 0x37a   : > { %984 = vst [vmem:[%s4682_s13 + $0xa8] sm:$0xff] %v898_v47  ;;  %v675_v6 = vadd.f32 %v674_v3, %v561_v39  ;;  %v4753_v5 = vsel %vm4234_vm5, %v1052_v31, %v4587_v14  ;;  %v503_v14 = vmul.f32 %v4408_v26, %v4183_v1  ;;  %v4790_v55 = vsel %vm4234_vm5, %v1054_v22, %v4673_v9 }
 0x37b   : > { %1060 = vrot.lane.b32.xlu2 %v4753_v5, %s4066_s26  ;;  %608 = vmatmul.f32.gmra.mxu0 %v501_v30 }
 0x37c   : > { %985 = vst [vmem:[%s4682_s13 + $0xb0] sm:$0xff] %v675_v6  ;;  %721 = vmatmul.f32.gmra.mxu1 %v502_v40  ;;  %834 = vmatmul.f32.gmra.mxu2 %v501_v30 }
 0x37d   : > { %947 = vmatmul.f32.gmra.mxu3 %v502_v40 }
 0x37f   : > { %v787_v29 = vpop.f32.mrf.mxu2  ;;  %v900_v46 = vpop.f32.mrf.mxu3 }
 0x380   : > { %v901_v45 = vadd.f32 %v900_v46, %v787_v29  ;;  %v564_v43 = vpop.f32.mrf.mxu0 }
 0x381   : > { %v677_v51 = vpop.f32.mrf.mxu1 }
 0x382   : > { %986 = vst [vmem:[%s4682_s13 + $0xb8] sm:$0xff] %v901_v45  ;;  %v678_v58 = vadd.f32 %v677_v51, %v564_v43 }
 0x383   : > { %611 = vmatmul.f32.gmra.mxu0 %v503_v14 }
 0x384   : > { %987 = vst [vmem:[%s4682_s13 + $0xc0] sm:$0xff] %v678_v58  ;;  %724 = vmatmul.f32.gmra.mxu1 %v504_v28  ;;  %837 = vmatmul.f32.gmra.mxu2 %v503_v14 }
 0x385   : > { %950 = vmatmul.f32.gmra.mxu3 %v504_v28 }
 0x387   : > { %v790_v59 = vpop.f32.mrf.mxu2  ;;  %v903_v50 = vpop.f32.mrf.mxu3 }
 0x388   : > { %v904_v61 = vadd.f32 %v903_v50, %v790_v59  ;;  %v1067_v42 = vpop.permute.xlu0 %1066  ;;  %v567_v41 = vpop.f32.mrf.mxu0 }
 0x389   : > { %v1069_v26 = vsel %vm202_vm6, %v1063_v19, %v1067_v42  ;;  %v1071_v60 = vsel %vm202_vm6, %v1067_v42, %v1063_v19  ;;  %v680_v49 = vpop.f32.mrf.mxu1  ;;  %v508_v19 = vmul.f32 %v4381_v17, %v4187_v2  ;;  %v509_v17 = vmul.f32 %v4373_v16, %v4183_v1 }
 0x38a   : > { %988 = vst [vmem:[%s4682_s13 + $0xc8] sm:$0xff] %v904_v61  ;;  %v681_v62 = vadd.f32 %v680_v49, %v567_v41  ;;  %v1075_v63 = vsel %vm4252_vm7, %v1071_v60, %v4654_v12  ;;  %v1074_v0 = vsel %vm4252_vm7, %v1069_v26, %v4659_v13 }
 0x38b   : > { %1082 = vrot.lane.b32.xlu1 %v1075_v63, %s4067_s27  ;;  %1078 = vrot.lane.b32.xlu0 %v1074_v0, %s4067_s27 }
 0x38c   : > { %989 = vst [vmem:[%s4682_s13 + $0xd0] sm:$0xff] %v681_v62  ;;  %614 = vmatmul.f32.gmra.mxu0 %v505_v25  ;;  %727 = vmatmul.f32.gmra.mxu1 %v506_v4 }
 0x38d   : > { %840 = vmatmul.f32.gmra.mxu2 %v505_v25  ;;  %953 = vmatmul.f32.gmra.mxu3 %v506_v4 }
 0x38f   : > { %v793_v12 = vpop.f32.mrf.mxu2  ;;  %v906_v38 = vpop.f32.mrf.mxu3 }
 0x390   : > { %v907_v36 = vadd.f32 %v906_v38, %v793_v12  ;;  %v570_v13 = vpop.f32.mrf.mxu0 }
 0x391   : > { %v683_v8 = vpop.f32.mrf.mxu1 }
 0x392   : > { %990 = vst [vmem:[%s4682_s13 + $0xd8] sm:$0xff] %v907_v36  ;;  %v684_v20 = vadd.f32 %v683_v8, %v570_v13 }
 0x393   : > { %1064 = vrot.lane.b32.xlu0 %v4790_v55, %s4066_s26 }
 0x394   : > { %991 = vst [vmem:[%s4682_s13 + $0xe0] sm:$0xff] %v684_v20  ;;  %617 = vmatmul.f32.gmra.mxu0 %v507_v52  ;;  %730 = vmatmul.f32.gmra.mxu1 %v508_v19 }
 0x395   : > { %843 = vmatmul.f32.gmra.mxu2 %v507_v52  ;;  %956 = vmatmul.f32.gmra.mxu3 %v508_v19 }
 0x397   : > { %v796_v54 = vpop.f32.mrf.mxu2  ;;  %v909_v53 = vpop.f32.mrf.mxu3 }
 0x398   : > { %v910_v35 = vadd.f32 %v909_v53, %v796_v54  ;;  %v573_v9 = vpop.f32.mrf.mxu0 }
 0x399   : > { %v686_v23 = vpop.f32.mrf.mxu1 }
 0x39a   : > { %992 = vst [vmem:[%s4682_s13 + $0xe8] sm:$0xff] %v910_v35  ;;  %v687_v18 = vadd.f32 %v686_v23, %v573_v9 }
 0x39c   : > { %993 = vst [vmem:[%s4682_s13 + $0xf0] sm:$0xff] %v687_v18  ;;  %620 = vmatmul.f32.gmra.mxu0 %v509_v17  ;;  %733 = vmatmul.f32.gmra.mxu1 %v510_v34 }
 0x39d   : > { %846 = vmatmul.f32.gmra.mxu2 %v509_v17  ;;  %959 = vmatmul.f32.gmra.mxu3 %v510_v34 }
 0x39f   : > { %v799_v24 = vpop.f32.mrf.mxu2  ;;  %v912_v32 = vpop.f32.mrf.mxu3 }
 0x3a0   : > { %v913_v48 = vadd.f32 %v912_v32, %v799_v24  ;;  %v576_v47 = vpop.f32.mrf.mxu0 }
 0x3a1   : > { %v689_v33 = vpop.f32.mrf.mxu1 }
 0x3a2   : > { %994 = vst [vmem:[%s4682_s13 + $0xf8] sm:$0xff] %v913_v48  ;;  %v690_v39 = vadd.f32 %v689_v33, %v576_v47 }
 0x3a4   : > { %995 = vst [vmem:[%s4682_s13 + $0x100] sm:$0xff] %v690_v39 }
 0x3a7   : > { %v802_v1 = vpop.f32.mrf.mxu2  ;;  %v915_v16 = vpop.f32.mrf.mxu3 }
 0x3a8   : > { %v916_v2 = vadd.f32 %v915_v16, %v802_v1  ;;  %v579_v15 = vpop.f32.mrf.mxu0 }
 0x3a9   : > { %v692_v31 = vpop.f32.mrf.mxu1 }
 0x3aa   : > { %996 = vst [vmem:[%s4682_s13 + $0x108] sm:$0xff] %v916_v2  ;;  %v693_v3 = vadd.f32 %v692_v31, %v579_v15 }
 0x3ac   : > { %997 = vst [vmem:[%s4682_s13 + $0x110] sm:$0xff] %v693_v3 }
 0x3af   : > { %v805_v30 = vpop.f32.mrf.mxu2  ;;  %v918_v6 = vpop.f32.mrf.mxu3 }
 0x3b0   : > { %v919_v40 = vadd.f32 %v918_v6, %v805_v30  ;;  %v582_v29 = vpop.f32.mrf.mxu0 }
 0x3b1   : > { %v695_v46 = vpop.f32.mrf.mxu1 }
 0x3b2   : > { %998 = vst [vmem:[%s4682_s13 + $0x118] sm:$0xff] %v919_v40  ;;  %v696_v45 = vadd.f32 %v695_v46, %v582_v29 }
 0x3b4   : > { %999 = vst [vmem:[%s4682_s13 + $0x120] sm:$0xff] %v696_v45 }
 0x3b7   : > { %v808_v43 = vpop.f32.mrf.mxu2  ;;  %v921_v51 = vpop.f32.mrf.mxu3 }
 0x3b8   : > { %v922_v14 = vadd.f32 %v921_v51, %v808_v43  ;;  %v585_v58 = vpop.f32.mrf.mxu0 }
 0x3b9   : > { %v698_v28 = vpop.f32.mrf.mxu1 }
 0x3ba   : > { %1000 = vst [vmem:[%s4682_s13 + $0x128] sm:$0xff] %v922_v14  ;;  %v699_v59 = vadd.f32 %v698_v28, %v585_v58 }
 0x3bc   : > { %1001 = vst [vmem:[%s4682_s13 + $0x130] sm:$0xff] %v699_v59 }
 0x3bf   : > { %v811_v50 = vpop.f32.mrf.mxu2  ;;  %v924_v61 = vpop.f32.mrf.mxu3 }
 0x3c0   : > { %v925_v42 = vadd.f32 %v924_v61, %v811_v50  ;;  %v588_v41 = vpop.f32.mrf.mxu0 }
 0x3c1   : > { %v701_v26 = vpop.f32.mrf.mxu1 }
 0x3c2   : > { %1002 = vst [vmem:[%s4682_s13 + $0x138] sm:$0xff] %v925_v42  ;;  %v702_v60 = vadd.f32 %v701_v26, %v588_v41 }
 0x3c4   : > { %1003 = vst [vmem:[%s4682_s13 + $0x140] sm:$0xff] %v702_v60 }
 0x3c7   : > { %v814_v49 = vpop.f32.mrf.mxu2  ;;  %v927_v25 = vpop.f32.mrf.mxu3 }
 0x3c8   : > { %v928_v62 = vadd.f32 %v927_v25, %v814_v49  ;;  %v591_v63 = vpop.f32.mrf.mxu0 }
 0x3c9   : > { %v704_v0 = vpop.f32.mrf.mxu1 }
 0x3ca   : > { %1004 = vst [vmem:[%s4682_s13 + $0x148] sm:$0xff] %v928_v62  ;;  %v705_v4 = vadd.f32 %v704_v0, %v591_v63 }
 0x3cc   : > { %1005 = vst [vmem:[%s4682_s13 + $0x150] sm:$0xff] %v705_v4 }
 0x3cf   : > { %v817_v22 = vpop.f32.mrf.mxu2  ;;  %v930_v12 = vpop.f32.mrf.mxu3 }
 0x3d0   : > { %v931_v38 = vadd.f32 %v930_v12, %v817_v22  ;;  %v594_v36 = vpop.f32.mrf.mxu0 }
 0x3d1   : > { %v707_v13 = vpop.f32.mrf.mxu1 }
 0x3d2   : > { %1006 = vst [vmem:[%s4682_s13 + $0x158] sm:$0xff] %v931_v38  ;;  %v708_v8 = vadd.f32 %v707_v13, %v594_v36 }
 0x3d4   : > { %1007 = vst [vmem:[%s4682_s13 + $0x160] sm:$0xff] %v708_v8 }
 0x3d5   : > { %v1061_v42 = vpop.permute.xlu2 %1060 }
 0x3d7   : > { %v820_v20 = vpop.f32.mrf.mxu2  ;;  %v933_v52 = vpop.f32.mrf.mxu3 }
 0x3d8   : > { %v934_v19 = vadd.f32 %v933_v52, %v820_v20  ;;  %v597_v54 = vpop.f32.mrf.mxu0 }
 0x3d9   : > { %v710_v53 = vpop.f32.mrf.mxu1 }
 0x3da   : > { %1008 = vst [vmem:[%s4682_s13 + $0x168] sm:$0xff] %v934_v19  ;;  %v711_v35 = vadd.f32 %v710_v53, %v597_v54 }
 0x3dc   : > { %1009 = vst [vmem:[%s4682_s13 + $0x170] sm:$0xff] %v711_v35 }
 0x3df   : > { %v823_v9 = vpop.f32.mrf.mxu2  ;;  %v936_v23 = vpop.f32.mrf.mxu3 }
 0x3e0   : > { %v937_v18 = vadd.f32 %v936_v23, %v823_v9  ;;  %v600_v17 = vpop.f32.mrf.mxu0 }
 0x3e1   : > { %v713_v34 = vpop.f32.mrf.mxu1 }
 0x3e2   : > { %1010 = vst [vmem:[%s4682_s13 + $0x178] sm:$0xff] %v937_v18  ;;  %v714_v24 = vadd.f32 %v713_v34, %v600_v17 }
 0x3e4   : > { %1011 = vst [vmem:[%s4682_s13 + $0x180] sm:$0xff] %v714_v24 }
 0x3e7   : > { %v826_v32 = vpop.f32.mrf.mxu2  ;;  %v939_v48 = vpop.f32.mrf.mxu3 }
 0x3e8   : > { %v940_v47 = vadd.f32 %v939_v48, %v826_v32  ;;  %v603_v33 = vpop.f32.mrf.mxu0  ;;  %v3765_v32 = vld [vmem:[%s4176_s24 + $0x4] sm:$0x3] }
 0x3e9   : > { %v716_v39 = vpop.f32.mrf.mxu1  ;;  %v4915_v48 = vperm.slane %v3765_v32, 0 }
 0x3ea   : > { %1012 = vst [vmem:[%s4682_s13 + $0x188] sm:$0xff] %v940_v47  ;;  %v717_v1 = vadd.f32 %v716_v39, %v603_v33  ;;  %v4917_v47 = vperm.slane %v3765_v32, 1 }
 0x3ec   : > { %1013 = vst [vmem:[%s4682_s13 + $0x190] sm:$0xff] %v717_v1 }
 0x3ef   : > { %v829_v16 = vpop.f32.mrf.mxu2  ;;  %v942_v2 = vpop.f32.mrf.mxu3 }
 0x3f0   : > { %v943_v15 = vadd.f32 %v942_v2, %v829_v16  ;;  %v606_v31 = vpop.f32.mrf.mxu0 }
 0x3f1   : > { %v719_v3 = vpop.f32.mrf.mxu1 }
 0x3f2   : > { %1014 = vst [vmem:[%s4682_s13 + $0x198] sm:$0xff] %v943_v15  ;;  %v720_v30 = vadd.f32 %v719_v3, %v606_v31 }
 0x3f4   : > { %1015 = vst [vmem:[%s4682_s13 + $0x1a0] sm:$0xff] %v720_v30 }
 0x3f7   : > { %v832_v6 = vpop.f32.mrf.mxu2  ;;  %v945_v40 = vpop.f32.mrf.mxu3 }
 0x3f8   : > { %v946_v29 = vadd.f32 %v945_v40, %v832_v6  ;;  %v609_v46 = vpop.f32.mrf.mxu0 }
 0x3f9   : > { %v722_v45 = vpop.f32.mrf.mxu1 }
 0x3fa   : > { %1016 = vst [vmem:[%s4682_s13 + $0x1a8] sm:$0xff] %v946_v29  ;;  %v723_v43 = vadd.f32 %v722_v45, %v609_v46 }
 0x3fc   : > { %1017 = vst [vmem:[%s4682_s13 + $0x1b0] sm:$0xff] %v723_v43 }
 0x3fd   : > { %v1079_v51 = vpop.permute.xlu0 %1078  ;;  %v1083_v17 = vpop.permute.xlu1 %1082 }
 0x3fe   : > { %v4878_v34 = vsel %vm219_vm9, %v1079_v51, %v1083_v17  ;;  %v4882_v24 = vsel %vm219_vm9, %v1083_v17, %v1079_v51 }
 0x3ff   : > { %v835_v14 = vpop.f32.mrf.mxu2 }
 0x400   : > { %v948_v58 = vpop.f32.mrf.mxu3  ;;  %v612_v28 = vpop.f32.mrf.mxu0 }
 0x401   : > { %v949_v59 = vadd.f32 %v948_v58, %v835_v14  ;;  %v725_v50 = vpop.f32.mrf.mxu1 }
 0x402   : > { %v726_v61 = vadd.f32 %v725_v50, %v612_v28 }
 0x403   : > { %1018 = vst [vmem:[%s4682_s13 + $0x1b8] sm:$0xff] %v949_v59 }
 0x404   : > { %1019 = vst [vmem:[%s4682_s13 + $0x1c0] sm:$0xff] %v726_v61 }
 0x405   : > { %v1065_v41 = vpop.permute.xlu0 %1064 }
 0x406   : > { %v1068_v26 = vsel %vm202_vm6, %v1061_v42, %v1065_v41  ;;  %v1070_v60 = vsel %vm202_vm6, %v1065_v41, %v1061_v42 }
 0x407   : > { %v4838_v49 = vsel %vm4266_vm8, %v1068_v26, %v4753_v5  ;;  %v4843_v25 = vsel %vm4266_vm8, %v1070_v60, %v4790_v55  ;;  %v838_v62 = vpop.f32.mrf.mxu2 }
 0x408   : > { %v951_v63 = vpop.f32.mrf.mxu3  ;;  %1180 = vrot.lane.b32.xlu2 %v4843_v25, %s4068_s28  ;;  %1196 = vrot.lane.b32.xlu1 %v4843_v25, %s4069_s29 }
 0x409   : > { %v952_v0 = vadd.f32 %v951_v63, %v838_v62  ;;  %1192 = vrot.lane.b32.xlu0 %v4838_v49, %s4069_s29  ;;  %v615_v5 = vpop.f32.mrf.mxu0  ;;  %v728_v4 = vpop.f32.mrf.mxu1 }
 0x40a   : > { %v729_v22 = vadd.f32 %v728_v4, %v615_v5 }
 0x40b   : > { %1020 = vst [vmem:[%s4682_s13 + $0x1c8] sm:$0xff] %v952_v0 }
 0x40c   : > { %1021 = vst [vmem:[%s4682_s13 + $0x1d0] sm:$0xff] %v729_v22 }
 0x410   : > { %v841_v55 = vpop.f32.mrf.mxu2  ;;  %v954_v12 = vpop.f32.mrf.mxu3  ;;  %1160 = vrot.lane.b32.xlu2 %v4838_v49, %s4070_s30  ;;  %1176 = vrot.lane.b32.xlu1 %v4838_v49, %s4068_s28 }
 0x411   : > { %v955_v38 = vadd.f32 %v954_v12, %v841_v55  ;;  %1164 = vrot.lane.b32.xlu0 %v4843_v25, %s4070_s30  ;;  %v618_v36 = vpop.f32.mrf.mxu0  ;;  %v731_v13 = vpop.f32.mrf.mxu1 }
 0x412   : > { %v732_v8 = vadd.f32 %v731_v13, %v618_v36 }
 0x413   : > { %1022 = vst [vmem:[%s4682_s13 + $0x1d8] sm:$0xff] %v955_v38 }
 0x414   : > { %1023 = vst [vmem:[%s4682_s13 + $0x1e0] sm:$0xff] %v732_v8 }
 0x418   : > { %v844_v20 = vpop.f32.mrf.mxu2  ;;  %v957_v52 = vpop.f32.mrf.mxu3  ;;  %1132 = vrot.lane.b32.xlu2 %v4843_v25, %s4071_s2  ;;  %1148 = vrot.lane.b32.xlu1 %v4843_v25, %s4072_s3 }
 0x419   : > { %v958_v19 = vadd.f32 %v957_v52, %v844_v20  ;;  %1144 = vrot.lane.b32.xlu0 %v4838_v49, %s4072_s3  ;;  %v621_v54 = vpop.f32.mrf.mxu0  ;;  %v734_v53 = vpop.f32.mrf.mxu1 }
 0x41a   : > { %v735_v35 = vadd.f32 %v734_v53, %v621_v54 }
 0x41b   : > { %1024 = vst [vmem:[%s4682_s13 + $0x1e8] sm:$0xff] %v958_v19 }
 0x41c   : > { %1025 = vst [vmem:[%s4682_s13 + $0x1f0] sm:$0xff] %v735_v35 }
 0x420   : > { %v847_v9 = vpop.f32.mrf.mxu2  ;;  %v960_v23 = vpop.f32.mrf.mxu3  ;;  %1112 = vrot.lane.b32.xlu2 %v4838_v49, %s4073_s4  ;;  %1128 = vrot.lane.b32.xlu1 %v4838_v49, %s4071_s2 }
 0x421   : > { %v961_v18 = vadd.f32 %v960_v23, %v847_v9  ;;  %1116 = vrot.lane.b32.xlu0 %v4843_v25, %s4073_s4 }
 0x423   : > { %1026 = vst [vmem:[%s4682_s13 + $0x1f8] sm:$0xff] %v961_v18 }
 0x428   : > { %1198 = vrot.lane.b32.xlu2 %v4882_v24, %s4069_s29  ;;  %1194 = vrot.lane.b32.xlu1 %v4878_v34, %s4069_s29 }
 0x429   : > { %1182 = vrot.lane.b32.xlu0 %v4882_v24, %s4068_s28 }
 0x430   : > { %1178 = vrot.lane.b32.xlu2 %v4878_v34, %s4068_s28  ;;  %1166 = vrot.lane.b32.xlu1 %v4882_v24, %s4070_s30 }
 0x431   : > { %1162 = vrot.lane.b32.xlu0 %v4878_v34, %s4070_s30 }
 0x438   : > { %1150 = vrot.lane.b32.xlu2 %v4882_v24, %s4072_s3  ;;  %1146 = vrot.lane.b32.xlu1 %v4878_v34, %s4072_s3 }
 0x439   : > { %1134 = vrot.lane.b32.xlu0 %v4882_v24, %s4071_s2 }
 0x440   : > { %1130 = vrot.lane.b32.xlu2 %v4878_v34, %s4071_s2  ;;  %1118 = vrot.lane.b32.xlu1 %v4882_v24, %s4073_s4 }
 0x441   : > { %1114 = vrot.lane.b32.xlu0 %v4878_v34, %s4073_s4 }
 0x448   : > { %1102 = vrot.lane.b32.xlu2 %v4882_v24, %s4074_s5  ;;  %1098 = vrot.lane.b32.xlu1 %v4878_v34, %s4074_s5 }
 0x449   : > { %1096 = vrot.lane.b32.xlu0 %v4838_v49, %s4074_s5 }
 0x450   : > { %1100 = vrot.lane.b32.xlu1 %v4843_v25, %s4074_s5  ;;  %1892 = vrot.lane.b32.xlu2 %v4915_v48, %s4064_s25 }
 0x451   : > { %1894 = vrot.lane.b32.xlu0 %v4917_v47, %s4064_s25 }
 0x462   : > { %v1181_v33 = vpop.permute.xlu2 %1180 }
 0x46a   : > { %v1161_v39 = vpop.permute.xlu2 %1160 }
 0x472   : > { %v4925_v2 = vpop.permute.xlu2 %1132 }
 0x47a   : > { %v1197_v1 = vpop.permute.xlu1 %1196  ;;  %v4927_v3 = vpop.permute.xlu2 %1112 }
 0x47b   : > { %v1193_v16 = vpop.permute.xlu0 %1192 }
 0x47c   : > { %v4945_v28 = vsel %vm6451_vm10, %v1193_v16, %v1197_v1  ;;  %v4949_v59 = vsel %vm6451_vm10, %v1197_v1, %v1193_v16 }
 0x482   : > { %v1177_v15 = vpop.permute.xlu1 %1176  ;;  %v1199_v40 = vpop.permute.xlu2 %1198 }
 0x483   : > { %v1165_v31 = vpop.permute.xlu0 %1164  ;;  %v4969_v42 = vsel %vm6449_vm11, %v1177_v15, %v1181_v33  ;;  %v4973_v41 = vsel %vm6449_vm11, %v1181_v33, %v1177_v15 }
 0x484   : > { %v4993_v5 = vsel %vm6448_vm12, %v1161_v39, %v1165_v31  ;;  %v4997_v4 = vsel %vm6448_vm12, %v1165_v31, %v1161_v39 }
 0x48a   : > { %v1149_v30 = vpop.permute.xlu1 %1148  ;;  %v1179_v45 = vpop.permute.xlu2 %1178 }
 0x48b   : > { %v1145_v6 = vpop.permute.xlu0 %1144 }
 0x48c   : > { %v5017_v36 = vsel %vm6450_vm13, %v1145_v6, %v1149_v30  ;;  %v5021_v13 = vsel %vm6450_vm13, %v1149_v30, %v1145_v6 }
 0x492   : > { %v4929_v29 = vpop.permute.xlu1 %1128  ;;  %v1151_v62 = vpop.permute.xlu2 %1150 }
 0x493   : > { %v4931_v46 = vpop.permute.xlu0 %1116 }
 0x494   : > { %v5071_v18 = vsel %vm257_vm15, %v4927_v3, %v4931_v46  ;;  %v5077_v17 = vsel %vm257_vm15, %v4931_v46, %v4927_v3 }
 0x49a   : > { %v1195_v43 = vpop.permute.xlu1 %1194  ;;  %v1131_v8 = vpop.permute.xlu2 %1130 }
 0x49b   : > { %v4935_v51 = vsel %vm6451_vm10, %v1195_v43, %v1199_v40  ;;  %v4939_v14 = vsel %vm6451_vm10, %v1199_v40, %v1195_v43  ;;  %v1183_v58 = vpop.permute.xlu0 %1182  ;;  %v1305_v43 = vmul.f32 %v4843_v25, %v4348_v57 }
 0x49c   : > { %1368 = vmatpush.msrb.mxu0 %v4935_v51  ;;  %1481 = vmatpush.msrb.mxu1 %v4939_v14  ;;  %v4957_v50 = vsel %vm6449_vm11, %v1179_v45, %v1183_v58  ;;  %v4961_v61 = vsel %vm6449_vm11, %v1183_v58, %v1179_v45  ;;  %v1304_v45 = vmul.f32 %v4838_v49, %v4346_v56 }
 0x49d   : > { %1594 = vmatpush.msrb.mxu2 %v4939_v14  ;;  %1707 = vmatpush.msrb.mxu3 %v4935_v51 }
 0x49e   : > { %1369 = vmatpush.msrb.mxu0 %v4945_v28  ;;  %1482 = vmatpush.msrb.mxu1 %v4949_v59 }
 0x49f   : > { %1595 = vmatpush.msrb.mxu2 %v4949_v59  ;;  %1708 = vmatpush.msrb.mxu3 %v4945_v28 }
 0x4a0   : > { %1370 = vmatpush.msrb.mxu0 %v4957_v50  ;;  %1483 = vmatpush.msrb.mxu1 %v4961_v61 }
 0x4a1   : > { %1596 = vmatpush.msrb.mxu2 %v4961_v61  ;;  %1709 = vmatpush.msrb.mxu3 %v4957_v50 }
 0x4a2   : > { %v1167_v26 = vpop.permute.xlu1 %1166  ;;  %1371 = vmatpush.msrb.mxu0 %v4969_v42  ;;  %1484 = vmatpush.msrb.mxu1 %v4973_v41  ;;  %v1103_v32 = vpop.permute.xlu2 %1102 }
 0x4a3   : > { %1597 = vmatpush.msrb.mxu2 %v4973_v41  ;;  %1710 = vmatpush.msrb.mxu3 %v4969_v42  ;;  %v1163_v60 = vpop.permute.xlu0 %1162 }
 0x4a4   : > { %v4983_v63 = vsel %vm6448_vm12, %v1163_v60, %v1167_v26  ;;  %v4987_v0 = vsel %vm6448_vm12, %v1167_v26, %v1163_v60  ;;  %vm6469_vm12 = vcmp.lt.s32.totalorder %v4191_v7, 80  ;;  %v1306_v26 = vmul.f32 %v4878_v34, %v4346_v56 }
 0x4a5   : > { %1372 = vmatpush.msrb.mxu0 %v4983_v63  ;;  %1485 = vmatpush.msrb.mxu1 %v4987_v0  ;;  %vm6470_vm11 = vmmov %vm6469_vm12  ;;  %v1307_v60 = vmul.f32 %v4882_v24, %v4348_v57 }
 0x4a6   : > { %1598 = vmatpush.msrb.mxu2 %v4987_v0  ;;  %1711 = vmatpush.msrb.mxu3 %v4983_v63 }
 0x4a7   : > { %1373 = vmatpush.msrb.mxu0 %v4993_v5  ;;  %1486 = vmatpush.msrb.mxu1 %v4997_v4 }
 0x4a8   : > { %1599 = vmatpush.msrb.mxu2 %v4997_v4  ;;  %1712 = vmatpush.msrb.mxu3 %v4993_v5 }
 0x4aa   : > { %v1147_v22 = vpop.permute.xlu1 %1146 }
 0x4ab   : > { %v5007_v55 = vsel %vm6450_vm13, %v1147_v22, %v1151_v62  ;;  %v5011_v12 = vsel %vm6450_vm13, %v1151_v62, %v1147_v22  ;;  %v1135_v38 = vpop.permute.xlu0 %1134  ;;  %vm6471_vm13 = vmmov %vm6470_vm11 }
 0x4ac   : > { %1374 = vmatpush.msrb.mxu0 %v5007_v55  ;;  %1487 = vmatpush.msrb.mxu1 %v5011_v12  ;;  %v5029_v20 = vsel %vm6469_vm12, %v1131_v8, %v1135_v38  ;;  %v5033_v52 = vsel %vm6470_vm11, %v1135_v38, %v1131_v8  ;;  %v5043_v19 = vsel %vm6471_vm13, %v4929_v29, %v4925_v2  ;;  %vm6472_vm12 = vmmov %vm6470_vm11  ;;  %vm6473_vm11 = vcmp.lt.s32.totalorder %v4191_v7, 32 }
 0x4ad   : > { %1600 = vmatpush.msrb.mxu2 %v5011_v12  ;;  %1713 = vmatpush.msrb.mxu3 %v5007_v55  ;;  %v5049_v54 = vsel %vm6472_vm12, %v4925_v2, %v4929_v29  ;;  %v1893_v2 = vpop.permute.xlu2 %1892  ;;  %vm6474_vm13 = vmmov %vm6473_vm11 }
 0x4ae   : > { %1375 = vmatpush.msrb.mxu0 %v5017_v36  ;;  %1488 = vmatpush.msrb.mxu1 %v5021_v13  ;;  %vm6475_vm12 = vmmov %vm6473_vm11 }
 0x4af   : > { %1601 = vmatpush.msrb.mxu2 %v5021_v13  ;;  %1714 = vmatpush.msrb.mxu3 %v5017_v36 }
 0x4b0   : > { %1376 = vmatpush.msrb.mxu0 %v5029_v20  ;;  %1489 = vmatpush.msrb.mxu1 %v5033_v52 }
 0x4b1   : > { %1602 = vmatpush.msrb.mxu2 %v5033_v52  ;;  %1715 = vmatpush.msrb.mxu3 %v5029_v20 }
 0x4b2   : > { %v1119_v53 = vpop.permute.xlu1 %1118  ;;  %1377 = vmatpush.msrb.mxu0 %v5043_v19  ;;  %1490 = vmatpush.msrb.mxu1 %v5049_v54 }
 0x4b3   : > { %1603 = vmatpush.msrb.mxu2 %v5049_v54  ;;  %1716 = vmatpush.msrb.mxu3 %v5043_v19  ;;  %v1115_v35 = vpop.permute.xlu0 %1114 }
 0x4b4   : > { %v5059_v9 = vsel %vm257_vm15, %v1115_v35, %v1119_v53  ;;  %v5063_v23 = vsel %vm257_vm15, %v1119_v53, %v1115_v35  ;;  %v1312_v53 = vmul.f32 %v5071_v18, %v4346_v56  ;;  %v1313_v35 = vmul.f32 %v5077_v17, %v4348_v57 }
 0x4b5   : > { %1378 = vmatpush.msrb.mxu0 %v5059_v9  ;;  %1491 = vmatpush.msrb.mxu1 %v5063_v23 }
 0x4b6   : > { %1604 = vmatpush.msrb.mxu2 %v5063_v23  ;;  %1717 = vmatpush.msrb.mxu3 %v5059_v9 }
 0x4b7   : > { %1379 = vmatpush.msrb.mxu0 %v5071_v18  ;;  %1492 = vmatpush.msrb.mxu1 %v5077_v17 }
 0x4b8   : > { %1605 = vmatpush.msrb.mxu2 %v5077_v17  ;;  %1718 = vmatpush.msrb.mxu3 %v5071_v18 }
 0x4ba   : > { %v1099_v33 = vpop.permute.xlu1 %1098 }
 0x4bb   : > { %v5087_v39 = vsel %vm240_vm14, %v1099_v33, %v1103_v32  ;;  %v5091_v1 = vsel %vm240_vm14, %v1103_v32, %v1099_v33  ;;  %v1097_v16 = vpop.permute.xlu0 %1096  ;;  %v1314_v32 = vmul.f32 %v5059_v9, %v4346_v56  ;;  %v1315_v33 = vmul.f32 %v5063_v23, %v4348_v57 }
 0x4bc   : > { %1380 = vmatpush.msrb.mxu0 %v5087_v39  ;;  %1493 = vmatpush.msrb.mxu1 %v5091_v1  ;;  %v1310_v38 = vmul.f32 %v5087_v39, %v4346_v56  ;;  %v1311_v8 = vmul.f32 %v5091_v1, %v4348_v57 }
 0x4bd   : > { %1606 = vmatpush.msrb.mxu2 %v5091_v1  ;;  %1719 = vmatpush.msrb.mxu3 %v5087_v39 }
 0x4c2   : > { %v1101_v15 = vpop.permute.xlu1 %1100 }
 0x4c3   : > { %v5099_v31 = vsel %vm240_vm14, %v1097_v16, %v1101_v15  ;;  %v5103_v3 = vsel %vm240_vm14, %v1101_v15, %v1097_v16  ;;  %v1895_v30 = vpop.permute.xlu0 %1894  ;;  %v1316_v16 = vmul.f32 %v5043_v19, %v4346_v56  ;;  %v1318_v15 = vmul.f32 %v5029_v20, %v4346_v56 }
 0x4c4   : > { %v1896_v6 = vsel %vm170_vm0, %v1893_v2, %v1895_v30  ;;  %v5109_v40 = vsel %vm170_vm0, %v1895_v30, %v1893_v2  ;;  %1381 = vmatpush.msrb.mxu0 %v5099_v31  ;;  %1494 = vmatpush.msrb.mxu1 %v5103_v3  ;;  %v1308_v62 = vmul.f32 %v5099_v31, %v4346_v56 }
 0x4c5   : > { %1607 = vmatpush.msrb.mxu2 %v5103_v3  ;;  %1720 = vmatpush.msrb.mxu3 %v5099_v31  ;;  %v5119_v29 = vsel %vm4194_vm1, %v5109_v40, %v4917_v47  ;;  %v5124_v46 = vsel %vm4194_vm1, %v1896_v6, %v4915_v48  ;;  %v5145_v58 = vsel %vm4198_vm2, %v1896_v6, %v4915_v48 }
 0x4c6   : > { %1908 = vrot.lane.b32.xlu2 %v5119_v29, %s4065_s17  ;;  %1904 = vrot.lane.b32.xlu1 %v5124_v46, %s4065_s17  ;;  %v1309_v22 = vmul.f32 %v5103_v3, %v4348_v57  ;;  %v1317_v2 = vmul.f32 %v5049_v54, %v4348_v57  ;;  %v1319_v30 = vmul.f32 %v5033_v52, %v4348_v57 }
 0x4c7   : > { %1382 = vmatpush.msrb.mxu0 %v4878_v34  ;;  %1495 = vmatpush.msrb.mxu1 %v4882_v24  ;;  %v1320_v6 = vmul.f32 %v5017_v36, %v4346_v56 }
 0x4c8   : > { %1608 = vmatpush.msrb.mxu2 %v4882_v24  ;;  %1721 = vmatpush.msrb.mxu3 %v4878_v34 }
 0x4c9   : > { %1383 = vmatpush.msrb.mxu0 %v4838_v49  ;;  %1496 = vmatpush.msrb.mxu1 %v4843_v25 }
 0x4ca   : > { %1609 = vmatpush.msrb.mxu2 %v4843_v25  ;;  %1722 = vmatpush.msrb.mxu3 %v4838_v49 }
 0x4cb   : > { %1384 = vmatmul.f32.vlgmr.msrb.gmra.mxu0 %v1304_v45  ;;  %1497 = vmatmul.f32.vlgmr.msrb.gmra.mxu1 %v1305_v43 }
 0x4cc   : > { %1610 = vmatmul.f32.vlgmr.msrb.gmra.mxu2 %v1304_v45  ;;  %1723 = vmatmul.f32.vlgmr.msrb.gmra.mxu3 %v1305_v43  ;;  %v1321_v45 = vmul.f32 %v5021_v13, %v4348_v57  ;;  %v1322_v43 = vmul.f32 %v5007_v55, %v4346_v56 }
 0x4ce   : > { %1902 = vrot.lane.b32.xlu2 %v5145_v58, %s4065_s17 }
 0x4d3   : > { %1387 = vmatmul.f32.gmra.mxu0 %v1306_v26  ;;  %1500 = vmatmul.f32.gmra.mxu1 %v1307_v60 }
 0x4d4   : > { %1613 = vmatmul.f32.gmra.mxu2 %v1306_v26  ;;  %1726 = vmatmul.f32.gmra.mxu3 %v1307_v60  ;;  %v1323_v26 = vmul.f32 %v5011_v12, %v4348_v57  ;;  %v1324_v60 = vmul.f32 %v4993_v5, %v4346_v56 }
 0x4db   : > { %1390 = vmatmul.f32.gmra.mxu0 %v1308_v62  ;;  %1503 = vmatmul.f32.gmra.mxu1 %v1309_v22 }
 0x4dc   : > { %1616 = vmatmul.f32.gmra.mxu2 %v1308_v62  ;;  %1729 = vmatmul.f32.gmra.mxu3 %v1309_v22  ;;  %v1325_v62 = vmul.f32 %v4997_v4, %v4348_v57  ;;  %v1326_v22 = vmul.f32 %v4983_v63, %v4346_v56 }
 0x4e3   : > { %1393 = vmatmul.f32.gmra.mxu0 %v1310_v38  ;;  %1506 = vmatmul.f32.gmra.mxu1 %v1311_v8 }
 0x4e4   : > { %1619 = vmatmul.f32.gmra.mxu2 %v1310_v38  ;;  %1732 = vmatmul.f32.gmra.mxu3 %v1311_v8  ;;  %v1327_v38 = vmul.f32 %v4987_v0, %v4348_v57  ;;  %v1328_v8 = vmul.f32 %v4969_v42, %v4346_v56 }
 0x4eb   : > { %1396 = vmatmul.f32.gmra.mxu0 %v1312_v53  ;;  %1509 = vmatmul.f32.gmra.mxu1 %v1313_v35 }
 0x4ec   : > { %1622 = vmatmul.f32.gmra.mxu2 %v1312_v53  ;;  %1735 = vmatmul.f32.gmra.mxu3 %v1313_v35  ;;  %v1329_v53 = vmul.f32 %v4973_v41, %v4348_v57  ;;  %v1330_v35 = vmul.f32 %v4957_v50, %v4346_v56 }
 0x4f3   : > { %1399 = vmatmul.f32.gmra.mxu0 %v1314_v32  ;;  %1512 = vmatmul.f32.gmra.mxu1 %v1315_v33 }
 0x4f4   : > { %1625 = vmatmul.f32.gmra.mxu2 %v1314_v32  ;;  %1738 = vmatmul.f32.gmra.mxu3 %v1315_v33  ;;  %v1331_v32 = vmul.f32 %v4961_v61, %v4348_v57 }
 0x4fb   : > { %1402 = vmatmul.f32.gmra.mxu0 %v1316_v16  ;;  %1515 = vmatmul.f32.gmra.mxu1 %v1317_v2 }
 0x4fc   : > { %1628 = vmatmul.f32.gmra.mxu2 %v1316_v16  ;;  %1741 = vmatmul.f32.gmra.mxu3 %v1317_v2 }
 0x503   : > { %1405 = vmatmul.f32.gmra.mxu0 %v1318_v15  ;;  %1518 = vmatmul.f32.gmra.mxu1 %v1319_v30 }
 0x504   : > { %1631 = vmatmul.f32.gmra.mxu2 %v1318_v15  ;;  %1744 = vmatmul.f32.gmra.mxu3 %v1319_v30  ;;  %v1332_v30 = vmul.f32 %v4945_v28, %v4346_v56 }
 0x50b   : > { %1408 = vmatmul.f32.gmra.mxu0 %v1320_v6  ;;  %1521 = vmatmul.f32.gmra.mxu1 %v1321_v45 }
 0x50c   : > { %1634 = vmatmul.f32.gmra.mxu2 %v1320_v6  ;;  %1747 = vmatmul.f32.gmra.mxu3 %v1321_v45  ;;  %v1333_v6 = vmul.f32 %v4949_v59, %v4348_v57 }
 0x513   : > { %1411 = vmatmul.f32.gmra.mxu0 %v1322_v43  ;;  %1524 = vmatmul.f32.gmra.mxu1 %v1323_v26 }
 0x514   : > { %1637 = vmatmul.f32.gmra.mxu2 %v1322_v43  ;;  %1750 = vmatmul.f32.gmra.mxu3 %v1323_v26  ;;  %v1335_v26 = vmul.f32 %v4939_v14, %v4348_v57 }
 0x51b   : > { %1414 = vmatmul.f32.gmra.mxu0 %v1324_v60  ;;  %1527 = vmatmul.f32.gmra.mxu1 %v1325_v62 }
 0x51c   : > { %1640 = vmatmul.f32.gmra.mxu2 %v1324_v60  ;;  %1753 = vmatmul.f32.gmra.mxu3 %v1325_v62 }
 0x520   : > { %v1909_v33 = vpop.permute.xlu2 %1908 }
 0x523   : > { %1417 = vmatmul.f32.gmra.mxu0 %v1326_v22  ;;  %1530 = vmatmul.f32.gmra.mxu1 %v1327_v38 }
 0x524   : > { %1643 = vmatmul.f32.gmra.mxu2 %v1326_v22  ;;  %1756 = vmatmul.f32.gmra.mxu3 %v1327_v38  ;;  %v1336_v38 = vmul.f32 %v4843_v25, %v4346_v56  ;;  %v1339_v25 = vmul.f32 %v4878_v34, %v4348_v57  ;;  %v1341_v34 = vmul.f32 %v5099_v31, %v4348_v57 }
 0x525   : > { %v1343_v31 = vmul.f32 %v5087_v39, %v4348_v57  ;;  %v1345_v39 = vmul.f32 %v5071_v18, %v4348_v57  ;;  %v1347_v18 = vmul.f32 %v5059_v9, %v4348_v57  ;;  %v1349_v9 = vmul.f32 %v5043_v19, %v4348_v57 }
 0x526   : > { %v1351_v19 = vmul.f32 %v5029_v20, %v4348_v57  ;;  %v1353_v20 = vmul.f32 %v5017_v36, %v4348_v57  ;;  %v1355_v36 = vmul.f32 %v5007_v55, %v4348_v57  ;;  %v1357_v55 = vmul.f32 %v4993_v5, %v4348_v57 }
 0x527   : > { %v1359_v5 = vmul.f32 %v4983_v63, %v4348_v57 }
 0x52b   : > { %1420 = vmatmul.f32.gmra.mxu0 %v1328_v8  ;;  %1533 = vmatmul.f32.gmra.mxu1 %v1329_v53 }
 0x52c   : > { %1646 = vmatmul.f32.gmra.mxu2 %v1328_v8  ;;  %1759 = vmatmul.f32.gmra.mxu3 %v1329_v53  ;;  %v1337_v8 = vmul.f32 %v4838_v49, %v4348_v57 }
 0x533   : > { %1423 = vmatmul.f32.gmra.mxu0 %v1330_v35  ;;  %1536 = vmatmul.f32.gmra.mxu1 %v1331_v32 }
 0x534   : > { %1649 = vmatmul.f32.gmra.mxu2 %v1330_v35  ;;  %1762 = vmatmul.f32.gmra.mxu3 %v1331_v32 }
 0x538   : > { %v1905_v16 = vpop.permute.xlu1 %1904 }
 0x539   : > { %v1911_v2 = vsel %vm185_vm3, %v1905_v16, %v1909_v33  ;;  %v1913_v15 = vsel %vm185_vm3, %v1909_v33, %v1905_v16 }
 0x53a   : > { %v5212_v45 = vsel %vm4223_vm4, %v1913_v15, %v5119_v29  ;;  %v5217_v43 = vsel %vm4223_vm4, %v1911_v2, %v5124_v46  ;;  %v1334_v29 = vmul.f32 %v4935_v51, %v4346_v56  ;;  %v5231_v46 = vsel %vm4198_vm2, %v5109_v40, %v4917_v47 }
 0x53b   : > { %1426 = vmatmul.f32.gmra.mxu0 %v1332_v30  ;;  %1539 = vmatmul.f32.gmra.mxu1 %v1333_v6  ;;  %v1338_v2 = vmul.f32 %v4882_v24, %v4346_v56  ;;  %v1340_v24 = vmul.f32 %v5103_v3, %v4346_v56  ;;  %v1342_v3 = vmul.f32 %v5091_v1, %v4346_v56 }
 0x53c   : > { %1652 = vmatmul.f32.gmra.mxu2 %v1332_v30  ;;  %1765 = vmatmul.f32.gmra.mxu3 %v1333_v6  ;;  %v1344_v1 = vmul.f32 %v5077_v17, %v4346_v56  ;;  %v1346_v17 = vmul.f32 %v5063_v23, %v4346_v56  ;;  %v1348_v23 = vmul.f32 %v5049_v54, %v4346_v56 }
 0x53d   : > { %1924 = vrot.lane.b32.xlu1 %v5212_v45, %s4066_s26  ;;  %1920 = vrot.lane.b32.xlu0 %v5217_v43, %s4066_s26  ;;  %v1350_v54 = vmul.f32 %v5033_v52, %v4346_v56  ;;  %v1352_v52 = vmul.f32 %v5021_v13, %v4346_v56  ;;  %v1354_v13 = vmul.f32 %v5011_v12, %v4346_v56 }
 0x53e   : > { %v1356_v12 = vmul.f32 %v4997_v4, %v4346_v56  ;;  %v1358_v4 = vmul.f32 %v4987_v0, %v4346_v56  ;;  %v1360_v0 = vmul.f32 %v4973_v41, %v4346_v56 }
 0x543   : > { %1429 = vmatmul.f32.gmra.mxu0 %v1334_v29  ;;  %1542 = vmatmul.f32.gmra.mxu1 %v1335_v26 }
 0x544   : > { %1655 = vmatmul.f32.gmra.mxu2 %v1334_v29  ;;  %1768 = vmatmul.f32.gmra.mxu3 %v1335_v26 }
 0x545   : > { %1906 = vrot.lane.b32.xlu0 %v5231_v46, %s4065_s17 }
 0x548   : > { %v1385_v60 = vpop.f32.mrf.mxu0  ;;  %v1498_v62 = vpop.f32.mrf.mxu1 }
 0x549   : > { %v1499_v22 = vadd.f32 %v1498_v62, %v1385_v60 }
 0x54b   : > { %3701 = vst [vmem:[%s4682_s13 + $0x200] sm:$0xff] %v1499_v22  ;;  %1432 = vmatmul.f32.gmra.mxu0 %v1336_v38  ;;  %1545 = vmatmul.f32.gmra.mxu1 %v1337_v8 }
 0x54c   : > { %1658 = vmatmul.f32.gmra.mxu2 %v1336_v38  ;;  %1771 = vmatmul.f32.gmra.mxu3 %v1337_v8 }
 0x54f   : > { %v1611_v40 = vpop.f32.mrf.mxu2  ;;  %v1724_v53 = vpop.f32.mrf.mxu3 }
 0x550   : > { %v1725_v35 = vadd.f32 %v1724_v53, %v1611_v40  ;;  %v1388_v32 = vpop.f32.mrf.mxu0  ;;  %v1501_v33 = vpop.f32.mrf.mxu1 }
 0x551   : > { %v1502_v16 = vadd.f32 %v1501_v33, %v1388_v32 }
 0x552   : > { %3702 = vst [vmem:[%s4682_s13 + $0x208] sm:$0xff] %v1725_v35 }
 0x553   : > { %3703 = vst [vmem:[%s4682_s13 + $0x210] sm:$0xff] %v1502_v16  ;;  %1435 = vmatmul.f32.gmra.mxu0 %v1338_v2  ;;  %1548 = vmatmul.f32.gmra.mxu1 %v1339_v25 }
 0x554   : > { %1661 = vmatmul.f32.gmra.mxu2 %v1338_v2  ;;  %1774 = vmatmul.f32.gmra.mxu3 %v1339_v25 }
 0x557   : > { %v1614_v49 = vpop.f32.mrf.mxu2  ;;  %v1727_v15 = vpop.f32.mrf.mxu3 }
 0x558   : > { %v1728_v30 = vadd.f32 %v1727_v15, %v1614_v49  ;;  %v1391_v6 = vpop.f32.mrf.mxu0  ;;  %v1504_v29 = vpop.f32.mrf.mxu1 }
 0x559   : > { %v1505_v26 = vadd.f32 %v1504_v29, %v1391_v6 }
 0x55a   : > { %3704 = vst [vmem:[%s4682_s13 + $0x218] sm:$0xff] %v1728_v30 }
 0x55b   : > { %3705 = vst [vmem:[%s4682_s13 + $0x220] sm:$0xff] %v1505_v26  ;;  %1438 = vmatmul.f32.gmra.mxu0 %v1340_v24  ;;  %1551 = vmatmul.f32.gmra.mxu1 %v1341_v34 }
 0x55c   : > { %1664 = vmatmul.f32.gmra.mxu2 %v1340_v24  ;;  %1777 = vmatmul.f32.gmra.mxu3 %v1341_v34 }
 0x55f   : > { %v1617_v60 = vpop.f32.mrf.mxu2  ;;  %v1730_v62 = vpop.f32.mrf.mxu3 }
 0x560   : > { %v1731_v22 = vadd.f32 %v1730_v62, %v1617_v60  ;;  %v1394_v38 = vpop.f32.mrf.mxu0  ;;  %v1507_v8 = vpop.f32.mrf.mxu1 }
 0x561   : > { %v1508_v40 = vadd.f32 %v1507_v8, %v1394_v38 }
 0x562   : > { %3706 = vst [vmem:[%s4682_s13 + $0x228] sm:$0xff] %v1731_v22 }
 0x563   : > { %3707 = vst [vmem:[%s4682_s13 + $0x230] sm:$0xff] %v1508_v40  ;;  %1441 = vmatmul.f32.gmra.mxu0 %v1342_v3  ;;  %1554 = vmatmul.f32.gmra.mxu1 %v1343_v31 }
 0x564   : > { %1667 = vmatmul.f32.gmra.mxu2 %v1342_v3  ;;  %1780 = vmatmul.f32.gmra.mxu3 %v1343_v31 }
 0x567   : > { %v1620_v53 = vpop.f32.mrf.mxu2  ;;  %v1733_v35 = vpop.f32.mrf.mxu3 }
 0x568   : > { %v1734_v32 = vadd.f32 %v1733_v35, %v1620_v53  ;;  %v1397_v33 = vpop.f32.mrf.mxu0  ;;  %v1510_v16 = vpop.f32.mrf.mxu1 }
 0x569   : > { %v1511_v2 = vadd.f32 %v1510_v16, %v1397_v33 }
 0x56a   : > { %3708 = vst [vmem:[%s4682_s13 + $0x238] sm:$0xff] %v1734_v32 }
 0x56b   : > { %3709 = vst [vmem:[%s4682_s13 + $0x240] sm:$0xff] %v1511_v2  ;;  %1444 = vmatmul.f32.gmra.mxu0 %v1344_v1  ;;  %1557 = vmatmul.f32.gmra.mxu1 %v1345_v39 }
 0x56c   : > { %1670 = vmatmul.f32.gmra.mxu2 %v1344_v1  ;;  %1783 = vmatmul.f32.gmra.mxu3 %v1345_v39 }
 0x56f   : > { %v1623_v25 = vpop.f32.mrf.mxu2  ;;  %v1736_v49 = vpop.f32.mrf.mxu3 }
 0x570   : > { %v1737_v15 = vadd.f32 %v1736_v49, %v1623_v25  ;;  %v1400_v30 = vpop.f32.mrf.mxu0  ;;  %v1513_v6 = vpop.f32.mrf.mxu1 }
 0x571   : > { %v1514_v29 = vadd.f32 %v1513_v6, %v1400_v30 }
 0x572   : > { %3710 = vst [vmem:[%s4682_s13 + $0x248] sm:$0xff] %v1737_v15 }
 0x573   : > { %3711 = vst [vmem:[%s4682_s13 + $0x250] sm:$0xff] %v1514_v29  ;;  %1447 = vmatmul.f32.gmra.mxu0 %v1346_v17  ;;  %1560 = vmatmul.f32.gmra.mxu1 %v1347_v18 }
 0x574   : > { %1673 = vmatmul.f32.gmra.mxu2 %v1346_v17  ;;  %1786 = vmatmul.f32.gmra.mxu3 %v1347_v18 }
 0x577   : > { %v1626_v26 = vpop.f32.mrf.mxu2  ;;  %v1739_v24 = vpop.f32.mrf.mxu3 }
 0x578   : > { %v1740_v34 = vadd.f32 %v1739_v24, %v1626_v26  ;;  %v1403_v60 = vpop.f32.mrf.mxu0  ;;  %v1516_v62 = vpop.f32.mrf.mxu1 }
 0x579   : > { %v1517_v22 = vadd.f32 %v1516_v62, %v1403_v60 }
 0x57a   : > { %3712 = vst [vmem:[%s4682_s13 + $0x258] sm:$0xff] %v1740_v34 }
 0x57b   : > { %3713 = vst [vmem:[%s4682_s13 + $0x260] sm:$0xff] %v1517_v22  ;;  %1450 = vmatmul.f32.gmra.mxu0 %v1348_v23  ;;  %1563 = vmatmul.f32.gmra.mxu1 %v1349_v9 }
 0x57c   : > { %1676 = vmatmul.f32.gmra.mxu2 %v1348_v23  ;;  %1789 = vmatmul.f32.gmra.mxu3 %v1349_v9 }
 0x57f   : > { %v1629_v38 = vpop.f32.mrf.mxu2  ;;  %v1742_v8 = vpop.f32.mrf.mxu3 }
 0x580   : > { %v1743_v40 = vadd.f32 %v1742_v8, %v1629_v38  ;;  %v1406_v3 = vpop.f32.mrf.mxu0  ;;  %v1519_v31 = vpop.f32.mrf.mxu1 }
 0x581   : > { %v1520_v53 = vadd.f32 %v1519_v31, %v1406_v3 }
 0x582   : > { %3714 = vst [vmem:[%s4682_s13 + $0x268] sm:$0xff] %v1743_v40 }
 0x583   : > { %3715 = vst [vmem:[%s4682_s13 + $0x270] sm:$0xff] %v1520_v53  ;;  %1453 = vmatmul.f32.gmra.mxu0 %v1350_v54  ;;  %1566 = vmatmul.f32.gmra.mxu1 %v1351_v19 }
 0x584   : > { %1679 = vmatmul.f32.gmra.mxu2 %v1350_v54  ;;  %1792 = vmatmul.f32.gmra.mxu3 %v1351_v19  ;;  %v1361_v19 = vmul.f32 %v4969_v42, %v4348_v57 }
 0x587   : > { %v1632_v35 = vpop.f32.mrf.mxu2  ;;  %v1745_v32 = vpop.f32.mrf.mxu3 }
 0x588   : > { %v1746_v33 = vadd.f32 %v1745_v32, %v1632_v35  ;;  %v1409_v16 = vpop.f32.mrf.mxu0  ;;  %v1522_v2 = vpop.f32.mrf.mxu1 }
 0x589   : > { %v1523_v1 = vadd.f32 %v1522_v2, %v1409_v16 }
 0x58a   : > { %3716 = vst [vmem:[%s4682_s13 + $0x278] sm:$0xff] %v1746_v33 }
 0x58b   : > { %3717 = vst [vmem:[%s4682_s13 + $0x280] sm:$0xff] %v1523_v1  ;;  %1456 = vmatmul.f32.gmra.mxu0 %v1352_v52  ;;  %1569 = vmatmul.f32.gmra.mxu1 %v1353_v20 }
 0x58c   : > { %1682 = vmatmul.f32.gmra.mxu2 %v1352_v52  ;;  %1795 = vmatmul.f32.gmra.mxu3 %v1353_v20  ;;  %v1362_v52 = vmul.f32 %v4961_v61, %v4346_v56  ;;  %v1903_v61 = vpop.permute.xlu2 %1902 }
 0x58f   : > { %v1635_v39 = vpop.f32.mrf.mxu2  ;;  %v1748_v25 = vpop.f32.mrf.mxu3 }
 0x590   : > { %v1749_v49 = vadd.f32 %v1748_v25, %v1635_v39  ;;  %v1412_v15 = vpop.f32.mrf.mxu0  ;;  %v1525_v30 = vpop.f32.mrf.mxu1 }
 0x591   : > { %v1526_v6 = vadd.f32 %v1525_v30, %v1412_v15 }
 0x592   : > { %3718 = vst [vmem:[%s4682_s13 + $0x288] sm:$0xff] %v1749_v49  ;;  %v1363_v49 = vmul.f32 %v4957_v50, %v4348_v57 }
 0x593   : > { %3719 = vst [vmem:[%s4682_s13 + $0x290] sm:$0xff] %v1526_v6  ;;  %1459 = vmatmul.f32.gmra.mxu0 %v1354_v13  ;;  %1572 = vmatmul.f32.gmra.mxu1 %v1355_v36 }
 0x594   : > { %1685 = vmatmul.f32.gmra.mxu2 %v1354_v13  ;;  %1798 = vmatmul.f32.gmra.mxu3 %v1355_v36 }
 0x597   : > { %v1638_v29 = vpop.f32.mrf.mxu2  ;;  %v1751_v17 = vpop.f32.mrf.mxu3 }
 0x598   : > { %v1752_v18 = vadd.f32 %v1751_v17, %v1638_v29  ;;  %v1415_v26 = vpop.f32.mrf.mxu0  ;;  %v1528_v24 = vpop.f32.mrf.mxu1  ;;  %v1364_v29 = vmul.f32 %v4949_v59, %v4346_v56 }
 0x599   : > { %v1529_v34 = vadd.f32 %v1528_v24, %v1415_v26  ;;  %v1365_v24 = vmul.f32 %v4945_v28, %v4348_v57 }
 0x59a   : > { %3720 = vst [vmem:[%s4682_s13 + $0x298] sm:$0xff] %v1752_v18 }
 0x59b   : > { %3721 = vst [vmem:[%s4682_s13 + $0x2a0] sm:$0xff] %v1529_v34  ;;  %1462 = vmatmul.f32.gmra.mxu0 %v1356_v12  ;;  %1575 = vmatmul.f32.gmra.mxu1 %v1357_v55 }
 0x59c   : > { %1688 = vmatmul.f32.gmra.mxu2 %v1356_v12  ;;  %1801 = vmatmul.f32.gmra.mxu3 %v1357_v55  ;;  %v1366_v55 = vmul.f32 %v4939_v14, %v4346_v56 }
 0x59f   : > { %v1641_v60 = vpop.f32.mrf.mxu2  ;;  %v1754_v62 = vpop.f32.mrf.mxu3 }
 0x5a0   : > { %v1755_v22 = vadd.f32 %v1754_v62, %v1641_v60  ;;  %v1418_v23 = vpop.f32.mrf.mxu0  ;;  %v1531_v9 = vpop.f32.mrf.mxu1  ;;  %v1367_v60 = vmul.f32 %v4935_v51, %v4348_v57 }
 0x5a1   : > { %v1532_v38 = vadd.f32 %v1531_v9, %v1418_v23 }
 0x5a2   : > { %3722 = vst [vmem:[%s4682_s13 + $0x2a8] sm:$0xff] %v1755_v22 }
 0x5a3   : > { %3723 = vst [vmem:[%s4682_s13 + $0x2b0] sm:$0xff] %v1532_v38  ;;  %1465 = vmatmul.f32.gmra.mxu0 %v1358_v4  ;;  %1578 = vmatmul.f32.gmra.mxu1 %v1359_v5 }
 0x5a4   : > { %1691 = vmatmul.f32.gmra.mxu2 %v1358_v4  ;;  %1804 = vmatmul.f32.gmra.mxu3 %v1359_v5 }
 0x5a7   : > { %v1644_v8 = vpop.f32.mrf.mxu2  ;;  %v1757_v40 = vpop.f32.mrf.mxu3 }
 0x5a8   : > { %v1758_v3 = vadd.f32 %v1757_v40, %v1644_v8  ;;  %v1421_v31 = vpop.f32.mrf.mxu0  ;;  %v1534_v53 = vpop.f32.mrf.mxu1 }
 0x5a9   : > { %v1535_v54 = vadd.f32 %v1534_v53, %v1421_v31 }
 0x5aa   : > { %3724 = vst [vmem:[%s4682_s13 + $0x2b8] sm:$0xff] %v1758_v3 }
 0x5ab   : > { %3725 = vst [vmem:[%s4682_s13 + $0x2c0] sm:$0xff] %v1535_v54  ;;  %1468 = vmatmul.f32.gmra.mxu0 %v1360_v0  ;;  %1581 = vmatmul.f32.gmra.mxu1 %v1361_v19 }
 0x5ac   : > { %1694 = vmatmul.f32.gmra.mxu2 %v1360_v0  ;;  %1807 = vmatmul.f32.gmra.mxu3 %v1361_v19 }
 0x5af   : > { %v1760_v63 = vpop.f32.mrf.mxu3  ;;  %v1925_v35 = vpop.permute.xlu1 %1924 }
 0x5b0   : > { %v1921_v32 = vpop.permute.xlu0 %1920  ;;  %v1647_v33 = vpop.f32.mrf.mxu2 }
 0x5b1   : > { %v1927_v16 = vsel %vm202_vm6, %v1921_v32, %v1925_v35  ;;  %v1929_v41 = vsel %vm202_vm6, %v1925_v35, %v1921_v32  ;;  %v1761_v2 = vadd.f32 %v1760_v63, %v1647_v33  ;;  %v1424_v42 = vpop.f32.mrf.mxu0  ;;  %v1537_v1 = vpop.f32.mrf.mxu1 }
 0x5b2   : > { %v1538_v20 = vadd.f32 %v1537_v1, %v1424_v42  ;;  %v1932_v39 = vsel %vm4252_vm7, %v1927_v16, %v5217_v43  ;;  %v1933_v25 = vsel %vm4252_vm7, %v1929_v41, %v5212_v45 }
 0x5b3   : > { %3726 = vst [vmem:[%s4682_s13 + $0x2c8] sm:$0xff] %v1761_v2  ;;  %1936 = vrot.lane.b32.xlu1 %v1932_v39, %s4067_s27  ;;  %1940 = vrot.lane.b32.xlu2 %v1933_v25, %s4067_s27 }
 0x5b4   : > { %3727 = vst [vmem:[%s4682_s13 + $0x2d0] sm:$0xff] %v1538_v20  ;;  %1471 = vmatmul.f32.gmra.mxu0 %v1362_v52  ;;  %1584 = vmatmul.f32.gmra.mxu1 %v1363_v49 }
 0x5b5   : > { %1697 = vmatmul.f32.gmra.mxu2 %v1362_v52  ;;  %1810 = vmatmul.f32.gmra.mxu3 %v1363_v49 }
 0x5b7   : > { %v1763_v43 = vpop.f32.mrf.mxu3 }
 0x5b8   : > { %v1907_v15 = vpop.permute.xlu0 %1906  ;;  %v1650_v30 = vpop.f32.mrf.mxu2 }
 0x5b9   : > { %v1910_v45 = vsel %vm185_vm3, %v1903_v61, %v1907_v15  ;;  %v1912_v50 = vsel %vm185_vm3, %v1907_v15, %v1903_v61  ;;  %v1764_v6 = vadd.f32 %v1763_v43, %v1650_v30  ;;  %v1427_v13 = vpop.f32.mrf.mxu0  ;;  %v1540_v36 = vpop.f32.mrf.mxu1 }
 0x5ba   : > { %v1541_v17 = vadd.f32 %v1540_v36, %v1427_v13  ;;  %v5339_v18 = vsel %vm4234_vm5, %v1912_v50, %v5231_v46  ;;  %v5344_v26 = vsel %vm4234_vm5, %v1910_v45, %v5145_v58 }
 0x5bb   : > { %3728 = vst [vmem:[%s4682_s13 + $0x2d8] sm:$0xff] %v1764_v6  ;;  %1922 = vrot.lane.b32.xlu1 %v5339_v18, %s4066_s26  ;;  %1918 = vrot.lane.b32.xlu0 %v5344_v26, %s4066_s26 }
 0x5bc   : > { %3729 = vst [vmem:[%s4682_s13 + $0x2e0] sm:$0xff] %v1541_v17  ;;  %1474 = vmatmul.f32.gmra.mxu0 %v1364_v29  ;;  %1587 = vmatmul.f32.gmra.mxu1 %v1365_v24 }
 0x5bd   : > { %1700 = vmatmul.f32.gmra.mxu2 %v1364_v29  ;;  %1813 = vmatmul.f32.gmra.mxu3 %v1365_v24 }
 0x5bf   : > { %v1766_v59 = vpop.f32.mrf.mxu3 }
 0x5c0   : > { %v1653_v58 = vpop.f32.mrf.mxu2 }
 0x5c1   : > { %v1767_v46 = vadd.f32 %v1766_v59, %v1653_v58  ;;  %v1430_v34 = vpop.f32.mrf.mxu0  ;;  %v1543_v12 = vpop.f32.mrf.mxu1 }
 0x5c2   : > { %v1544_v28 = vadd.f32 %v1543_v12, %v1430_v34 }
 0x5c3   : > { %3730 = vst [vmem:[%s4682_s13 + $0x2e8] sm:$0xff] %v1767_v46 }
 0x5c4   : > { %3731 = vst [vmem:[%s4682_s13 + $0x2f0] sm:$0xff] %v1544_v28  ;;  %1477 = vmatmul.f32.gmra.mxu0 %v1366_v55  ;;  %1590 = vmatmul.f32.gmra.mxu1 %v1367_v60 }
 0x5c5   : > { %1703 = vmatmul.f32.gmra.mxu2 %v1366_v55  ;;  %1816 = vmatmul.f32.gmra.mxu3 %v1367_v60 }
 0x5c7   : > { %v1769_v62 = vpop.f32.mrf.mxu3 }
 0x5c8   : > { %v1656_v22 = vpop.f32.mrf.mxu2 }
 0x5c9   : > { %v1770_v23 = vadd.f32 %v1769_v62, %v1656_v22  ;;  %v1433_v9 = vpop.f32.mrf.mxu0  ;;  %v1546_v38 = vpop.f32.mrf.mxu1 }
 0x5ca   : > { %v1547_v4 = vadd.f32 %v1546_v38, %v1433_v9 }
 0x5cb   : > { %3732 = vst [vmem:[%s4682_s13 + $0x2f8] sm:$0xff] %v1770_v23 }
 0x5cc   : > { %3733 = vst [vmem:[%s4682_s13 + $0x300] sm:$0xff] %v1547_v4 }
 0x5cf   : > { %v1772_v56 = vpop.f32.mrf.mxu3 }
 0x5d0   : > { %v1659_v57 = vpop.f32.mrf.mxu2 }
 0x5d1   : > { %v1773_v51 = vadd.f32 %v1772_v56, %v1659_v57  ;;  %v1436_v14 = vpop.f32.mrf.mxu0  ;;  %v1549_v5 = vpop.f32.mrf.mxu1 }
 0x5d2   : > { %v1550_v8 = vadd.f32 %v1549_v5, %v1436_v14 }
 0x5d3   : > { %3734 = vst [vmem:[%s4682_s13 + $0x308] sm:$0xff] %v1773_v51 }
 0x5d4   : > { %3735 = vst [vmem:[%s4682_s13 + $0x310] sm:$0xff] %v1550_v8 }
 0x5d7   : > { %v1775_v40 = vpop.f32.mrf.mxu3 }
 0x5d8   : > { %v1662_v3 = vpop.f32.mrf.mxu2 }
 0x5d9   : > { %v1776_v31 = vadd.f32 %v1775_v40, %v1662_v3  ;;  %v1439_v53 = vpop.f32.mrf.mxu0  ;;  %v1552_v54 = vpop.f32.mrf.mxu1 }
 0x5da   : > { %v1553_v0 = vadd.f32 %v1552_v54, %v1439_v53 }
 0x5db   : > { %3736 = vst [vmem:[%s4682_s13 + $0x318] sm:$0xff] %v1776_v31 }
 0x5dc   : > { %3737 = vst [vmem:[%s4682_s13 + $0x320] sm:$0xff] %v1553_v0 }
 0x5df   : > { %v1778_v19 = vpop.f32.mrf.mxu3 }
 0x5e0   : > { %v1665_v63 = vpop.f32.mrf.mxu2 }
 0x5e1   : > { %v1779_v35 = vadd.f32 %v1778_v19, %v1665_v63  ;;  %v1442_v32 = vpop.f32.mrf.mxu0  ;;  %v1555_v33 = vpop.f32.mrf.mxu1 }
 0x5e2   : > { %v1556_v16 = vadd.f32 %v1555_v33, %v1442_v32 }
 0x5e3   : > { %3738 = vst [vmem:[%s4682_s13 + $0x328] sm:$0xff] %v1779_v35 }
 0x5e4   : > { %3739 = vst [vmem:[%s4682_s13 + $0x330] sm:$0xff] %v1556_v16 }
 0x5e7   : > { %v1781_v41 = vpop.f32.mrf.mxu3 }
 0x5e8   : > { %v1668_v2 = vpop.f32.mrf.mxu2 }
 0x5e9   : > { %v1782_v42 = vadd.f32 %v1781_v41, %v1668_v2  ;;  %v1445_v1 = vpop.f32.mrf.mxu0  ;;  %v1558_v52 = vpop.f32.mrf.mxu1 }
 0x5ea   : > { %v1559_v20 = vadd.f32 %v1558_v52, %v1445_v1 }
 0x5eb   : > { %3740 = vst [vmem:[%s4682_s13 + $0x338] sm:$0xff] %v1782_v42 }
 0x5ec   : > { %3741 = vst [vmem:[%s4682_s13 + $0x340] sm:$0xff] %v1559_v20 }
 0x5ef   : > { %v1784_v39 = vpop.f32.mrf.mxu3 }
 0x5f0   : > { %v1671_v25 = vpop.f32.mrf.mxu2 }
 0x5f1   : > { %v1785_v49 = vadd.f32 %v1784_v39, %v1671_v25  ;;  %v1448_v61 = vpop.f32.mrf.mxu0  ;;  %v1561_v43 = vpop.f32.mrf.mxu1 }
 0x5f2   : > { %v1562_v15 = vadd.f32 %v1561_v43, %v1448_v61 }
 0x5f3   : > { %3742 = vst [vmem:[%s4682_s13 + $0x348] sm:$0xff] %v1785_v49 }
 0x5f4   : > { %3743 = vst [vmem:[%s4682_s13 + $0x350] sm:$0xff] %v1562_v15 }
 0x5f7   : > { %v1787_v30 = vpop.f32.mrf.mxu3 }
 0x5f8   : > { %v1674_v45 = vpop.f32.mrf.mxu2 }
 0x5f9   : > { %v1788_v50 = vadd.f32 %v1787_v30, %v1674_v45  ;;  %v1451_v6 = vpop.f32.mrf.mxu0  ;;  %v1564_v13 = vpop.f32.mrf.mxu1 }
 0x5fa   : > { %v1565_v36 = vadd.f32 %v1564_v13, %v1451_v6 }
 0x5fb   : > { %3744 = vst [vmem:[%s4682_s13 + $0x358] sm:$0xff] %v1788_v50 }
 0x5fc   : > { %3745 = vst [vmem:[%s4682_s13 + $0x360] sm:$0xff] %v1565_v36 }
 0x5ff   : > { %v1790_v29 = vpop.f32.mrf.mxu3 }
 0x600   : > { %v1677_v17 = vpop.f32.mrf.mxu2 }
 0x601   : > { %v1791_v24 = vadd.f32 %v1790_v29, %v1677_v17  ;;  %v1454_v59 = vpop.f32.mrf.mxu0  ;;  %v1567_v58 = vpop.f32.mrf.mxu1 }
 0x602   : > { %v1568_v46 = vadd.f32 %v1567_v58, %v1454_v59 }
 0x603   : > { %3746 = vst [vmem:[%s4682_s13 + $0x368] sm:$0xff] %v1791_v24 }
 0x604   : > { %3747 = vst [vmem:[%s4682_s13 + $0x370] sm:$0xff] %v1568_v46 }
 0x607   : > { %v1793_v34 = vpop.f32.mrf.mxu3 }
 0x608   : > { %v1680_v12 = vpop.f32.mrf.mxu2 }
 0x609   : > { %v1794_v28 = vadd.f32 %v1793_v34, %v1680_v12  ;;  %v1457_v55 = vpop.f32.mrf.mxu0  ;;  %v1570_v60 = vpop.f32.mrf.mxu1 }
 0x60a   : > { %v1571_v62 = vadd.f32 %v1570_v60, %v1457_v55 }
 0x60b   : > { %3748 = vst [vmem:[%s4682_s13 + $0x378] sm:$0xff] %v1794_v28 }
 0x60c   : > { %3749 = vst [vmem:[%s4682_s13 + $0x380] sm:$0xff] %v1571_v62 }
 0x60d   : > { %v1941_v55 = vpop.permute.xlu2 %1940 }
 0x60f   : > { %v1796_v22 = vpop.f32.mrf.mxu3 }
 0x610   : > { %v1683_v23 = vpop.f32.mrf.mxu2 }
 0x611   : > { %v1797_v9 = vadd.f32 %v1796_v22, %v1683_v23  ;;  %v1460_v38 = vpop.f32.mrf.mxu0  ;;  %v1573_v4 = vpop.f32.mrf.mxu1  ;;  %v3830_v22 = vld [vmem:[%s4176_s24 + $0x6] sm:$0x3]  ;;  %s3617_s24 = sshll.u32 %s3614_s22, 4  ;;  %s3618_s24 = int_to_ptr.hbm [resolvable:$true] %s3617_s24 }
 0x612   : > { %v1574_v56 = vadd.f32 %v1573_v4, %v1460_v38  ;;  %v5470_v23 = vperm.slane %v3830_v22, 0 }
 0x613   : > { %3750 = vst [vmem:[%s4682_s13 + $0x388] sm:$0xff] %v1797_v9  ;;  %v5472_v9 = vperm.slane %v3830_v22, 1 }
 0x614   : > { %3751 = vst [vmem:[%s4682_s13 + $0x390] sm:$0xff] %v1574_v56 }
 0x617   : > { %v1799_v57 = vpop.f32.mrf.mxu3 }
 0x618   : > { %v1686_v51 = vpop.f32.mrf.mxu2 }
 0x619   : > { %v1800_v14 = vadd.f32 %v1799_v57, %v1686_v51  ;;  %v1463_v5 = vpop.f32.mrf.mxu0  ;;  %v1576_v8 = vpop.f32.mrf.mxu1 }
 0x61a   : > { %v1577_v40 = vadd.f32 %v1576_v8, %v1463_v5 }
 0x61b   : > { %3752 = vst [vmem:[%s4682_s13 + $0x398] sm:$0xff] %v1800_v14 }
 0x61c   : > { %3753 = vst [vmem:[%s4682_s13 + $0x3a0] sm:$0xff] %v1577_v40 }
 0x61f   : > { %v1802_v3 = vpop.f32.mrf.mxu3 }
 0x620   : > { %v1689_v31 = vpop.f32.mrf.mxu2 }
 0x621   : > { %v1803_v53 = vadd.f32 %v1802_v3, %v1689_v31  ;;  %v1466_v54 = vpop.f32.mrf.mxu0  ;;  %v1579_v0 = vpop.f32.mrf.mxu1 }
 0x622   : > { %v1580_v19 = vadd.f32 %v1579_v0, %v1466_v54 }
 0x623   : > { %3754 = vst [vmem:[%s4682_s13 + $0x3a8] sm:$0xff] %v1803_v53 }
 0x624   : > { %3755 = vst [vmem:[%s4682_s13 + $0x3b0] sm:$0xff] %v1580_v19 }
 0x625   : > { %v1937_v63 = vpop.permute.xlu1 %1936 }
 0x626   : > { %v5433_v60 = vsel %vm219_vm9, %v1937_v63, %v1941_v55  ;;  %v5437_v62 = vsel %vm219_vm9, %v1941_v55, %v1937_v63 }
 0x627   : > { %v1805_v35 = vpop.f32.mrf.mxu3 }
 0x628   : > { %v1692_v32 = vpop.f32.mrf.mxu2 }
 0x629   : > { %v1806_v33 = vadd.f32 %v1805_v35, %v1692_v32  ;;  %v1469_v16 = vpop.f32.mrf.mxu0  ;;  %v1582_v41 = vpop.f32.mrf.mxu1 }
 0x62a   : > { %v1583_v2 = vadd.f32 %v1582_v41, %v1469_v16 }
 0x62b   : > { %3756 = vst [vmem:[%s4682_s13 + $0x3b8] sm:$0xff] %v1806_v33 }
 0x62c   : > { %3757 = vst [vmem:[%s4682_s13 + $0x3c0] sm:$0xff] %v1583_v2 }
 0x62d   : > { %v1923_v42 = vpop.permute.xlu1 %1922  ;;  %v1919_v1 = vpop.permute.xlu0 %1918 }
 0x62e   : > { %v1926_v52 = vsel %vm202_vm6, %v1919_v1, %v1923_v42  ;;  %v1928_v20 = vsel %vm202_vm6, %v1923_v42, %v1919_v1 }
 0x62f   : > { %v5393_v39 = vsel %vm4266_vm8, %v1926_v52, %v5344_v26  ;;  %v5398_v25 = vsel %vm4266_vm8, %v1928_v20, %v5339_v18  ;;  %v1808_v49 = vpop.f32.mrf.mxu3 }
 0x630   : > { %2038 = vrot.lane.b32.xlu0 %v5398_v25, %s4068_s28  ;;  %2054 = vrot.lane.b32.xlu2 %v5398_v25, %s4069_s29  ;;  %v1695_v61 = vpop.f32.mrf.mxu2 }
 0x631   : > { %2050 = vrot.lane.b32.xlu1 %v5393_v39, %s4069_s29  ;;  %v1809_v43 = vadd.f32 %v1808_v49, %v1695_v61  ;;  %v1472_v26 = vpop.f32.mrf.mxu0  ;;  %v1585_v15 = vpop.f32.mrf.mxu1 }
 0x632   : > { %v1586_v30 = vadd.f32 %v1585_v15, %v1472_v26 }
 0x633   : > { %3758 = vst [vmem:[%s4682_s13 + $0x3c8] sm:$0xff] %v1809_v43 }
 0x634   : > { %3759 = vst [vmem:[%s4682_s13 + $0x3d0] sm:$0xff] %v1586_v30 }
 0x638   : > { %2018 = vrot.lane.b32.xlu0 %v5393_v39, %s4070_s30  ;;  %2034 = vrot.lane.b32.xlu2 %v5393_v39, %s4068_s28  ;;  %v1698_v18 = vpop.f32.mrf.mxu2  ;;  %v1811_v45 = vpop.f32.mrf.mxu3 }
 0x639   : > { %2022 = vrot.lane.b32.xlu1 %v5398_v25, %s4070_s30  ;;  %v1812_v50 = vadd.f32 %v1811_v45, %v1698_v18  ;;  %v1475_v6 = vpop.f32.mrf.mxu0  ;;  %v1588_v13 = vpop.f32.mrf.mxu1 }
 0x63a   : > { %v1589_v36 = vadd.f32 %v1588_v13, %v1475_v6 }
 0x63b   : > { %3760 = vst [vmem:[%s4682_s13 + $0x3d8] sm:$0xff] %v1812_v50 }
 0x63c   : > { %3761 = vst [vmem:[%s4682_s13 + $0x3e0] sm:$0xff] %v1589_v36 }
 0x640   : > { %1990 = vrot.lane.b32.xlu0 %v5398_v25, %s4071_s2  ;;  %2006 = vrot.lane.b32.xlu2 %v5398_v25, %s4072_s3  ;;  %v1701_v29 = vpop.f32.mrf.mxu2  ;;  %v1814_v17 = vpop.f32.mrf.mxu3 }
 0x641   : > { %2002 = vrot.lane.b32.xlu1 %v5393_v39, %s4072_s3  ;;  %v1815_v24 = vadd.f32 %v1814_v17, %v1701_v29  ;;  %v1478_v59 = vpop.f32.mrf.mxu0  ;;  %v1591_v58 = vpop.f32.mrf.mxu1 }
 0x642   : > { %v1592_v46 = vadd.f32 %v1591_v58, %v1478_v59 }
 0x643   : > { %3762 = vst [vmem:[%s4682_s13 + $0x3e8] sm:$0xff] %v1815_v24 }
 0x644   : > { %3763 = vst [vmem:[%s4682_s13 + $0x3f0] sm:$0xff] %v1592_v46 }
 0x648   : > { %1970 = vrot.lane.b32.xlu0 %v5393_v39, %s4073_s4  ;;  %1986 = vrot.lane.b32.xlu2 %v5393_v39, %s4071_s2  ;;  %v1704_v34 = vpop.f32.mrf.mxu2  ;;  %v1817_v12 = vpop.f32.mrf.mxu3 }
 0x649   : > { %1974 = vrot.lane.b32.xlu1 %v5398_v25, %s4073_s4  ;;  %v1818_v28 = vadd.f32 %v1817_v12, %v1704_v34 }
 0x64b   : > { %3764 = vst [vmem:[%s4682_s13 + $0x3f8] sm:$0xff] %v1818_v28 }
 0x650   : > { %2056 = vrot.lane.b32.xlu0 %v5437_v62, %s4069_s29  ;;  %2052 = vrot.lane.b32.xlu2 %v5433_v60, %s4069_s29 }
 0x651   : > { %2040 = vrot.lane.b32.xlu1 %v5437_v62, %s4068_s28 }
 0x658   : > { %2036 = vrot.lane.b32.xlu0 %v5433_v60, %s4068_s28  ;;  %2024 = vrot.lane.b32.xlu2 %v5437_v62, %s4070_s30 }
 0x659   : > { %2020 = vrot.lane.b32.xlu1 %v5433_v60, %s4070_s30 }
 0x660   : > { %2008 = vrot.lane.b32.xlu0 %v5437_v62, %s4072_s3  ;;  %2004 = vrot.lane.b32.xlu2 %v5433_v60, %s4072_s3 }
 0x661   : > { %1992 = vrot.lane.b32.xlu1 %v5437_v62, %s4071_s2 }
 0x668   : > { %1988 = vrot.lane.b32.xlu0 %v5433_v60, %s4071_s2  ;;  %1976 = vrot.lane.b32.xlu2 %v5437_v62, %s4073_s4 }
 0x669   : > { %1972 = vrot.lane.b32.xlu1 %v5433_v60, %s4073_s4 }
 0x670   : > { %1960 = vrot.lane.b32.xlu0 %v5437_v62, %s4074_s5  ;;  %1956 = vrot.lane.b32.xlu2 %v5433_v60, %s4074_s5 }
 0x671   : > { %1954 = vrot.lane.b32.xlu1 %v5393_v39, %s4074_s5 }
 0x678   : > { %2750 = vrot.lane.b32.xlu0 %v5470_v23, %s4064_s25  ;;  %1958 = vrot.lane.b32.xlu2 %v5398_v25, %s4074_s5 }
 0x679   : > { %2752 = vrot.lane.b32.xlu1 %v5472_v9, %s4064_s25  ;;  %s4008_s25 = sshra.s32 %s3618_s24, 4  ;;  %s4009_s25 = int_to_ptr.hbm [resolvable:$true] %s4008_s25 }
 0x67a   : > { %p4015_p0 = scmp.lt.s32.totalorder %s4009_s25, %s6446_s1 }
 0x68a   : > { %v2055_v38 = vpop.permute.xlu2 %2054 }
 0x692   : > { %v2035_v4 = vpop.permute.xlu2 %2034 }
 0x69a   : > { %v2007_v56 = vpop.permute.xlu2 %2006 }
 0x6a2   : > { %v2039_v57 = vpop.permute.xlu0 %2038  ;;  %v5480_v14 = vpop.permute.xlu2 %1986 }
 0x6a3   : > { %v2051_v51 = vpop.permute.xlu1 %2050  ;;  %v5524_v20 = vsel %vm6475_vm12, %v2035_v4, %v2039_v57 }
 0x6a4   : > { %v5500_v33 = vsel %vm6451_vm10, %v2051_v51, %v2055_v38  ;;  %v5504_v16 = vsel %vm6451_vm10, %v2055_v38, %v2051_v51 }
 0x6aa   : > { %v2019_v5 = vpop.permute.xlu0 %2018  ;;  %v2053_v40 = vpop.permute.xlu2 %2052 }
 0x6ab   : > { %v2023_v8 = vpop.permute.xlu1 %2022 }
 0x6b2   : > { %v5482_v3 = vpop.permute.xlu0 %1990  ;;  %v2025_v0 = vpop.permute.xlu2 %2024 }
 0x6b3   : > { %v2003_v31 = vpop.permute.xlu1 %2002 }
 0x6ba   : > { %v5484_v53 = vpop.permute.xlu0 %1970  ;;  %v2005_v41 = vpop.permute.xlu2 %2004 }
 0x6bb   : > { %v5486_v54 = vpop.permute.xlu1 %1974 }
 0x6bc   : > { %v5626_v55 = vsel %vm257_vm15, %v5484_v53, %v5486_v54  ;;  %v5632_v22 = vsel %vm257_vm15, %v5486_v54, %v5484_v53 }
 0x6c2   : > { %v2057_v19 = vpop.permute.xlu0 %2056  ;;  %v1977_v26 = vpop.permute.xlu2 %1976 }
 0x6c3   : > { %v2041_v63 = vpop.permute.xlu1 %2040  ;;  %v5490_v35 = vsel %vm6451_vm10, %v2053_v40, %v2057_v19  ;;  %v5494_v32 = vsel %vm6451_vm10, %v2057_v19, %v2053_v40  ;;  %vm6476_vm10 = vmmov %vm6473_vm11  ;;  %v2162_v40 = vmul.f32 %v5393_v39, %v4915_v48 }
 0x6c4   : > { %2226 = vmatpush.msra.mxu0 %v5490_v35  ;;  %2339 = vmatpush.msra.mxu1 %v5494_v32  ;;  %v5528_v49 = vsel %vm6476_vm10, %v2039_v57, %v2035_v4  ;;  %v2225_v27 = vmul.f32 %v5490_v35, %v4917_v47 }
 0x6c5   : > { %2452 = vmatpush.msra.mxu2 %v5494_v32  ;;  %2565 = vmatpush.msra.mxu3 %v5490_v35 }
 0x6c6   : > { %2227 = vmatpush.msra.mxu0 %v5500_v33  ;;  %2340 = vmatpush.msra.mxu1 %v5504_v16 }
 0x6c7   : > { %2453 = vmatpush.msra.mxu2 %v5504_v16  ;;  %2566 = vmatpush.msra.mxu3 %v5500_v33 }
 0x6ca   : > { %v2037_v2 = vpop.permute.xlu0 %2036  ;;  %v1957_v29 = vpop.permute.xlu2 %1956 }
 0x6cb   : > { %v2021_v42 = vpop.permute.xlu1 %2020  ;;  %v5514_v1 = vsel %vm6473_vm11, %v2037_v2, %v2041_v63  ;;  %v5518_v52 = vsel %vm6474_vm13, %v2041_v63, %v2037_v2  ;;  %vm6477_vm11 = vcmp.lt.s32.totalorder %v4191_v7, 48  ;;  %v2164_v63 = vmul.f32 %v5433_v60, %v4915_v48 }
 0x6cc   : > { %2228 = vmatpush.msra.mxu0 %v5514_v1  ;;  %2341 = vmatpush.msra.mxu1 %v5518_v52  ;;  %v5536_v61 = vsel %vm6477_vm11, %v2021_v42, %v2025_v0  ;;  %vm6478_vm13 = vmmov %vm6477_vm11 }
 0x6cd   : > { %2454 = vmatpush.msra.mxu2 %v5518_v52  ;;  %2567 = vmatpush.msra.mxu3 %v5514_v1  ;;  %v5540_v43 = vsel %vm6478_vm13, %v2025_v0, %v2021_v42  ;;  %vm6479_vm10 = vmmov %vm6477_vm11  ;;  %vm6481_vm11 = vcmp.lt.s32.totalorder %v4191_v7, 64 }
 0x6ce   : > { %2229 = vmatpush.msra.mxu0 %v5524_v20  ;;  %2342 = vmatpush.msra.mxu1 %v5528_v49  ;;  %v5548_v15 = vsel %vm6479_vm10, %v2019_v5, %v2023_v8  ;;  %vm6480_vm12 = vmmov %vm6479_vm10 }
 0x6cf   : > { %2455 = vmatpush.msra.mxu2 %v5528_v49  ;;  %2568 = vmatpush.msra.mxu3 %v5524_v20  ;;  %v5552_v30 = vsel %vm6480_vm12, %v2023_v8, %v2019_v5  ;;  %vm6482_vm13 = vmmov %vm6481_vm11 }
 0x6d0   : > { %2230 = vmatpush.msra.mxu0 %v5536_v61  ;;  %2343 = vmatpush.msra.mxu1 %v5540_v43  ;;  %vm6483_vm10 = vmmov %vm6481_vm11 }
 0x6d1   : > { %2456 = vmatpush.msra.mxu2 %v5540_v43  ;;  %2569 = vmatpush.msra.mxu3 %v5536_v61  ;;  %v5572_v13 = vsel %vm6483_vm10, %v2003_v31, %v2007_v56  ;;  %vm6484_vm12 = vmmov %vm6483_vm10 }
 0x6d2   : > { %v2009_v18 = vpop.permute.xlu0 %2008  ;;  %2231 = vmatpush.msra.mxu0 %v5548_v15  ;;  %2344 = vmatpush.msra.mxu1 %v5552_v30  ;;  %v5576_v36 = vsel %vm6484_vm12, %v2007_v56, %v2003_v31  ;;  %v1959_v51 = vpop.permute.xlu2 %1958 }
 0x6d3   : > { %v1993_v45 = vpop.permute.xlu1 %1992  ;;  %v5560_v50 = vsel %vm6481_vm11, %v2005_v41, %v2009_v18  ;;  %v5564_v6 = vsel %vm6482_vm13, %v2009_v18, %v2005_v41  ;;  %2457 = vmatpush.msra.mxu2 %v5552_v30  ;;  %2570 = vmatpush.msra.mxu3 %v5548_v15  ;;  %vm6485_vm11 = vcmp.lt.s32.totalorder %v4191_v7, 80  ;;  %v2165_v41 = vmul.f32 %v5437_v62, %v4917_v47 }
 0x6d4   : > { %2232 = vmatpush.msra.mxu0 %v5560_v50  ;;  %2345 = vmatpush.msra.mxu1 %v5564_v6  ;;  %vm6486_vm13 = vmmov %vm6485_vm11 }
 0x6d5   : > { %2458 = vmatpush.msra.mxu2 %v5564_v6  ;;  %2571 = vmatpush.msra.mxu3 %v5560_v50  ;;  %vm6487_vm10 = vmmov %vm6485_vm11 }
 0x6d6   : > { %2233 = vmatpush.msra.mxu0 %v5572_v13  ;;  %2346 = vmatpush.msra.mxu1 %v5576_v36  ;;  %v5598_v46 = vsel %vm6487_vm10, %v5480_v14, %v5482_v3  ;;  %vm6488_vm12 = vmmov %vm6487_vm10  ;;  %vm6501_vm10 = vcmp.lt.s32.totalorder %v4191_v7, 64 }
 0x6d7   : > { %2459 = vmatpush.msra.mxu2 %v5576_v36  ;;  %2572 = vmatpush.msra.mxu3 %v5572_v13  ;;  %v5604_v34 = vsel %vm6488_vm12, %v5482_v3, %v5480_v14  ;;  %v2163_v3 = vmul.f32 %v5398_v25, %v4917_v47  ;;  %vm6502_vm12 = vmmov %vm6501_vm10 }
 0x6da   : > { %v1989_v17 = vpop.permute.xlu0 %1988 }
 0x6db   : > { %v1973_v24 = vpop.permute.xlu1 %1972  ;;  %v5586_v59 = vsel %vm6485_vm11, %v1989_v17, %v1993_v45  ;;  %v5590_v58 = vsel %vm6486_vm13, %v1993_v45, %v1989_v17  ;;  %v2170_v45 = vmul.f32 %v5626_v55, %v4915_v48 }
 0x6dc   : > { %2234 = vmatpush.msra.mxu0 %v5586_v59  ;;  %2347 = vmatpush.msra.mxu1 %v5590_v58  ;;  %v5612_v12 = vsel %vm257_vm15, %v1973_v24, %v1977_v26  ;;  %v5616_v28 = vsel %vm257_vm15, %v1977_v26, %v1973_v24 }
 0x6dd   : > { %2460 = vmatpush.msra.mxu2 %v5590_v58  ;;  %2573 = vmatpush.msra.mxu3 %v5586_v59  ;;  %v2172_v17 = vmul.f32 %v5612_v12, %v4915_v48  ;;  %v2173_v24 = vmul.f32 %v5616_v28, %v4917_v47 }
 0x6de   : > { %2235 = vmatpush.msra.mxu0 %v5598_v46  ;;  %2348 = vmatpush.msra.mxu1 %v5604_v34 }
 0x6df   : > { %2461 = vmatpush.msra.mxu2 %v5604_v34  ;;  %2574 = vmatpush.msra.mxu3 %v5598_v46 }
 0x6e0   : > { %2236 = vmatpush.msra.mxu0 %v5612_v12  ;;  %2349 = vmatpush.msra.mxu1 %v5616_v28 }
 0x6e1   : > { %2462 = vmatpush.msra.mxu2 %v5616_v28  ;;  %2575 = vmatpush.msra.mxu3 %v5612_v12 }
 0x6e2   : > { %v1961_v38 = vpop.permute.xlu0 %1960  ;;  %2237 = vmatpush.msra.mxu0 %v5626_v55  ;;  %2350 = vmatpush.msra.mxu1 %v5632_v22 }
 0x6e3   : > { %v1955_v4 = vpop.permute.xlu1 %1954  ;;  %v5640_v56 = vsel %vm240_vm14, %v1957_v29, %v1961_v38  ;;  %v5644_v57 = vsel %vm240_vm14, %v1961_v38, %v1957_v29  ;;  %2463 = vmatpush.msra.mxu2 %v5632_v22  ;;  %2576 = vmatpush.msra.mxu3 %v5626_v55  ;;  %v2171_v29 = vmul.f32 %v5632_v22, %v4917_v47 }
 0x6e4   : > { %2238 = vmatpush.msra.mxu0 %v5640_v56  ;;  %2351 = vmatpush.msra.mxu1 %v5644_v57  ;;  %v5652_v14 = vsel %vm240_vm14, %v1955_v4, %v1959_v51  ;;  %v5656_v5 = vsel %vm240_vm14, %v1959_v51, %v1955_v4  ;;  %v2168_v26 = vmul.f32 %v5640_v56, %v4915_v48 }
 0x6e5   : > { %2464 = vmatpush.msra.mxu2 %v5644_v57  ;;  %2577 = vmatpush.msra.mxu3 %v5640_v56  ;;  %v2166_v2 = vmul.f32 %v5652_v14, %v4915_v48  ;;  %v2167_v42 = vmul.f32 %v5656_v5, %v4917_v47  ;;  %v2169_v18 = vmul.f32 %v5644_v57, %v4917_v47 }
 0x6e6   : > { %2239 = vmatpush.msra.mxu0 %v5652_v14  ;;  %2352 = vmatpush.msra.mxu1 %v5656_v5  ;;  %v2174_v38 = vmul.f32 %v5598_v46, %v4915_v48  ;;  %v2175_v4 = vmul.f32 %v5604_v34, %v4917_v47  ;;  %v2176_v51 = vmul.f32 %v5586_v59, %v4915_v48 }
 0x6e7   : > { %2465 = vmatpush.msra.mxu2 %v5656_v5  ;;  %2578 = vmatpush.msra.mxu3 %v5652_v14 }
 0x6e8   : > { %2240 = vmatpush.msra.mxu0 %v5433_v60  ;;  %2353 = vmatpush.msra.mxu1 %v5437_v62 }
 0x6e9   : > { %2466 = vmatpush.msra.mxu2 %v5437_v62  ;;  %2579 = vmatpush.msra.mxu3 %v5433_v60 }
 0x6ea   : > { %v2751_v8 = vpop.permute.xlu0 %2750  ;;  %2241 = vmatpush.msra.mxu0 %v5393_v39  ;;  %2354 = vmatpush.msra.mxu1 %v5398_v25 }
 0x6eb   : > { %v2753_v31 = vpop.permute.xlu1 %2752  ;;  %2467 = vmatpush.msra.mxu2 %v5398_v25  ;;  %2580 = vmatpush.msra.mxu3 %v5393_v39 }
 0x6ec   : > { %v2754_v53 = vsel %vm170_vm0, %v2751_v8, %v2753_v31  ;;  %v5680_v54 = vsel %vm170_vm0, %v2753_v31, %v2751_v8  ;;  %2242 = vmatmul.f32.vlgmr.msra.gmra.mxu0 %v2162_v40  ;;  %2355 = vmatmul.f32.vlgmr.msra.gmra.mxu1 %v2163_v3  ;;  %v2177_v8 = vmul.f32 %v5590_v58, %v4917_v47  ;;  %vm6489_vm0 = vcmp.lt.s32.totalorder %v4191_v7, 16 }
 0x6ed   : > { %2468 = vmatmul.f32.vlgmr.msra.gmra.mxu2 %v2162_v40  ;;  %2581 = vmatmul.f32.vlgmr.msra.gmra.mxu3 %v2163_v3  ;;  %v5686_v0 = vsel %vm4194_vm1, %v5680_v54, %v5472_v9  ;;  %v5691_v19 = vsel %vm4194_vm1, %v2754_v53, %v5470_v23  ;;  %v5704_v10 = vsel %vm4198_vm2, %v2754_v53, %v5470_v23  ;;  %vm6490_vm1 = vmmov %vm6489_vm0 }
 0x6ee   : > { %2766 = vrot.lane.b32.xlu0 %v5686_v0, %s4065_s17  ;;  %2762 = vrot.lane.b32.xlu2 %v5691_v19, %s4065_s17  ;;  %v2178_v40 = vmul.f32 %v5572_v13, %v4915_v48  ;;  %v2179_v3 = vmul.f32 %v5576_v36, %v4917_v47  ;;  %v2180_v31 = vmul.f32 %v5560_v50, %v4915_v48 }
 0x6ef   : > { %v2181_v53 = vmul.f32 %v5564_v6, %v4917_v47 }
 0x6f4   : > { %2245 = vmatmul.f32.gmra.mxu0 %v2164_v63  ;;  %2358 = vmatmul.f32.gmra.mxu1 %v2165_v41 }
 0x6f5   : > { %2471 = vmatmul.f32.gmra.mxu2 %v2164_v63  ;;  %2584 = vmatmul.f32.gmra.mxu3 %v2165_v41  ;;  %v2182_v63 = vmul.f32 %v5548_v15, %v4915_v48  ;;  %v2183_v41 = vmul.f32 %v5552_v30, %v4917_v47 }
 0x6f6   : > { %2760 = vrot.lane.b32.xlu0 %v5704_v10, %s4065_s17 }
 0x6fc   : > { %2248 = vmatmul.f32.gmra.mxu0 %v2166_v2  ;;  %2361 = vmatmul.f32.gmra.mxu1 %v2167_v42 }
 0x6fd   : > { %2474 = vmatmul.f32.gmra.mxu2 %v2166_v2  ;;  %2587 = vmatmul.f32.gmra.mxu3 %v2167_v42  ;;  %v2184_v2 = vmul.f32 %v5536_v61, %v4915_v48  ;;  %v2185_v42 = vmul.f32 %v5540_v43, %v4917_v47 }
 0x704   : > { %2251 = vmatmul.f32.gmra.mxu0 %v2168_v26  ;;  %2364 = vmatmul.f32.gmra.mxu1 %v2169_v18 }
 0x705   : > { %2477 = vmatmul.f32.gmra.mxu2 %v2168_v26  ;;  %2590 = vmatmul.f32.gmra.mxu3 %v2169_v18  ;;  %v2186_v26 = vmul.f32 %v5524_v20, %v4915_v48  ;;  %v2187_v18 = vmul.f32 %v5528_v49, %v4917_v47 }
 0x70c   : > { %2254 = vmatmul.f32.gmra.mxu0 %v2170_v45  ;;  %2367 = vmatmul.f32.gmra.mxu1 %v2171_v29 }
 0x70d   : > { %2480 = vmatmul.f32.gmra.mxu2 %v2170_v45  ;;  %2593 = vmatmul.f32.gmra.mxu3 %v2171_v29  ;;  %v2188_v45 = vmul.f32 %v5514_v1, %v4915_v48  ;;  %v2189_v29 = vmul.f32 %v5518_v52, %v4917_v47 }
 0x714   : > { %2257 = vmatmul.f32.gmra.mxu0 %v2172_v17  ;;  %2370 = vmatmul.f32.gmra.mxu1 %v2173_v24 }
 0x715   : > { %2483 = vmatmul.f32.gmra.mxu2 %v2172_v17  ;;  %2596 = vmatmul.f32.gmra.mxu3 %v2173_v24  ;;  %v2190_v17 = vmul.f32 %v5500_v33, %v4915_v48  ;;  %v2191_v24 = vmul.f32 %v5504_v16, %v4917_v47 }
 0x71c   : > { %2260 = vmatmul.f32.gmra.mxu0 %v2174_v38  ;;  %2373 = vmatmul.f32.gmra.mxu1 %v2175_v4 }
 0x71d   : > { %2486 = vmatmul.f32.gmra.mxu2 %v2174_v38  ;;  %2599 = vmatmul.f32.gmra.mxu3 %v2175_v4 }
 0x724   : > { %2263 = vmatmul.f32.gmra.mxu0 %v2176_v51  ;;  %2376 = vmatmul.f32.gmra.mxu1 %v2177_v8 }
 0x725   : > { %2489 = vmatmul.f32.gmra.mxu2 %v2176_v51  ;;  %2602 = vmatmul.f32.gmra.mxu3 %v2177_v8 }
 0x72c   : > { %2266 = vmatmul.f32.gmra.mxu0 %v2178_v40  ;;  %2379 = vmatmul.f32.gmra.mxu1 %v2179_v3 }
 0x72d   : > { %2492 = vmatmul.f32.gmra.mxu2 %v2178_v40  ;;  %2605 = vmatmul.f32.gmra.mxu3 %v2179_v3 }
 0x734   : > { %2269 = vmatmul.f32.gmra.mxu0 %v2180_v31  ;;  %2382 = vmatmul.f32.gmra.mxu1 %v2181_v53 }
 0x735   : > { %2495 = vmatmul.f32.gmra.mxu2 %v2180_v31  ;;  %2608 = vmatmul.f32.gmra.mxu3 %v2181_v53  ;;  %v2192_v31 = vmul.f32 %v5490_v35, %v4915_v48  ;;  %v2193_v53 = vmul.f32 %v5494_v32, %v4917_v47 }
 0x73c   : > { %2272 = vmatmul.f32.gmra.mxu0 %v2182_v63  ;;  %2385 = vmatmul.f32.gmra.mxu1 %v2183_v41 }
 0x73d   : > { %2498 = vmatmul.f32.gmra.mxu2 %v2182_v63  ;;  %2611 = vmatmul.f32.gmra.mxu3 %v2183_v41  ;;  %v5786_v63 = vsel %vm4198_vm2, %v5680_v54, %v5472_v9  ;;  %v2194_v41 = vmul.f32 %v5398_v25, %v4915_v48  ;;  %v2196_v25 = vmul.f32 %v5437_v62, %v4915_v48  ;;  %vm6491_vm2 = vmmov %vm6489_vm0 }
 0x73e   : > { %v2198_v62 = vmul.f32 %v5656_v5, %v4915_v48  ;;  %v2200_v5 = vmul.f32 %v5644_v57, %v4915_v48  ;;  %v2202_v57 = vmul.f32 %v5632_v22, %v4915_v48  ;;  %v2204_v22 = vmul.f32 %v5616_v28, %v4915_v48 }
 0x73f   : > { %v2206_v28 = vmul.f32 %v5604_v34, %v4915_v48  ;;  %v2208_v34 = vmul.f32 %v5590_v58, %v4915_v48  ;;  %v2210_v58 = vmul.f32 %v5576_v36, %v4915_v48  ;;  %v2212_v36 = vmul.f32 %v5564_v6, %v4915_v48 }
 0x740   : > { %v2214_v6 = vmul.f32 %v5552_v30, %v4915_v48  ;;  %v2216_v30 = vmul.f32 %v5540_v43, %v4915_v48  ;;  %v2218_v43 = vmul.f32 %v5528_v49, %v4915_v48  ;;  %v2220_v49 = vmul.f32 %v5518_v52, %v4915_v48 }
 0x744   : > { %2275 = vmatmul.f32.gmra.mxu0 %v2184_v2  ;;  %2388 = vmatmul.f32.gmra.mxu1 %v2185_v42 }
 0x745   : > { %2501 = vmatmul.f32.gmra.mxu2 %v2184_v2  ;;  %2614 = vmatmul.f32.gmra.mxu3 %v2185_v42  ;;  %v2195_v2 = vmul.f32 %v5393_v39, %v4917_v47  ;;  %v2197_v39 = vmul.f32 %v5433_v60, %v4917_v47  ;;  %v2199_v60 = vmul.f32 %v5652_v14, %v4917_v47 }
 0x746   : > { %v2201_v14 = vmul.f32 %v5640_v56, %v4917_v47  ;;  %v2203_v56 = vmul.f32 %v5626_v55, %v4917_v47  ;;  %v2205_v55 = vmul.f32 %v5612_v12, %v4917_v47  ;;  %v2207_v12 = vmul.f32 %v5598_v46, %v4917_v47 }
 0x747   : > { %v2209_v46 = vmul.f32 %v5586_v59, %v4917_v47  ;;  %v2211_v59 = vmul.f32 %v5572_v13, %v4917_v47  ;;  %v2213_v13 = vmul.f32 %v5560_v50, %v4917_v47  ;;  %v2215_v50 = vmul.f32 %v5548_v15, %v4917_v47 }
 0x748   : > { %v2763_v38 = vpop.permute.xlu2 %2762  ;;  %v2217_v15 = vmul.f32 %v5536_v61, %v4917_v47  ;;  %v2219_v61 = vmul.f32 %v5524_v20, %v4917_v47 }
 0x74c   : > { %2278 = vmatmul.f32.gmra.mxu0 %v2186_v26  ;;  %2391 = vmatmul.f32.gmra.mxu1 %v2187_v18 }
 0x74d   : > { %2504 = vmatmul.f32.gmra.mxu2 %v2186_v26  ;;  %2617 = vmatmul.f32.gmra.mxu3 %v2187_v18 }
 0x754   : > { %2281 = vmatmul.f32.gmra.mxu0 %v2188_v45  ;;  %2394 = vmatmul.f32.gmra.mxu1 %v2189_v29 }
 0x755   : > { %2507 = vmatmul.f32.gmra.mxu2 %v2188_v45  ;;  %2620 = vmatmul.f32.gmra.mxu3 %v2189_v29 }
 0x75c   : > { %2284 = vmatmul.f32.gmra.mxu0 %v2190_v17  ;;  %2397 = vmatmul.f32.gmra.mxu1 %v2191_v24 }
 0x75d   : > { %2510 = vmatmul.f32.gmra.mxu2 %v2190_v17  ;;  %2623 = vmatmul.f32.gmra.mxu3 %v2191_v24 }
 0x760   : > { %v2767_v4 = vpop.permute.xlu0 %2766 }
 0x761   : > { %v2769_v51 = vsel %vm185_vm3, %v2763_v38, %v2767_v4  ;;  %v2771_v8 = vsel %vm185_vm3, %v2767_v4, %v2763_v38 }
 0x762   : > { %v5767_v40 = vsel %vm4223_vm4, %v2771_v8, %v5686_v0  ;;  %v5772_v3 = vsel %vm4223_vm4, %v2769_v51, %v5691_v19  ;;  %vm6493_vm4 = vcmp.lt.s32.totalorder %v4191_v7, 32 }
 0x763   : > { %2782 = vrot.lane.b32.xlu2 %v5767_v40, %s4066_s26  ;;  %2778 = vrot.lane.b32.xlu1 %v5772_v3, %s4066_s26 }
 0x764   : > { %2287 = vmatmul.f32.gmra.mxu0 %v2192_v31  ;;  %2400 = vmatmul.f32.gmra.mxu1 %v2193_v53 }
 0x765   : > { %2513 = vmatmul.f32.gmra.mxu2 %v2192_v31  ;;  %2626 = vmatmul.f32.gmra.mxu3 %v2193_v53 }
 0x768   : > { %v2761_v37 = vpop.permute.xlu0 %2760 }
 0x769   : > { %v2243_v21 = vpop.f32.mrf.mxu0  ;;  %v2356_v0 = vpop.f32.mrf.mxu1 }
 0x76a   : > { %v2357_v19 = vadd.f32 %v2356_v0, %v2243_v21 }
 0x76b   : > { %2764 = vrot.lane.b32.xlu1 %v5786_v63, %s4065_s17  ;;  %s4010_s17 = scalar_lea.hbm %s4009_s25, 2048 }
 0x76c   : > { %3766 = vst [vmem:[%s4682_s13 + $0x400] sm:$0xff] %v2357_v19  ;;  %2290 = vmatmul.f32.gmra.mxu0 %v2194_v41  ;;  %2403 = vmatmul.f32.gmra.mxu1 %v2195_v2  ;;  %p4011_p6 = scmp.ne.s32.totalorder %s4009_s25, %s4010_s17 }
 0x76d   : > { %2516 = vmatmul.f32.gmra.mxu2 %v2194_v41  ;;  %2629 = vmatmul.f32.gmra.mxu3 %v2195_v2 }
 0x76e   : > { %p4012_p9 = pnand %p4011_p6, %p4136_p11 }
 0x770   : > { %v2469_v42 = vpop.f32.mrf.mxu2  ;;  %v2582_v11 = vpop.f32.mrf.mxu3  ;;  %p4013_p13 = pneg %p4012_p9 }
 0x771   : > { %v2583_v54 = vadd.f32 %v2582_v11, %v2469_v42  ;;  %v2246_v26 = vpop.f32.mrf.mxu0  ;;  %v2359_v18 = vpop.f32.mrf.mxu1 }
 0x772   : > { %v2360_v45 = vadd.f32 %v2359_v18, %v2246_v26 }
 0x773   : > { %3767 = vst [vmem:[%s4682_s13 + $0x408] sm:$0xff] %v2583_v54 }
 0x774   : > { %3768 = vst [vmem:[%s4682_s13 + $0x410] sm:$0xff] %v2360_v45  ;;  %2293 = vmatmul.f32.gmra.mxu0 %v2196_v25  ;;  %2406 = vmatmul.f32.gmra.mxu1 %v2197_v39 }
 0x775   : > { %2519 = vmatmul.f32.gmra.mxu2 %v2196_v25  ;;  %2632 = vmatmul.f32.gmra.mxu3 %v2197_v39 }
 0x778   : > { %v2472_v29 = vpop.f32.mrf.mxu2  ;;  %v2585_v17 = vpop.f32.mrf.mxu3 }
 0x779   : > { %v2586_v24 = vadd.f32 %v2585_v17, %v2472_v29  ;;  %v2249_v38 = vpop.f32.mrf.mxu0  ;;  %v2362_v4 = vpop.f32.mrf.mxu1 }
 0x77a   : > { %v2363_v51 = vadd.f32 %v2362_v4, %v2249_v38 }
 0x77b   : > { %3769 = vst [vmem:[%s4682_s13 + $0x418] sm:$0xff] %v2586_v24 }
 0x77c   : > { %3770 = vst [vmem:[%s4682_s13 + $0x420] sm:$0xff] %v2363_v51  ;;  %2296 = vmatmul.f32.gmra.mxu0 %v2198_v62  ;;  %2409 = vmatmul.f32.gmra.mxu1 %v2199_v60 }
 0x77d   : > { %2522 = vmatmul.f32.gmra.mxu2 %v2198_v62  ;;  %2635 = vmatmul.f32.gmra.mxu3 %v2199_v60 }
 0x780   : > { %v2475_v8 = vpop.f32.mrf.mxu2  ;;  %v2588_v31 = vpop.f32.mrf.mxu3 }
 0x781   : > { %v2589_v53 = vadd.f32 %v2588_v31, %v2475_v8  ;;  %v2252_v21 = vpop.f32.mrf.mxu0  ;;  %v2365_v0 = vpop.f32.mrf.mxu1 }
 0x782   : > { %v2366_v19 = vadd.f32 %v2365_v0, %v2252_v21 }
 0x783   : > { %3771 = vst [vmem:[%s4682_s13 + $0x428] sm:$0xff] %v2589_v53 }
 0x784   : > { %3772 = vst [vmem:[%s4682_s13 + $0x430] sm:$0xff] %v2366_v19  ;;  %2299 = vmatmul.f32.gmra.mxu0 %v2200_v5  ;;  %2412 = vmatmul.f32.gmra.mxu1 %v2201_v14 }
 0x785   : > { %2525 = vmatmul.f32.gmra.mxu2 %v2200_v5  ;;  %2638 = vmatmul.f32.gmra.mxu3 %v2201_v14 }
 0x788   : > { %v2478_v41 = vpop.f32.mrf.mxu2  ;;  %v2591_v2 = vpop.f32.mrf.mxu3 }
 0x789   : > { %v2592_v42 = vadd.f32 %v2591_v2, %v2478_v41  ;;  %v2255_v11 = vpop.f32.mrf.mxu0  ;;  %v2368_v54 = vpop.f32.mrf.mxu1 }
 0x78a   : > { %v2369_v26 = vadd.f32 %v2368_v54, %v2255_v11 }
 0x78b   : > { %3773 = vst [vmem:[%s4682_s13 + $0x438] sm:$0xff] %v2592_v42 }
 0x78c   : > { %3774 = vst [vmem:[%s4682_s13 + $0x440] sm:$0xff] %v2369_v26  ;;  %2302 = vmatmul.f32.gmra.mxu0 %v2202_v57  ;;  %2415 = vmatmul.f32.gmra.mxu1 %v2203_v56 }
 0x78d   : > { %2528 = vmatmul.f32.gmra.mxu2 %v2202_v57  ;;  %2641 = vmatmul.f32.gmra.mxu3 %v2203_v56 }
 0x790   : > { %v2481_v18 = vpop.f32.mrf.mxu2  ;;  %v2594_v45 = vpop.f32.mrf.mxu3 }
 0x791   : > { %v2595_v25 = vadd.f32 %v2594_v45, %v2481_v18  ;;  %v2258_v39 = vpop.f32.mrf.mxu0  ;;  %v2371_v29 = vpop.f32.mrf.mxu1 }
 0x792   : > { %v2372_v17 = vadd.f32 %v2371_v29, %v2258_v39 }
 0x793   : > { %3775 = vst [vmem:[%s4682_s13 + $0x448] sm:$0xff] %v2595_v25 }
 0x794   : > { %3776 = vst [vmem:[%s4682_s13 + $0x450] sm:$0xff] %v2372_v17  ;;  %2305 = vmatmul.f32.gmra.mxu0 %v2204_v22  ;;  %2418 = vmatmul.f32.gmra.mxu1 %v2205_v55 }
 0x795   : > { %2531 = vmatmul.f32.gmra.mxu2 %v2204_v22  ;;  %2644 = vmatmul.f32.gmra.mxu3 %v2205_v55 }
 0x798   : > { %v2484_v24 = vpop.f32.mrf.mxu2  ;;  %v2597_v38 = vpop.f32.mrf.mxu3 }
 0x799   : > { %v2598_v4 = vadd.f32 %v2597_v38, %v2484_v24  ;;  %v2261_v51 = vpop.f32.mrf.mxu0  ;;  %v2374_v62 = vpop.f32.mrf.mxu1 }
 0x79a   : > { %v2375_v60 = vadd.f32 %v2374_v62, %v2261_v51 }
 0x79b   : > { %3777 = vst [vmem:[%s4682_s13 + $0x458] sm:$0xff] %v2598_v4 }
 0x79c   : > { %3778 = vst [vmem:[%s4682_s13 + $0x460] sm:$0xff] %v2375_v60  ;;  %2308 = vmatmul.f32.gmra.mxu0 %v2206_v28  ;;  %2421 = vmatmul.f32.gmra.mxu1 %v2207_v12 }
 0x79d   : > { %2534 = vmatmul.f32.gmra.mxu2 %v2206_v28  ;;  %2647 = vmatmul.f32.gmra.mxu3 %v2207_v12 }
 0x7a0   : > { %v2487_v8 = vpop.f32.mrf.mxu2  ;;  %v2600_v31 = vpop.f32.mrf.mxu3 }
 0x7a1   : > { %v2601_v53 = vadd.f32 %v2600_v31, %v2487_v8  ;;  %v2264_v21 = vpop.f32.mrf.mxu0  ;;  %v2377_v0 = vpop.f32.mrf.mxu1 }
 0x7a2   : > { %v2378_v19 = vadd.f32 %v2377_v0, %v2264_v21 }
 0x7a3   : > { %3779 = vst [vmem:[%s4682_s13 + $0x468] sm:$0xff] %v2601_v53 }
 0x7a4   : > { %3780 = vst [vmem:[%s4682_s13 + $0x470] sm:$0xff] %v2378_v19  ;;  %2311 = vmatmul.f32.gmra.mxu0 %v2208_v34  ;;  %2424 = vmatmul.f32.gmra.mxu1 %v2209_v46 }
 0x7a5   : > { %2537 = vmatmul.f32.gmra.mxu2 %v2208_v34  ;;  %2650 = vmatmul.f32.gmra.mxu3 %v2209_v46 }
 0x7a8   : > { %v2490_v5 = vpop.f32.mrf.mxu2  ;;  %v2603_v14 = vpop.f32.mrf.mxu3 }
 0x7a9   : > { %v2604_v41 = vadd.f32 %v2603_v14, %v2490_v5  ;;  %v2267_v2 = vpop.f32.mrf.mxu0  ;;  %v2380_v42 = vpop.f32.mrf.mxu1 }
 0x7aa   : > { %v2381_v11 = vadd.f32 %v2380_v42, %v2267_v2 }
 0x7ab   : > { %3781 = vst [vmem:[%s4682_s13 + $0x478] sm:$0xff] %v2604_v41  ;;  %v2221_v41 = vmul.f32 %v5514_v1, %v4917_v47 }
 0x7ac   : > { %3782 = vst [vmem:[%s4682_s13 + $0x480] sm:$0xff] %v2381_v11  ;;  %2314 = vmatmul.f32.gmra.mxu0 %v2210_v58  ;;  %2427 = vmatmul.f32.gmra.mxu1 %v2211_v59 }
 0x7ad   : > { %2540 = vmatmul.f32.gmra.mxu2 %v2210_v58  ;;  %2653 = vmatmul.f32.gmra.mxu3 %v2211_v59 }
 0x7b0   : > { %v2493_v54 = vpop.f32.mrf.mxu2  ;;  %v2606_v26 = vpop.f32.mrf.mxu3 }
 0x7b1   : > { %v2607_v57 = vadd.f32 %v2606_v26, %v2493_v54  ;;  %v2270_v56 = vpop.f32.mrf.mxu0  ;;  %v2383_v18 = vpop.f32.mrf.mxu1 }
 0x7b2   : > { %v2384_v45 = vadd.f32 %v2383_v18, %v2270_v56  ;;  %v2222_v18 = vmul.f32 %v5504_v16, %v4915_v48 }
 0x7b3   : > { %3783 = vst [vmem:[%s4682_s13 + $0x488] sm:$0xff] %v2607_v57 }
 0x7b4   : > { %3784 = vst [vmem:[%s4682_s13 + $0x490] sm:$0xff] %v2384_v45  ;;  %2317 = vmatmul.f32.gmra.mxu0 %v2212_v36  ;;  %2430 = vmatmul.f32.gmra.mxu1 %v2213_v13 }
 0x7b5   : > { %2543 = vmatmul.f32.gmra.mxu2 %v2212_v36  ;;  %2656 = vmatmul.f32.gmra.mxu3 %v2213_v13 }
 0x7b8   : > { %v2496_v25 = vpop.f32.mrf.mxu2  ;;  %v2609_v39 = vpop.f32.mrf.mxu3 }
 0x7b9   : > { %v2610_v29 = vadd.f32 %v2609_v39, %v2496_v25  ;;  %v2273_v17 = vpop.f32.mrf.mxu0  ;;  %v2386_v22 = vpop.f32.mrf.mxu1 }
 0x7ba   : > { %v2387_v55 = vadd.f32 %v2386_v22, %v2273_v17 }
 0x7bb   : > { %3785 = vst [vmem:[%s4682_s13 + $0x498] sm:$0xff] %v2610_v29 }
 0x7bc   : > { %3786 = vst [vmem:[%s4682_s13 + $0x4a0] sm:$0xff] %v2387_v55  ;;  %2320 = vmatmul.f32.gmra.mxu0 %v2214_v6  ;;  %2433 = vmatmul.f32.gmra.mxu1 %v2215_v50 }
 0x7bd   : > { %2546 = vmatmul.f32.gmra.mxu2 %v2214_v6  ;;  %2659 = vmatmul.f32.gmra.mxu3 %v2215_v50  ;;  %v2783_v20 = vpop.permute.xlu2 %2782 }
 0x7c0   : > { %v2499_v24 = vpop.f32.mrf.mxu2  ;;  %v2612_v38 = vpop.f32.mrf.mxu3 }
 0x7c1   : > { %v2613_v4 = vadd.f32 %v2612_v38, %v2499_v24  ;;  %v2276_v51 = vpop.f32.mrf.mxu0  ;;  %v2389_v62 = vpop.f32.mrf.mxu1 }
 0x7c2   : > { %v2390_v60 = vadd.f32 %v2389_v62, %v2276_v51 }
 0x7c3   : > { %3787 = vst [vmem:[%s4682_s13 + $0x4a8] sm:$0xff] %v2613_v4 }
 0x7c4   : > { %3788 = vst [vmem:[%s4682_s13 + $0x4b0] sm:$0xff] %v2390_v60  ;;  %2323 = vmatmul.f32.gmra.mxu0 %v2216_v30  ;;  %2436 = vmatmul.f32.gmra.mxu1 %v2217_v15 }
 0x7c5   : > { %2549 = vmatmul.f32.gmra.mxu2 %v2216_v30  ;;  %2662 = vmatmul.f32.gmra.mxu3 %v2217_v15 }
 0x7c8   : > { %v2502_v28 = vpop.f32.mrf.mxu2  ;;  %v2615_v12 = vpop.f32.mrf.mxu3 }
 0x7c9   : > { %v2616_v8 = vadd.f32 %v2615_v12, %v2502_v28  ;;  %v2279_v31 = vpop.f32.mrf.mxu0  ;;  %v2392_v53 = vpop.f32.mrf.mxu1 }
 0x7ca   : > { %v2393_v21 = vadd.f32 %v2392_v53, %v2279_v31 }
 0x7cb   : > { %3789 = vst [vmem:[%s4682_s13 + $0x4b8] sm:$0xff] %v2616_v8 }
 0x7cc   : > { %3790 = vst [vmem:[%s4682_s13 + $0x4c0] sm:$0xff] %v2393_v21  ;;  %2326 = vmatmul.f32.gmra.mxu0 %v2218_v43  ;;  %2439 = vmatmul.f32.gmra.mxu1 %v2219_v61 }
 0x7cd   : > { %2552 = vmatmul.f32.gmra.mxu2 %v2218_v43  ;;  %2665 = vmatmul.f32.gmra.mxu3 %v2219_v61 }
 0x7d0   : > { %v2505_v0 = vpop.f32.mrf.mxu2  ;;  %v2618_v19 = vpop.f32.mrf.mxu3 }
 0x7d1   : > { %v2619_v34 = vadd.f32 %v2618_v19, %v2505_v0  ;;  %v2282_v46 = vpop.f32.mrf.mxu0  ;;  %v2395_v5 = vpop.f32.mrf.mxu1 }
 0x7d2   : > { %v2396_v14 = vadd.f32 %v2395_v5, %v2282_v46 }
 0x7d3   : > { %3791 = vst [vmem:[%s4682_s13 + $0x4c8] sm:$0xff] %v2619_v34 }
 0x7d4   : > { %3792 = vst [vmem:[%s4682_s13 + $0x4d0] sm:$0xff] %v2396_v14  ;;  %2329 = vmatmul.f32.gmra.mxu0 %v2220_v49  ;;  %2442 = vmatmul.f32.gmra.mxu1 %v2221_v41 }
 0x7d5   : > { %2555 = vmatmul.f32.gmra.mxu2 %v2220_v49  ;;  %2668 = vmatmul.f32.gmra.mxu3 %v2221_v41  ;;  %v2779_v2 = vpop.permute.xlu1 %2778 }
 0x7d6   : > { %v2785_v42 = vsel %vm202_vm6, %v2779_v2, %v2783_v20  ;;  %v2787_v11 = vsel %vm202_vm6, %v2783_v20, %v2779_v2 }
 0x7d7   : > { %v2791_v1 = vsel %vm4252_vm7, %v2787_v11, %v5767_v40  ;;  %v2790_v52 = vsel %vm4252_vm7, %v2785_v42, %v5772_v3  ;;  %v2223_v40 = vmul.f32 %v5500_v33, %v4917_v47  ;;  %vm6496_vm7 = vmmov %vm6493_vm4 }
 0x7d8   : > { %v2508_v58 = vpop.f32.mrf.mxu2  ;;  %v2621_v59 = vpop.f32.mrf.mxu3  ;;  %2798 = vrot.lane.b32.xlu0 %v2791_v1, %s4067_s27  ;;  %2794 = vrot.lane.b32.xlu2 %v2790_v52, %s4067_s27 }
 0x7d9   : > { %v2622_v54 = vadd.f32 %v2621_v59, %v2508_v58  ;;  %v2285_v26 = vpop.f32.mrf.mxu0  ;;  %v2398_v57 = vpop.f32.mrf.mxu1 }
 0x7da   : > { %v2399_v56 = vadd.f32 %v2398_v57, %v2285_v26 }
 0x7db   : > { %3793 = vst [vmem:[%s4682_s13 + $0x4d8] sm:$0xff] %v2622_v54 }
 0x7dc   : > { %3794 = vst [vmem:[%s4682_s13 + $0x4e0] sm:$0xff] %v2399_v56  ;;  %2332 = vmatmul.f32.gmra.mxu0 %v2222_v18  ;;  %2445 = vmatmul.f32.gmra.mxu1 %v2223_v40 }
 0x7dd   : > { %2558 = vmatmul.f32.gmra.mxu2 %v2222_v18  ;;  %2671 = vmatmul.f32.gmra.mxu3 %v2223_v40  ;;  %v2765_v3 = vpop.permute.xlu1 %2764 }
 0x7de   : > { %v2768_v45 = vsel %vm185_vm3, %v2761_v37, %v2765_v3  ;;  %v2770_v36 = vsel %vm185_vm3, %v2765_v3, %v2761_v37  ;;  %vm6492_vm3 = vmmov %vm6489_vm0 }
 0x7df   : > { %v5898_v33 = vsel %vm4234_vm5, %v2770_v36, %v5786_v63  ;;  %v5903_v16 = vsel %vm4234_vm5, %v2768_v45, %v5704_v10  ;;  %v2224_v63 = vmul.f32 %v5494_v32, %v4915_v48  ;;  %vm6494_vm5 = vmmov %vm6493_vm4 }
 0x7e0   : > { %v2511_v13 = vpop.f32.mrf.mxu2  ;;  %v2624_v25 = vpop.f32.mrf.mxu3  ;;  %2780 = vrot.lane.b32.xlu2 %v5898_v33, %s4066_s26  ;;  %2776 = vrot.lane.b32.xlu1 %v5903_v16, %s4066_s26 }
 0x7e1   : > { %v2625_v39 = vadd.f32 %v2624_v25, %v2511_v13  ;;  %v2288_v29 = vpop.f32.mrf.mxu0  ;;  %v2401_v17 = vpop.f32.mrf.mxu1 }
 0x7e2   : > { %v2402_v22 = vadd.f32 %v2401_v17, %v2288_v29 }
 0x7e3   : > { %3795 = vst [vmem:[%s4682_s13 + $0x4e8] sm:$0xff] %v2625_v39 }
 0x7e4   : > { %3796 = vst [vmem:[%s4682_s13 + $0x4f0] sm:$0xff] %v2402_v22  ;;  %2335 = vmatmul.f32.gmra.mxu0 %v2224_v63  ;;  %2448 = vmatmul.f32.gmra.mxu1 %v2225_v27 }
 0x7e5   : > { %2561 = vmatmul.f32.gmra.mxu2 %v2224_v63  ;;  %2674 = vmatmul.f32.gmra.mxu3 %v2225_v27 }
 0x7e8   : > { %v2514_v10 = vpop.f32.mrf.mxu2  ;;  %v2627_v55 = vpop.f32.mrf.mxu3 }
 0x7e9   : > { %v2628_v6 = vadd.f32 %v2627_v55, %v2514_v10  ;;  %v2291_v50 = vpop.f32.mrf.mxu0  ;;  %v2404_v24 = vpop.f32.mrf.mxu1 }
 0x7ea   : > { %v2405_v38 = vadd.f32 %v2404_v24, %v2291_v50 }
 0x7eb   : > { %3797 = vst [vmem:[%s4682_s13 + $0x4f8] sm:$0xff] %v2628_v6 }
 0x7ec   : > { %3798 = vst [vmem:[%s4682_s13 + $0x500] sm:$0xff] %v2405_v38 }
 0x7f0   : > { %v2517_v48 = vpop.f32.mrf.mxu2  ;;  %v2630_v47 = vpop.f32.mrf.mxu3 }
 0x7f1   : > { %v2631_v35 = vadd.f32 %v2630_v47, %v2517_v48  ;;  %v2294_v32 = vpop.f32.mrf.mxu0  ;;  %v2407_v4 = vpop.f32.mrf.mxu1 }
 0x7f2   : > { %v2408_v51 = vadd.f32 %v2407_v4, %v2294_v32 }
 0x7f3   : > { %3799 = vst [vmem:[%s4682_s13 + $0x508] sm:$0xff] %v2631_v35 }
 0x7f4   : > { %3800 = vst [vmem:[%s4682_s13 + $0x510] sm:$0xff] %v2408_v51 }
 0x7f8   : > { %v2520_v62 = vpop.f32.mrf.mxu2  ;;  %v2633_v60 = vpop.f32.mrf.mxu3 }
 0x7f9   : > { %v2634_v30 = vadd.f32 %v2633_v60, %v2520_v62  ;;  %v2297_v15 = vpop.f32.mrf.mxu0  ;;  %v2410_v28 = vpop.f32.mrf.mxu1 }
 0x7fa   : > { %v2411_v12 = vadd.f32 %v2410_v28, %v2297_v15 }
 0x7fb   : > { %3801 = vst [vmem:[%s4682_s13 + $0x518] sm:$0xff] %v2634_v30 }
 0x7fc   : > { %3802 = vst [vmem:[%s4682_s13 + $0x520] sm:$0xff] %v2411_v12 }
 0x800   : > { %v2523_v8 = vpop.f32.mrf.mxu2  ;;  %v2636_v31 = vpop.f32.mrf.mxu3 }
 0x801   : > { %v2637_v53 = vadd.f32 %v2636_v31, %v2523_v8  ;;  %v2300_v21 = vpop.f32.mrf.mxu0  ;;  %v2413_v43 = vpop.f32.mrf.mxu1 }
 0x802   : > { %v2414_v61 = vadd.f32 %v2413_v43, %v2300_v21 }
 0x803   : > { %3803 = vst [vmem:[%s4682_s13 + $0x528] sm:$0xff] %v2637_v53 }
 0x804   : > { %3804 = vst [vmem:[%s4682_s13 + $0x530] sm:$0xff] %v2414_v61 }
 0x808   : > { %v2526_v0 = vpop.f32.mrf.mxu2  ;;  %v2639_v19 = vpop.f32.mrf.mxu3 }
 0x809   : > { %v2640_v34 = vadd.f32 %v2639_v19, %v2526_v0  ;;  %v2303_v46 = vpop.f32.mrf.mxu0  ;;  %v2416_v5 = vpop.f32.mrf.mxu1 }
 0x80a   : > { %v2417_v14 = vadd.f32 %v2416_v5, %v2303_v46 }
 0x80b   : > { %3805 = vst [vmem:[%s4682_s13 + $0x538] sm:$0xff] %v2640_v34 }
 0x80c   : > { %3806 = vst [vmem:[%s4682_s13 + $0x540] sm:$0xff] %v2417_v14 }
 0x810   : > { %v2529_v49 = vpop.f32.mrf.mxu2  ;;  %v2642_v41 = vpop.f32.mrf.mxu3 }
 0x811   : > { %v2643_v20 = vadd.f32 %v2642_v41, %v2529_v49  ;;  %v2306_v2 = vpop.f32.mrf.mxu0  ;;  %v2419_v42 = vpop.f32.mrf.mxu1 }
 0x812   : > { %v2420_v11 = vadd.f32 %v2419_v42, %v2306_v2 }
 0x813   : > { %3807 = vst [vmem:[%s4682_s13 + $0x548] sm:$0xff] %v2643_v20 }
 0x814   : > { %3808 = vst [vmem:[%s4682_s13 + $0x550] sm:$0xff] %v2420_v11 }
 0x818   : > { %v2532_v1 = vpop.f32.mrf.mxu2  ;;  %v2645_v52 = vpop.f32.mrf.mxu3 }
 0x819   : > { %v2646_v58 = vadd.f32 %v2645_v52, %v2532_v1  ;;  %v2309_v59 = vpop.f32.mrf.mxu0  ;;  %v2422_v54 = vpop.f32.mrf.mxu1 }
 0x81a   : > { %v2423_v26 = vadd.f32 %v2422_v54, %v2309_v59 }
 0x81b   : > { %3809 = vst [vmem:[%s4682_s13 + $0x558] sm:$0xff] %v2646_v58 }
 0x81c   : > { %3810 = vst [vmem:[%s4682_s13 + $0x560] sm:$0xff] %v2423_v26 }
 0x820   : > { %v2535_v57 = vpop.f32.mrf.mxu2  ;;  %v2648_v56 = vpop.f32.mrf.mxu3 }
 0x821   : > { %v2649_v18 = vadd.f32 %v2648_v56, %v2535_v57  ;;  %v2312_v40 = vpop.f32.mrf.mxu0  ;;  %v2425_v37 = vpop.f32.mrf.mxu1 }
 0x822   : > { %v2426_v3 = vadd.f32 %v2425_v37, %v2312_v40 }
 0x823   : > { %3811 = vst [vmem:[%s4682_s13 + $0x568] sm:$0xff] %v2649_v18 }
 0x824   : > { %3812 = vst [vmem:[%s4682_s13 + $0x570] sm:$0xff] %v2426_v3 }
 0x828   : > { %v2538_v45 = vpop.f32.mrf.mxu2  ;;  %v2651_v36 = vpop.f32.mrf.mxu3 }
 0x829   : > { %v2652_v13 = vadd.f32 %v2651_v36, %v2538_v45  ;;  %v2315_v25 = vpop.f32.mrf.mxu0  ;;  %v2428_v39 = vpop.f32.mrf.mxu1 }
 0x82a   : > { %v2429_v29 = vadd.f32 %v2428_v39, %v2315_v25 }
 0x82b   : > { %3813 = vst [vmem:[%s4682_s13 + $0x578] sm:$0xff] %v2652_v13 }
 0x82c   : > { %3814 = vst [vmem:[%s4682_s13 + $0x580] sm:$0xff] %v2429_v29 }
 0x830   : > { %v2541_v17 = vpop.f32.mrf.mxu2  ;;  %v2654_v22 = vpop.f32.mrf.mxu3 }
 0x831   : > { %v2655_v63 = vadd.f32 %v2654_v22, %v2541_v17  ;;  %v2318_v27 = vpop.f32.mrf.mxu0  ;;  %v2431_v10 = vpop.f32.mrf.mxu1 }
 0x832   : > { %v2432_v55 = vadd.f32 %v2431_v10, %v2318_v27  ;;  %v2795_v30 = vpop.permute.xlu2 %2794 }
 0x833   : > { %3815 = vst [vmem:[%s4682_s13 + $0x588] sm:$0xff] %v2655_v63 }
 0x834   : > { %3816 = vst [vmem:[%s4682_s13 + $0x590] sm:$0xff] %v2432_v55 }
 0x838   : > { %v2544_v6 = vpop.f32.mrf.mxu2  ;;  %v2657_v50 = vpop.f32.mrf.mxu3 }
 0x839   : > { %v2658_v24 = vadd.f32 %v2657_v50, %v2544_v6  ;;  %v2321_v38 = vpop.f32.mrf.mxu0  ;;  %v2434_v48 = vpop.f32.mrf.mxu1 }
 0x83a   : > { %v2435_v47 = vadd.f32 %v2434_v48, %v2321_v38  ;;  %v2781_v34 = vpop.permute.xlu2 %2780 }
 0x83b   : > { %3817 = vst [vmem:[%s4682_s13 + $0x598] sm:$0xff] %v2658_v24 }
 0x83c   : > { %3818 = vst [vmem:[%s4682_s13 + $0x5a0] sm:$0xff] %v2435_v47 }
 0x840   : > { %v2547_v35 = vpop.f32.mrf.mxu2  ;;  %v2660_v32 = vpop.f32.mrf.mxu3 }
 0x841   : > { %v2661_v4 = vadd.f32 %v2660_v32, %v2547_v35  ;;  %v2324_v51 = vpop.f32.mrf.mxu0  ;;  %v2437_v62 = vpop.f32.mrf.mxu1 }
 0x842   : > { %v2438_v60 = vadd.f32 %v2437_v62, %v2324_v51 }
 0x843   : > { %3819 = vst [vmem:[%s4682_s13 + $0x5a8] sm:$0xff] %v2661_v4 }
 0x844   : > { %3820 = vst [vmem:[%s4682_s13 + $0x5b0] sm:$0xff] %v2438_v60 }
 0x848   : > { %v2550_v15 = vpop.f32.mrf.mxu2  ;;  %v2663_v28 = vpop.f32.mrf.mxu3 }
 0x849   : > { %v2664_v12 = vadd.f32 %v2663_v28, %v2550_v15  ;;  %v2327_v8 = vpop.f32.mrf.mxu0  ;;  %v2440_v31 = vpop.f32.mrf.mxu1 }
 0x84a   : > { %v2441_v53 = vadd.f32 %v2440_v31, %v2327_v8  ;;  %v2799_v40 = vpop.permute.xlu0 %2798 }
 0x84b   : > { %3821 = vst [vmem:[%s4682_s13 + $0x5b8] sm:$0xff] %v2664_v12  ;;  %v5988_v37 = vsel %vm219_vm9, %v2795_v30, %v2799_v40  ;;  %v5992_v3 = vsel %vm219_vm9, %v2799_v40, %v2795_v30 }
 0x84c   : > { %3822 = vst [vmem:[%s4682_s13 + $0x5c0] sm:$0xff] %v2441_v53 }
 0x850   : > { %v2553_v21 = vpop.f32.mrf.mxu2  ;;  %v2666_v43 = vpop.f32.mrf.mxu3 }
 0x851   : > { %v2667_v61 = vadd.f32 %v2666_v43, %v2553_v21  ;;  %v2330_v0 = vpop.f32.mrf.mxu0  ;;  %v2443_v19 = vpop.f32.mrf.mxu1 }
 0x852   : > { %v2444_v46 = vadd.f32 %v2443_v19, %v2330_v0  ;;  %v2777_v5 = vpop.permute.xlu1 %2776 }
 0x853   : > { %3823 = vst [vmem:[%s4682_s13 + $0x5c8] sm:$0xff] %v2667_v61  ;;  %v2784_v14 = vsel %vm202_vm6, %v2777_v5, %v2781_v34  ;;  %v2786_v49 = vsel %vm202_vm6, %v2781_v34, %v2777_v5  ;;  %vm6495_vm6 = vmmov %vm6493_vm4 }
 0x854   : > { %3824 = vst [vmem:[%s4682_s13 + $0x5d0] sm:$0xff] %v2444_v46  ;;  %v5950_v41 = vsel %vm4266_vm8, %v2784_v14, %v5903_v16  ;;  %v5955_v20 = vsel %vm4266_vm8, %v2786_v49, %v5898_v33  ;;  %vm6497_vm8 = vcmp.lt.s32.totalorder %v4191_v7, 48 }
 0x855   : > { %2896 = vrot.lane.b32.xlu1 %v5955_v20, %s4068_s28  ;;  %2912 = vrot.lane.b32.xlu0 %v5955_v20, %s4069_s29  ;;  %vm6498_vm9 = vmmov %vm6497_vm8  ;;  %v3021_v40 = vmul.f32 %v5955_v20, %v5472_v9 }
 0x856   : > { %2908 = vrot.lane.b32.xlu2 %v5950_v41, %s4069_s29  ;;  %vm6499_vm11 = vmmov %vm6497_vm8 }
 0x857   : > { %vm6500_vm13 = vmmov %vm6497_vm8 }
 0x858   : > { %v2556_v2 = vpop.f32.mrf.mxu2  ;;  %v2669_v42 = vpop.f32.mrf.mxu3 }
 0x859   : > { %v2670_v11 = vadd.f32 %v2669_v42, %v2556_v2  ;;  %v2333_v16 = vpop.f32.mrf.mxu0  ;;  %v2446_v1 = vpop.f32.mrf.mxu1 }
 0x85a   : > { %v2447_v52 = vadd.f32 %v2446_v1, %v2333_v16 }
 0x85b   : > { %3825 = vst [vmem:[%s4682_s13 + $0x5d8] sm:$0xff] %v2670_v11 }
 0x85c   : > { %3826 = vst [vmem:[%s4682_s13 + $0x5e0] sm:$0xff] %v2447_v52 }
 0x85d   : > { %2876 = vrot.lane.b32.xlu1 %v5950_v41, %s4070_s30  ;;  %2892 = vrot.lane.b32.xlu0 %v5950_v41, %s4068_s28 }
 0x85e   : > { %2880 = vrot.lane.b32.xlu2 %v5955_v20, %s4070_s30 }
 0x860   : > { %v2559_v44 = vpop.f32.mrf.mxu2  ;;  %v2672_v33 = vpop.f32.mrf.mxu3 }
 0x861   : > { %v2673_v58 = vadd.f32 %v2672_v33, %v2559_v44  ;;  %v2336_v59 = vpop.f32.mrf.mxu0  ;;  %v2449_v54 = vpop.f32.mrf.mxu1 }
 0x862   : > { %v2450_v26 = vadd.f32 %v2449_v54, %v2336_v59 }
 0x863   : > { %3827 = vst [vmem:[%s4682_s13 + $0x5e8] sm:$0xff] %v2673_v58 }
 0x864   : > { %3828 = vst [vmem:[%s4682_s13 + $0x5f0] sm:$0xff] %v2450_v26 }
 0x865   : > { %2848 = vrot.lane.b32.xlu1 %v5955_v20, %s4071_s2  ;;  %2864 = vrot.lane.b32.xlu0 %v5955_v20, %s4072_s3 }
 0x866   : > { %2860 = vrot.lane.b32.xlu2 %v5950_v41, %s4072_s3 }
 0x868   : > { %v2562_v57 = vpop.f32.mrf.mxu2  ;;  %v2675_v56 = vpop.f32.mrf.mxu3 }
 0x869   : > { %v2676_v18 = vadd.f32 %v2675_v56, %v2562_v57 }
 0x86b   : > { %3829 = vst [vmem:[%s4682_s13 + $0x5f8] sm:$0xff] %v2676_v18 }
 0x86d   : > { %2828 = vrot.lane.b32.xlu1 %v5950_v41, %s4073_s4  ;;  %2844 = vrot.lane.b32.xlu0 %v5950_v41, %s4071_s2 }
 0x86e   : > { %2832 = vrot.lane.b32.xlu2 %v5955_v20, %s4073_s4 }
 0x875   : > { %2914 = vrot.lane.b32.xlu1 %v5992_v3, %s4069_s29  ;;  %2910 = vrot.lane.b32.xlu0 %v5988_v37, %s4069_s29 }
 0x876   : > { %2898 = vrot.lane.b32.xlu2 %v5992_v3, %s4068_s28 }
 0x87d   : > { %2894 = vrot.lane.b32.xlu1 %v5988_v37, %s4068_s28  ;;  %2882 = vrot.lane.b32.xlu0 %v5992_v3, %s4070_s30  ;;  %s4014_s28 = scalar_lea.hbm %s6446_s1, 4096 }
 0x87e   : > { %2878 = vrot.lane.b32.xlu2 %v5988_v37, %s4070_s30  ;;  %p4016_p1 = scmp.lt.s32.totalorder %s4014_s28, %s4010_s17 }
 0x880   : > { %p4017_p3 = por %p4016_p1, %p4015_p0 }
 0x882   : > { %p4018_p4 = pnand %p4017_p3, %p4013_p13 }
 0x885   : > { %2866 = vrot.lane.b32.xlu1 %v5992_v3, %s4072_s3  ;;  %2862 = vrot.lane.b32.xlu0 %v5988_v37, %s4072_s3 }
 0x886   : > { %2850 = vrot.lane.b32.xlu2 %v5992_v3, %s4071_s2 }
 0x88d   : > { %2846 = vrot.lane.b32.xlu1 %v5988_v37, %s4071_s2  ;;  %2834 = vrot.lane.b32.xlu0 %v5992_v3, %s4073_s4 }
 0x88e   : > { %2830 = vrot.lane.b32.xlu2 %v5988_v37, %s4073_s4 }
 0x895   : > { %2818 = vrot.lane.b32.xlu1 %v5992_v3, %s4074_s5  ;;  %2814 = vrot.lane.b32.xlu0 %v5988_v37, %s4074_s5 }
 0x896   : > { %2812 = vrot.lane.b32.xlu2 %v5950_v41, %s4074_s5 }
 0x89d   : > { %2816 = vrot.lane.b32.xlu0 %v5955_v20, %s4074_s5 }
 0x8b0   : > { %v2909_v45 = vpop.permute.xlu2 %2908 }
 0x8b8   : > { %v2881_v36 = vpop.permute.xlu2 %2880 }
 0x8c0   : > { %v2861_v17 = vpop.permute.xlu2 %2860 }
 0x8c7   : > { %v2897_v13 = vpop.permute.xlu1 %2896  ;;  %v2913_v25 = vpop.permute.xlu0 %2912 }
 0x8c8   : > { %v6028_v27 = vpop.permute.xlu2 %2832  ;;  %v6046_v47 = vsel %vm6491_vm2, %v2909_v45, %v2913_v25  ;;  %v6050_v35 = vsel %vm6492_vm3, %v2913_v25, %v2909_v45  ;;  %vm6505_vm2 = vcmp.lt.s32.totalorder %v4191_v7, 80  ;;  %v3020_v7 = vmul.f32 %v5950_v41, %v5470_v23 }
 0x8c9   : > { %vm6506_vm3 = vmmov %vm6505_vm2  ;;  %v3022_v45 = vmul.f32 %v5988_v37, %v5470_v23 }
 0x8cf   : > { %v2877_v39 = vpop.permute.xlu1 %2876  ;;  %v2893_v29 = vpop.permute.xlu0 %2892 }
 0x8d0   : > { %v2899_v6 = vpop.permute.xlu2 %2898  ;;  %v6070_v30 = vsel %vm6495_vm6, %v2893_v29, %v2897_v13  ;;  %v6074_v15 = vsel %vm6496_vm7, %v2897_v13, %v2893_v29  ;;  %v6094_v8 = vsel %vm6499_vm11, %v2877_v39, %v2881_v36  ;;  %v6098_v31 = vsel %vm6500_vm13, %v2881_v36, %v2877_v39 }
 0x8d1   : > { %v3023_v36 = vmul.f32 %v5992_v3, %v5472_v9 }
 0x8d7   : > { %v6026_v22 = vpop.permute.xlu1 %2848  ;;  %v2865_v63 = vpop.permute.xlu0 %2864 }
 0x8d8   : > { %v2879_v32 = vpop.permute.xlu2 %2878 }
 0x8df   : > { %v6030_v10 = vpop.permute.xlu1 %2828  ;;  %v6032_v55 = vpop.permute.xlu0 %2844 }
 0x8e0   : > { %v2851_v0 = vpop.permute.xlu2 %2850  ;;  %v6172_v52 = vsel %vm257_vm15, %v6030_v10, %v6028_v27  ;;  %v6178_v44 = vsel %vm257_vm15, %v6028_v27, %v6030_v10 }
 0x8e7   : > { %v2915_v50 = vpop.permute.xlu1 %2914  ;;  %v2911_v24 = vpop.permute.xlu0 %2910 }
 0x8e8   : > { %v6036_v38 = vsel %vm6489_vm0, %v2911_v24, %v2915_v50  ;;  %v6040_v48 = vsel %vm6490_vm1, %v2915_v50, %v2911_v24  ;;  %vm6503_vm0 = vmmov %vm6501_vm10  ;;  %v2831_v11 = vpop.permute.xlu2 %2830 }
 0x8e9   : > { %3084 = vmatpush.msrb.mxu0 %v6036_v38  ;;  %3197 = vmatpush.msrb.mxu1 %v6040_v48  ;;  %v6118_v19 = vsel %vm6503_vm0, %v2861_v17, %v2865_v63  ;;  %vm6504_vm1 = vmmov %vm6503_vm0 }
 0x8ea   : > { %3310 = vmatpush.msrb.mxu2 %v6040_v48  ;;  %3423 = vmatpush.msrb.mxu3 %v6036_v38  ;;  %v6122_v34 = vsel %vm6504_vm1, %v2865_v63, %v2861_v17  ;;  %v3028_v17 = vmul.f32 %v6172_v52, %v5470_v23  ;;  %v3036_v24 = vmul.f32 %v6118_v19, %v5470_v23 }
 0x8eb   : > { %3085 = vmatpush.msrb.mxu0 %v6046_v47  ;;  %3198 = vmatpush.msrb.mxu1 %v6050_v35 }
 0x8ec   : > { %3311 = vmatpush.msrb.mxu2 %v6050_v35  ;;  %3424 = vmatpush.msrb.mxu3 %v6046_v47 }
 0x8ef   : > { %v2895_v4 = vpop.permute.xlu1 %2894  ;;  %v2883_v51 = vpop.permute.xlu0 %2882 }
 0x8f0   : > { %v6060_v62 = vsel %vm6493_vm4, %v2895_v4, %v2899_v6  ;;  %v6064_v60 = vsel %vm6494_vm5, %v2899_v6, %v2895_v4  ;;  %v6082_v28 = vsel %vm6497_vm8, %v2879_v32, %v2883_v51  ;;  %v6086_v12 = vsel %vm6498_vm9, %v2883_v51, %v2879_v32  ;;  %vm6507_vm4 = vmmov %vm6505_vm2  ;;  %v2813_v26 = vpop.permute.xlu2 %2812 }
 0x8f1   : > { %3086 = vmatpush.msrb.mxu0 %v6060_v62  ;;  %3199 = vmatpush.msrb.mxu1 %v6064_v60  ;;  %v6144_v2 = vsel %vm6507_vm4, %v6032_v55, %v6026_v22  ;;  %vm6508_vm5 = vmmov %vm6505_vm2  ;;  %v3037_v32 = vmul.f32 %v6122_v34, %v5472_v9 }
 0x8f2   : > { %3312 = vmatpush.msrb.mxu2 %v6064_v60  ;;  %3425 = vmatpush.msrb.mxu3 %v6060_v62  ;;  %v6150_v42 = vsel %vm6508_vm5, %v6026_v22, %v6032_v55  ;;  %v3029_v22 = vmul.f32 %v6178_v44, %v5472_v9  ;;  %v3032_v10 = vmul.f32 %v6144_v2, %v5470_v23 }
 0x8f3   : > { %3087 = vmatpush.msrb.mxu0 %v6070_v30  ;;  %3200 = vmatpush.msrb.mxu1 %v6074_v15  ;;  %v3033_v55 = vmul.f32 %v6150_v42, %v5472_v9 }
 0x8f4   : > { %3313 = vmatpush.msrb.mxu2 %v6074_v15  ;;  %3426 = vmatpush.msrb.mxu3 %v6070_v30 }
 0x8f5   : > { %3088 = vmatpush.msrb.mxu0 %v6082_v28  ;;  %3201 = vmatpush.msrb.mxu1 %v6086_v12 }
 0x8f6   : > { %3314 = vmatpush.msrb.mxu2 %v6086_v12  ;;  %3427 = vmatpush.msrb.mxu3 %v6082_v28 }
 0x8f7   : > { %v2867_v53 = vpop.permute.xlu1 %2866  ;;  %v2863_v21 = vpop.permute.xlu0 %2862  ;;  %3089 = vmatpush.msrb.mxu0 %v6094_v8  ;;  %3202 = vmatpush.msrb.mxu1 %v6098_v31 }
 0x8f8   : > { %v6106_v43 = vsel %vm6501_vm10, %v2863_v21, %v2867_v53  ;;  %v6110_v61 = vsel %vm6502_vm12, %v2867_v53, %v2863_v21  ;;  %3315 = vmatpush.msrb.mxu2 %v6098_v31  ;;  %3428 = vmatpush.msrb.mxu3 %v6094_v8  ;;  %v3040_v53 = vmul.f32 %v6094_v8, %v5470_v23 }
 0x8f9   : > { %3090 = vmatpush.msrb.mxu0 %v6106_v43  ;;  %3203 = vmatpush.msrb.mxu1 %v6110_v61  ;;  %v3038_v4 = vmul.f32 %v6106_v43, %v5470_v23  ;;  %v3039_v51 = vmul.f32 %v6110_v61, %v5472_v9  ;;  %v3041_v21 = vmul.f32 %v6098_v31, %v5472_v9 }
 0x8fa   : > { %3316 = vmatpush.msrb.mxu2 %v6110_v61  ;;  %3429 = vmatpush.msrb.mxu3 %v6106_v43 }
 0x8fb   : > { %3091 = vmatpush.msrb.mxu0 %v6118_v19  ;;  %3204 = vmatpush.msrb.mxu1 %v6122_v34 }
 0x8fc   : > { %3317 = vmatpush.msrb.mxu2 %v6122_v34  ;;  %3430 = vmatpush.msrb.mxu3 %v6118_v19 }
 0x8ff   : > { %v2847_v46 = vpop.permute.xlu1 %2846  ;;  %v2835_v5 = vpop.permute.xlu0 %2834 }
 0x900   : > { %v6132_v14 = vsel %vm6505_vm2, %v2847_v46, %v2851_v0  ;;  %v6136_v49 = vsel %vm6506_vm3, %v2851_v0, %v2847_v46  ;;  %v6158_v16 = vsel %vm257_vm15, %v2831_v11, %v2835_v5  ;;  %v6162_v1 = vsel %vm257_vm15, %v2835_v5, %v2831_v11 }
 0x901   : > { %3092 = vmatpush.msrb.mxu0 %v6132_v14  ;;  %3205 = vmatpush.msrb.mxu1 %v6136_v49  ;;  %v3030_v63 = vmul.f32 %v6158_v16, %v5470_v23  ;;  %v3031_v27 = vmul.f32 %v6162_v1, %v5472_v9  ;;  %v3034_v6 = vmul.f32 %v6132_v14, %v5470_v23 }
 0x902   : > { %3318 = vmatpush.msrb.mxu2 %v6136_v49  ;;  %3431 = vmatpush.msrb.mxu3 %v6132_v14  ;;  %v3035_v50 = vmul.f32 %v6136_v49, %v5472_v9  ;;  %v3042_v0 = vmul.f32 %v6082_v28, %v5470_v23  ;;  %v3043_v46 = vmul.f32 %v6086_v12, %v5472_v9 }
 0x903   : > { %3093 = vmatpush.msrb.mxu0 %v6144_v2  ;;  %3206 = vmatpush.msrb.mxu1 %v6150_v42  ;;  %v3044_v5 = vmul.f32 %v6070_v30, %v5470_v23  ;;  %v3045_v11 = vmul.f32 %v6074_v15, %v5472_v9 }
 0x904   : > { %3319 = vmatpush.msrb.mxu2 %v6150_v42  ;;  %3432 = vmatpush.msrb.mxu3 %v6144_v2 }
 0x905   : > { %3094 = vmatpush.msrb.mxu0 %v6158_v16  ;;  %3207 = vmatpush.msrb.mxu1 %v6162_v1 }
 0x906   : > { %3320 = vmatpush.msrb.mxu2 %v6162_v1  ;;  %3433 = vmatpush.msrb.mxu3 %v6158_v16 }
 0x907   : > { %v2819_v33 = vpop.permute.xlu1 %2818  ;;  %v2815_v58 = vpop.permute.xlu0 %2814  ;;  %3095 = vmatpush.msrb.mxu0 %v6172_v52  ;;  %3208 = vmatpush.msrb.mxu1 %v6178_v44 }
 0x908   : > { %v6186_v59 = vsel %vm240_vm14, %v2815_v58, %v2819_v33  ;;  %v6190_v54 = vsel %vm240_vm14, %v2819_v33, %v2815_v58  ;;  %3321 = vmatpush.msrb.mxu2 %v6178_v44  ;;  %3434 = vmatpush.msrb.mxu3 %v6172_v52  ;;  %v3046_v33 = vmul.f32 %v6060_v62, %v5470_v23 }
 0x909   : > { %3096 = vmatpush.msrb.mxu0 %v6186_v59  ;;  %3209 = vmatpush.msrb.mxu1 %v6190_v54  ;;  %v3026_v39 = vmul.f32 %v6186_v59, %v5470_v23  ;;  %v3027_v29 = vmul.f32 %v6190_v54, %v5472_v9  ;;  %v3047_v58 = vmul.f32 %v6064_v60, %v5472_v9 }
 0x90a   : > { %3322 = vmatpush.msrb.mxu2 %v6190_v54  ;;  %3435 = vmatpush.msrb.mxu3 %v6186_v59 }
 0x90f   : > { %v2817_v57 = vpop.permute.xlu0 %2816 }
 0x910   : > { %v6200_v56 = vsel %vm240_vm14, %v2813_v26, %v2817_v57  ;;  %v6204_v18 = vsel %vm240_vm14, %v2817_v57, %v2813_v26  ;;  %v3048_v26 = vmul.f32 %v6046_v47, %v5470_v23  ;;  %v3049_v57 = vmul.f32 %v6050_v35, %v5472_v9 }
 0x911   : > { %3097 = vmatpush.msrb.mxu0 %v6200_v56  ;;  %3210 = vmatpush.msrb.mxu1 %v6204_v18  ;;  %v3024_v13 = vmul.f32 %v6200_v56, %v5470_v23  ;;  %v3025_v25 = vmul.f32 %v6204_v18, %v5472_v9 }
 0x912   : > { %3323 = vmatpush.msrb.mxu2 %v6204_v18  ;;  %3436 = vmatpush.msrb.mxu3 %v6200_v56 }
 0x913   : > { %3098 = vmatpush.msrb.mxu0 %v5988_v37  ;;  %3211 = vmatpush.msrb.mxu1 %v5992_v3 }
 0x914   : > { %3324 = vmatpush.msrb.mxu2 %v5992_v3  ;;  %3437 = vmatpush.msrb.mxu3 %v5988_v37 }
 0x915   : > { %3099 = vmatpush.msrb.mxu0 %v5950_v41  ;;  %3212 = vmatpush.msrb.mxu1 %v5955_v20 }
 0x916   : > { %3325 = vmatpush.msrb.mxu2 %v5955_v20  ;;  %3438 = vmatpush.msrb.mxu3 %v5950_v41 }
 0x917   : > { %3100 = vmatmul.f32.vlgmr.msrb.gmra.mxu0 %v3020_v7  ;;  %3213 = vmatmul.f32.vlgmr.msrb.gmra.mxu1 %v3021_v40 }
 0x918   : > { %3326 = vmatmul.f32.vlgmr.msrb.gmra.mxu2 %v3020_v7  ;;  %3439 = vmatmul.f32.vlgmr.msrb.gmra.mxu3 %v3021_v40  ;;  %v3050_v7 = vmul.f32 %v6036_v38, %v5470_v23  ;;  %v3051_v40 = vmul.f32 %v6040_v48, %v5472_v9 }
 0x91f   : > { %3103 = vmatmul.f32.gmra.mxu0 %v3022_v45  ;;  %3216 = vmatmul.f32.gmra.mxu1 %v3023_v36 }
 0x920   : > { %3329 = vmatmul.f32.gmra.mxu2 %v3022_v45  ;;  %3442 = vmatmul.f32.gmra.mxu3 %v3023_v36 }
 0x927   : > { %3106 = vmatmul.f32.gmra.mxu0 %v3024_v13  ;;  %3219 = vmatmul.f32.gmra.mxu1 %v3025_v25 }
 0x928   : > { %3332 = vmatmul.f32.gmra.mxu2 %v3024_v13  ;;  %3445 = vmatmul.f32.gmra.mxu3 %v3025_v25  ;;  %v3052_v25 = vmul.f32 %v5955_v20, %v5470_v23  ;;  %v3055_v20 = vmul.f32 %v5988_v37, %v5472_v9  ;;  %v3057_v37 = vmul.f32 %v6200_v56, %v5472_v9 }
 0x929   : > { %v3059_v56 = vmul.f32 %v6186_v59, %v5472_v9  ;;  %v3061_v59 = vmul.f32 %v6172_v52, %v5472_v9  ;;  %v3063_v52 = vmul.f32 %v6158_v16, %v5472_v9  ;;  %v3065_v16 = vmul.f32 %v6144_v2, %v5472_v9 }
 0x92a   : > { %v3067_v2 = vmul.f32 %v6132_v14, %v5472_v9  ;;  %v3069_v14 = vmul.f32 %v6118_v19, %v5472_v9  ;;  %v3071_v19 = vmul.f32 %v6106_v43, %v5472_v9  ;;  %v3073_v43 = vmul.f32 %v6094_v8, %v5472_v9 }
 0x92b   : > { %v3075_v8 = vmul.f32 %v6082_v28, %v5472_v9  ;;  %v3077_v28 = vmul.f32 %v6070_v30, %v5472_v9  ;;  %v3079_v30 = vmul.f32 %v6060_v62, %v5472_v9  ;;  %v3081_v62 = vmul.f32 %v6046_v47, %v5472_v9 }
 0x92c   : > { %v3083_v47 = vmul.f32 %v6036_v38, %v5472_v9 }
 0x92f   : > { %3109 = vmatmul.f32.gmra.mxu0 %v3026_v39  ;;  %3222 = vmatmul.f32.gmra.mxu1 %v3027_v29 }
 0x930   : > { %3335 = vmatmul.f32.gmra.mxu2 %v3026_v39  ;;  %3448 = vmatmul.f32.gmra.mxu3 %v3027_v29  ;;  %v3053_v39 = vmul.f32 %v5950_v41, %v5472_v9 }
 0x937   : > { %3112 = vmatmul.f32.gmra.mxu0 %v3028_v17  ;;  %3225 = vmatmul.f32.gmra.mxu1 %v3029_v22 }
 0x938   : > { %3338 = vmatmul.f32.gmra.mxu2 %v3028_v17  ;;  %3451 = vmatmul.f32.gmra.mxu3 %v3029_v22 }
 0x93f   : > { %3115 = vmatmul.f32.gmra.mxu0 %v3030_v63  ;;  %3228 = vmatmul.f32.gmra.mxu1 %v3031_v27 }
 0x940   : > { %3341 = vmatmul.f32.gmra.mxu2 %v3030_v63  ;;  %3454 = vmatmul.f32.gmra.mxu3 %v3031_v27 }
 0x947   : > { %3118 = vmatmul.f32.gmra.mxu0 %v3032_v10  ;;  %3231 = vmatmul.f32.gmra.mxu1 %v3033_v55 }
 0x948   : > { %3344 = vmatmul.f32.gmra.mxu2 %v3032_v10  ;;  %3457 = vmatmul.f32.gmra.mxu3 %v3033_v55  ;;  %v3054_v55 = vmul.f32 %v5992_v3, %v5470_v23  ;;  %v3056_v3 = vmul.f32 %v6204_v18, %v5470_v23  ;;  %v3058_v18 = vmul.f32 %v6190_v54, %v5470_v23 }
 0x949   : > { %v3060_v54 = vmul.f32 %v6178_v44, %v5470_v23  ;;  %v3062_v44 = vmul.f32 %v6162_v1, %v5470_v23  ;;  %v3064_v1 = vmul.f32 %v6150_v42, %v5470_v23  ;;  %v3066_v42 = vmul.f32 %v6136_v49, %v5470_v23 }
 0x94a   : > { %v3068_v49 = vmul.f32 %v6122_v34, %v5470_v23  ;;  %v3070_v34 = vmul.f32 %v6110_v61, %v5470_v23  ;;  %v3072_v61 = vmul.f32 %v6098_v31, %v5470_v23  ;;  %v3074_v31 = vmul.f32 %v6086_v12, %v5470_v23 }
 0x94b   : > { %v3076_v12 = vmul.f32 %v6074_v15, %v5470_v23  ;;  %v3078_v15 = vmul.f32 %v6064_v60, %v5470_v23  ;;  %v3080_v60 = vmul.f32 %v6050_v35, %v5470_v23  ;;  %v3082_v35 = vmul.f32 %v6040_v48, %v5470_v23 }
 0x94f   : > { %3121 = vmatmul.f32.gmra.mxu0 %v3034_v6  ;;  %3234 = vmatmul.f32.gmra.mxu1 %v3035_v50 }
 0x950   : > { %3347 = vmatmul.f32.gmra.mxu2 %v3034_v6  ;;  %3460 = vmatmul.f32.gmra.mxu3 %v3035_v50 }
 0x957   : > { %3124 = vmatmul.f32.gmra.mxu0 %v3036_v24  ;;  %3237 = vmatmul.f32.gmra.mxu1 %v3037_v32 }
 0x958   : > { %3350 = vmatmul.f32.gmra.mxu2 %v3036_v24  ;;  %3463 = vmatmul.f32.gmra.mxu3 %v3037_v32 }
 0x95f   : > { %3127 = vmatmul.f32.gmra.mxu0 %v3038_v4  ;;  %3240 = vmatmul.f32.gmra.mxu1 %v3039_v51 }
 0x960   : > { %3353 = vmatmul.f32.gmra.mxu2 %v3038_v4  ;;  %3466 = vmatmul.f32.gmra.mxu3 %v3039_v51 }
 0x967   : > { %3130 = vmatmul.f32.gmra.mxu0 %v3040_v53  ;;  %3243 = vmatmul.f32.gmra.mxu1 %v3041_v21 }
 0x968   : > { %3356 = vmatmul.f32.gmra.mxu2 %v3040_v53  ;;  %3469 = vmatmul.f32.gmra.mxu3 %v3041_v21 }
 0x96f   : > { %3133 = vmatmul.f32.gmra.mxu0 %v3042_v0  ;;  %3246 = vmatmul.f32.gmra.mxu1 %v3043_v46 }
 0x970   : > { %3359 = vmatmul.f32.gmra.mxu2 %v3042_v0  ;;  %3472 = vmatmul.f32.gmra.mxu3 %v3043_v46 }
 0x977   : > { %3136 = vmatmul.f32.gmra.mxu0 %v3044_v5  ;;  %3249 = vmatmul.f32.gmra.mxu1 %v3045_v11 }
 0x978   : > { %3362 = vmatmul.f32.gmra.mxu2 %v3044_v5  ;;  %3475 = vmatmul.f32.gmra.mxu3 %v3045_v11 }
 0x97f   : > { %3139 = vmatmul.f32.gmra.mxu0 %v3046_v33  ;;  %3252 = vmatmul.f32.gmra.mxu1 %v3047_v58 }
 0x980   : > { %3365 = vmatmul.f32.gmra.mxu2 %v3046_v33  ;;  %3478 = vmatmul.f32.gmra.mxu3 %v3047_v58 }
 0x987   : > { %3142 = vmatmul.f32.gmra.mxu0 %v3048_v26  ;;  %3255 = vmatmul.f32.gmra.mxu1 %v3049_v57 }
 0x988   : > { %3368 = vmatmul.f32.gmra.mxu2 %v3048_v26  ;;  %3481 = vmatmul.f32.gmra.mxu3 %v3049_v57 }
 0x98f   : > { %3145 = vmatmul.f32.gmra.mxu0 %v3050_v7  ;;  %3258 = vmatmul.f32.gmra.mxu1 %v3051_v40 }
 0x990   : > { %3371 = vmatmul.f32.gmra.mxu2 %v3050_v7  ;;  %3484 = vmatmul.f32.gmra.mxu3 %v3051_v40 }
 0x994   : > { %v3101_v45 = vpop.f32.mrf.mxu0  ;;  %v3214_v36 = vpop.f32.mrf.mxu1 }
 0x995   : > { %v3215_v13 = vadd.f32 %v3214_v36, %v3101_v45 }
 0x997   : > { %3831 = vst [vmem:[%s4682_s13 + $0x600] sm:$0xff] %v3215_v13  ;;  %3148 = vmatmul.f32.gmra.mxu0 %v3052_v25  ;;  %3261 = vmatmul.f32.gmra.mxu1 %v3053_v39 }
 0x998   : > { %3374 = vmatmul.f32.gmra.mxu2 %v3052_v25  ;;  %3487 = vmatmul.f32.gmra.mxu3 %v3053_v39 }
 0x99b   : > { %v3327_v29 = vpop.f32.mrf.mxu2  ;;  %v3440_v17 = vpop.f32.mrf.mxu3 }
 0x99c   : > { %v3441_v22 = vadd.f32 %v3440_v17, %v3327_v29  ;;  %v3104_v63 = vpop.f32.mrf.mxu0  ;;  %v3217_v27 = vpop.f32.mrf.mxu1 }
 0x99d   : > { %v3218_v10 = vadd.f32 %v3217_v27, %v3104_v63 }
 0x99e   : > { %3832 = vst [vmem:[%s4682_s13 + $0x608] sm:$0xff] %v3441_v22 }
 0x99f   : > { %3833 = vst [vmem:[%s4682_s13 + $0x610] sm:$0xff] %v3218_v10  ;;  %3151 = vmatmul.f32.gmra.mxu0 %v3054_v55  ;;  %3264 = vmatmul.f32.gmra.mxu1 %v3055_v20 }
 0x9a0   : > { %3377 = vmatmul.f32.gmra.mxu2 %v3054_v55  ;;  %3490 = vmatmul.f32.gmra.mxu3 %v3055_v20 }
 0x9a3   : > { %v3330_v41 = vpop.f32.mrf.mxu2  ;;  %v3443_v6 = vpop.f32.mrf.mxu3 }
 0x9a4   : > { %v3444_v50 = vadd.f32 %v3443_v6, %v3330_v41  ;;  %v3107_v24 = vpop.f32.mrf.mxu0  ;;  %v3220_v32 = vpop.f32.mrf.mxu1 }
 0x9a5   : > { %v3221_v4 = vadd.f32 %v3220_v32, %v3107_v24 }
 0x9a6   : > { %3834 = vst [vmem:[%s4682_s13 + $0x618] sm:$0xff] %v3444_v50 }
 0x9a7   : > { %3835 = vst [vmem:[%s4682_s13 + $0x620] sm:$0xff] %v3221_v4  ;;  %3154 = vmatmul.f32.gmra.mxu0 %v3056_v3  ;;  %3267 = vmatmul.f32.gmra.mxu1 %v3057_v37 }
 0x9a8   : > { %3380 = vmatmul.f32.gmra.mxu2 %v3056_v3  ;;  %3493 = vmatmul.f32.gmra.mxu3 %v3057_v37 }
 0x9ab   : > { %v3333_v51 = vpop.f32.mrf.mxu2  ;;  %v3446_v53 = vpop.f32.mrf.mxu3 }
 0x9ac   : > { %v3447_v21 = vadd.f32 %v3446_v53, %v3333_v51  ;;  %v3110_v0 = vpop.f32.mrf.mxu0  ;;  %v3223_v46 = vpop.f32.mrf.mxu1 }
 0x9ad   : > { %v3224_v5 = vadd.f32 %v3223_v46, %v3110_v0 }
 0x9ae   : > { %3836 = vst [vmem:[%s4682_s13 + $0x628] sm:$0xff] %v3447_v21 }
 0x9af   : > { %3837 = vst [vmem:[%s4682_s13 + $0x630] sm:$0xff] %v3224_v5  ;;  %3157 = vmatmul.f32.gmra.mxu0 %v3058_v18  ;;  %3270 = vmatmul.f32.gmra.mxu1 %v3059_v56 }
 0x9b0   : > { %3383 = vmatmul.f32.gmra.mxu2 %v3058_v18  ;;  %3496 = vmatmul.f32.gmra.mxu3 %v3059_v56 }
 0x9b3   : > { %v3336_v11 = vpop.f32.mrf.mxu2  ;;  %v3449_v33 = vpop.f32.mrf.mxu3 }
 0x9b4   : > { %v3450_v58 = vadd.f32 %v3449_v33, %v3336_v11  ;;  %v3113_v26 = vpop.f32.mrf.mxu0  ;;  %v3226_v57 = vpop.f32.mrf.mxu1 }
 0x9b5   : > { %v3227_v7 = vadd.f32 %v3226_v57, %v3113_v26 }
 0x9b6   : > { %3838 = vst [vmem:[%s4682_s13 + $0x638] sm:$0xff] %v3450_v58 }
 0x9b7   : > { %3839 = vst [vmem:[%s4682_s13 + $0x640] sm:$0xff] %v3227_v7  ;;  %3160 = vmatmul.f32.gmra.mxu0 %v3060_v54  ;;  %3273 = vmatmul.f32.gmra.mxu1 %v3061_v59 }
 0x9b8   : > { %3386 = vmatmul.f32.gmra.mxu2 %v3060_v54  ;;  %3499 = vmatmul.f32.gmra.mxu3 %v3061_v59 }
 0x9bb   : > { %v3339_v40 = vpop.f32.mrf.mxu2  ;;  %v3452_v45 = vpop.f32.mrf.mxu3 }
 0x9bc   : > { %v3453_v36 = vadd.f32 %v3452_v45, %v3339_v40  ;;  %v3116_v13 = vpop.f32.mrf.mxu0  ;;  %v3229_v25 = vpop.f32.mrf.mxu1 }
 0x9bd   : > { %v3230_v39 = vadd.f32 %v3229_v25, %v3116_v13 }
 0x9be   : > { %3840 = vst [vmem:[%s4682_s13 + $0x648] sm:$0xff] %v3453_v36 }
 0x9bf   : > { %3841 = vst [vmem:[%s4682_s13 + $0x650] sm:$0xff] %v3230_v39  ;;  %3163 = vmatmul.f32.gmra.mxu0 %v3062_v44  ;;  %3276 = vmatmul.f32.gmra.mxu1 %v3063_v52 }
 0x9c0   : > { %3389 = vmatmul.f32.gmra.mxu2 %v3062_v44  ;;  %3502 = vmatmul.f32.gmra.mxu3 %v3063_v52 }
 0x9c3   : > { %v3342_v29 = vpop.f32.mrf.mxu2  ;;  %v3455_v17 = vpop.f32.mrf.mxu3 }
 0x9c4   : > { %v3456_v22 = vadd.f32 %v3455_v17, %v3342_v29  ;;  %v3119_v63 = vpop.f32.mrf.mxu0  ;;  %v3232_v27 = vpop.f32.mrf.mxu1 }
 0x9c5   : > { %v3233_v10 = vadd.f32 %v3232_v27, %v3119_v63 }
 0x9c6   : > { %3842 = vst [vmem:[%s4682_s13 + $0x658] sm:$0xff] %v3456_v22 }
 0x9c7   : > { %3843 = vst [vmem:[%s4682_s13 + $0x660] sm:$0xff] %v3233_v10  ;;  %3166 = vmatmul.f32.gmra.mxu0 %v3064_v1  ;;  %3279 = vmatmul.f32.gmra.mxu1 %v3065_v16 }
 0x9c8   : > { %3392 = vmatmul.f32.gmra.mxu2 %v3064_v1  ;;  %3505 = vmatmul.f32.gmra.mxu3 %v3065_v16 }
 0x9cb   : > { %v3345_v55 = vpop.f32.mrf.mxu2  ;;  %v3458_v20 = vpop.f32.mrf.mxu3 }
 0x9cc   : > { %v3459_v41 = vadd.f32 %v3458_v20, %v3345_v55  ;;  %v3122_v6 = vpop.f32.mrf.mxu0  ;;  %v3235_v50 = vpop.f32.mrf.mxu1 }
 0x9cd   : > { %v3236_v24 = vadd.f32 %v3235_v50, %v3122_v6 }
 0x9ce   : > { %3844 = vst [vmem:[%s4682_s13 + $0x668] sm:$0xff] %v3459_v41 }
 0x9cf   : > { %3845 = vst [vmem:[%s4682_s13 + $0x670] sm:$0xff] %v3236_v24  ;;  %3169 = vmatmul.f32.gmra.mxu0 %v3066_v42  ;;  %3282 = vmatmul.f32.gmra.mxu1 %v3067_v2 }
 0x9d0   : > { %3395 = vmatmul.f32.gmra.mxu2 %v3066_v42  ;;  %3508 = vmatmul.f32.gmra.mxu3 %v3067_v2 }
 0x9d3   : > { %v3348_v32 = vpop.f32.mrf.mxu2  ;;  %v3461_v4 = vpop.f32.mrf.mxu3 }
 0x9d4   : > { %v3462_v3 = vadd.f32 %v3461_v4, %v3348_v32  ;;  %v3125_v37 = vpop.f32.mrf.mxu0  ;;  %v3238_v51 = vpop.f32.mrf.mxu1 }
 0x9d5   : > { %v3239_v53 = vadd.f32 %v3238_v51, %v3125_v37 }
 0x9d6   : > { %3846 = vst [vmem:[%s4682_s13 + $0x678] sm:$0xff] %v3462_v3 }
 0x9d7   : > { %3847 = vst [vmem:[%s4682_s13 + $0x680] sm:$0xff] %v3239_v53  ;;  %3172 = vmatmul.f32.gmra.mxu0 %v3068_v49  ;;  %3285 = vmatmul.f32.gmra.mxu1 %v3069_v14 }
 0x9d8   : > { %3398 = vmatmul.f32.gmra.mxu2 %v3068_v49  ;;  %3511 = vmatmul.f32.gmra.mxu3 %v3069_v14 }
 0x9db   : > { %v3351_v21 = vpop.f32.mrf.mxu2  ;;  %v3464_v0 = vpop.f32.mrf.mxu3 }
 0x9dc   : > { %v3465_v46 = vadd.f32 %v3464_v0, %v3351_v21  ;;  %v3128_v5 = vpop.f32.mrf.mxu0  ;;  %v3241_v18 = vpop.f32.mrf.mxu1 }
 0x9dd   : > { %v3242_v56 = vadd.f32 %v3241_v18, %v3128_v5 }
 0x9de   : > { %3848 = vst [vmem:[%s4682_s13 + $0x688] sm:$0xff] %v3465_v46 }
 0x9df   : > { %3849 = vst [vmem:[%s4682_s13 + $0x690] sm:$0xff] %v3242_v56  ;;  %3175 = vmatmul.f32.gmra.mxu0 %v3070_v34  ;;  %3288 = vmatmul.f32.gmra.mxu1 %v3071_v19 }
 0x9e0   : > { %3401 = vmatmul.f32.gmra.mxu2 %v3070_v34  ;;  %3514 = vmatmul.f32.gmra.mxu3 %v3071_v19 }
 0x9e3   : > { %v3354_v11 = vpop.f32.mrf.mxu2  ;;  %v3467_v33 = vpop.f32.mrf.mxu3 }
 0x9e4   : > { %v3468_v58 = vadd.f32 %v3467_v33, %v3354_v11  ;;  %v3131_v26 = vpop.f32.mrf.mxu0  ;;  %v3244_v57 = vpop.f32.mrf.mxu1 }
 0x9e5   : > { %v3245_v7 = vadd.f32 %v3244_v57, %v3131_v26 }
 0x9e6   : > { %3850 = vst [vmem:[%s4682_s13 + $0x698] sm:$0xff] %v3468_v58 }
 0x9e7   : > { %3851 = vst [vmem:[%s4682_s13 + $0x6a0] sm:$0xff] %v3245_v7  ;;  %3178 = vmatmul.f32.gmra.mxu0 %v3072_v61  ;;  %3291 = vmatmul.f32.gmra.mxu1 %v3073_v43 }
 0x9e8   : > { %3404 = vmatmul.f32.gmra.mxu2 %v3072_v61  ;;  %3517 = vmatmul.f32.gmra.mxu3 %v3073_v43 }
 0x9eb   : > { %v3357_v54 = vpop.f32.mrf.mxu2  ;;  %v3470_v59 = vpop.f32.mrf.mxu3 }
 0x9ec   : > { %v3471_v40 = vadd.f32 %v3470_v59, %v3357_v54  ;;  %v3134_v45 = vpop.f32.mrf.mxu0  ;;  %v3247_v36 = vpop.f32.mrf.mxu1 }
 0x9ed   : > { %v3248_v13 = vadd.f32 %v3247_v36, %v3134_v45 }
 0x9ee   : > { %3852 = vst [vmem:[%s4682_s13 + $0x6a8] sm:$0xff] %v3471_v40 }
 0x9ef   : > { %3853 = vst [vmem:[%s4682_s13 + $0x6b0] sm:$0xff] %v3248_v13  ;;  %3181 = vmatmul.f32.gmra.mxu0 %v3074_v31  ;;  %3294 = vmatmul.f32.gmra.mxu1 %v3075_v8 }
 0x9f0   : > { %3407 = vmatmul.f32.gmra.mxu2 %v3074_v31  ;;  %3520 = vmatmul.f32.gmra.mxu3 %v3075_v8 }
 0x9f3   : > { %v3360_v25 = vpop.f32.mrf.mxu2  ;;  %v3473_v39 = vpop.f32.mrf.mxu3 }
 0x9f4   : > { %v3474_v44 = vadd.f32 %v3473_v39, %v3360_v25  ;;  %v3137_v52 = vpop.f32.mrf.mxu0  ;;  %v3250_v29 = vpop.f32.mrf.mxu1 }
 0x9f5   : > { %v3251_v17 = vadd.f32 %v3250_v29, %v3137_v52 }
 0x9f6   : > { %3854 = vst [vmem:[%s4682_s13 + $0x6b8] sm:$0xff] %v3474_v44 }
 0x9f7   : > { %3855 = vst [vmem:[%s4682_s13 + $0x6c0] sm:$0xff] %v3251_v17  ;;  %3184 = vmatmul.f32.gmra.mxu0 %v3076_v12  ;;  %3297 = vmatmul.f32.gmra.mxu1 %v3077_v28 }
 0x9f8   : > { %3410 = vmatmul.f32.gmra.mxu2 %v3076_v12  ;;  %3523 = vmatmul.f32.gmra.mxu3 %v3077_v28 }
 0x9fb   : > { %v3363_v22 = vpop.f32.mrf.mxu2  ;;  %v3476_v63 = vpop.f32.mrf.mxu3 }
 0x9fc   : > { %v3477_v27 = vadd.f32 %v3476_v63, %v3363_v22  ;;  %v3140_v10 = vpop.f32.mrf.mxu0  ;;  %v3253_v1 = vpop.f32.mrf.mxu1 }
 0x9fd   : > { %v3254_v16 = vadd.f32 %v3253_v1, %v3140_v10 }
 0x9fe   : > { %3856 = vst [vmem:[%s4682_s13 + $0x6c8] sm:$0xff] %v3477_v27 }
 0x9ff   : > { %3857 = vst [vmem:[%s4682_s13 + $0x6d0] sm:$0xff] %v3254_v16  ;;  %3187 = vmatmul.f32.gmra.mxu0 %v3078_v15  ;;  %3300 = vmatmul.f32.gmra.mxu1 %v3079_v30 }
 0xa00   : > { %3413 = vmatmul.f32.gmra.mxu2 %v3078_v15  ;;  %3526 = vmatmul.f32.gmra.mxu3 %v3079_v30 }
 0xa03   : > { %v3366_v55 = vpop.f32.mrf.mxu2  ;;  %v3479_v20 = vpop.f32.mrf.mxu3 }
 0xa04   : > { %v3480_v41 = vadd.f32 %v3479_v20, %v3366_v55  ;;  %v3143_v6 = vpop.f32.mrf.mxu0  ;;  %v3256_v50 = vpop.f32.mrf.mxu1 }
 0xa05   : > { %v3257_v24 = vadd.f32 %v3256_v50, %v3143_v6 }
 0xa06   : > { %3858 = vst [vmem:[%s4682_s13 + $0x6d8] sm:$0xff] %v3480_v41 }
 0xa07   : > { %3859 = vst [vmem:[%s4682_s13 + $0x6e0] sm:$0xff] %v3257_v24  ;;  %3190 = vmatmul.f32.gmra.mxu0 %v3080_v60  ;;  %3303 = vmatmul.f32.gmra.mxu1 %v3081_v62 }
 0xa08   : > { %3416 = vmatmul.f32.gmra.mxu2 %v3080_v60  ;;  %3529 = vmatmul.f32.gmra.mxu3 %v3081_v62 }
 0xa0b   : > { %v3369_v42 = vpop.f32.mrf.mxu2  ;;  %v3482_v2 = vpop.f32.mrf.mxu3 }
 0xa0c   : > { %v3483_v32 = vadd.f32 %v3482_v2, %v3369_v42  ;;  %v3146_v4 = vpop.f32.mrf.mxu0  ;;  %v3259_v3 = vpop.f32.mrf.mxu1 }
 0xa0d   : > { %v3260_v37 = vadd.f32 %v3259_v3, %v3146_v4 }
 0xa0e   : > { %3860 = vst [vmem:[%s4682_s13 + $0x6e8] sm:$0xff] %v3483_v32 }
 0xa0f   : > { %3861 = vst [vmem:[%s4682_s13 + $0x6f0] sm:$0xff] %v3260_v37  ;;  %3193 = vmatmul.f32.gmra.mxu0 %v3082_v35  ;;  %3306 = vmatmul.f32.gmra.mxu1 %v3083_v47 }
 0xa10   : > { %3419 = vmatmul.f32.gmra.mxu2 %v3082_v35  ;;  %3532 = vmatmul.f32.gmra.mxu3 %v3083_v47 }
 0xa13   : > { %v3372_v51 = vpop.f32.mrf.mxu2  ;;  %v3485_v53 = vpop.f32.mrf.mxu3 }
 0xa14   : > { %v3486_v49 = vadd.f32 %v3485_v53, %v3372_v51  ;;  %v3149_v14 = vpop.f32.mrf.mxu0  ;;  %v3262_v21 = vpop.f32.mrf.mxu1 }
 0xa15   : > { %v3263_v0 = vadd.f32 %v3262_v21, %v3149_v14 }
 0xa16   : > { %3862 = vst [vmem:[%s4682_s13 + $0x6f8] sm:$0xff] %v3486_v49 }
 0xa17   : > { %3863 = vst [vmem:[%s4682_s13 + $0x700] sm:$0xff] %v3263_v0 }
 0xa1b   : > { %v3375_v23 = vpop.f32.mrf.mxu2  ;;  %v3488_v9 = vpop.f32.mrf.mxu3 }
 0xa1c   : > { %v3489_v38 = vadd.f32 %v3488_v9, %v3375_v23  ;;  %v3152_v48 = vpop.f32.mrf.mxu0  ;;  %v3265_v46 = vpop.f32.mrf.mxu1 }
 0xa1d   : > { %v3266_v5 = vadd.f32 %v3265_v46, %v3152_v48 }
 0xa1e   : > { %3864 = vst [vmem:[%s4682_s13 + $0x708] sm:$0xff] %v3489_v38 }
 0xa1f   : > { %3865 = vst [vmem:[%s4682_s13 + $0x710] sm:$0xff] %v3266_v5 }
 0xa23   : > { %v3378_v18 = vpop.f32.mrf.mxu2  ;;  %v3491_v56 = vpop.f32.mrf.mxu3 }
 0xa24   : > { %v3492_v34 = vadd.f32 %v3491_v56, %v3378_v18  ;;  %v3155_v19 = vpop.f32.mrf.mxu0  ;;  %v3268_v11 = vpop.f32.mrf.mxu1 }
 0xa25   : > { %v3269_v33 = vadd.f32 %v3268_v11, %v3155_v19 }
 0xa26   : > { %3866 = vst [vmem:[%s4682_s13 + $0x718] sm:$0xff] %v3492_v34 }
 0xa27   : > { %3867 = vst [vmem:[%s4682_s13 + $0x720] sm:$0xff] %v3269_v33 }
 0xa2b   : > { %v3381_v58 = vpop.f32.mrf.mxu2  ;;  %v3494_v26 = vpop.f32.mrf.mxu3 }
 0xa2c   : > { %v3495_v57 = vadd.f32 %v3494_v26, %v3381_v58  ;;  %v3158_v7 = vpop.f32.mrf.mxu0  ;;  %v3271_v61 = vpop.f32.mrf.mxu1 }
 0xa2d   : > { %v3272_v43 = vadd.f32 %v3271_v61, %v3158_v7 }
 0xa2e   : > { %3868 = vst [vmem:[%s4682_s13 + $0x728] sm:$0xff] %v3495_v57 }
 0xa2f   : > { %3869 = vst [vmem:[%s4682_s13 + $0x730] sm:$0xff] %v3272_v43 }
 0xa33   : > { %v3384_v54 = vpop.f32.mrf.mxu2  ;;  %v3497_v59 = vpop.f32.mrf.mxu3 }
 0xa34   : > { %v3498_v40 = vadd.f32 %v3497_v59, %v3384_v54  ;;  %v3161_v45 = vpop.f32.mrf.mxu0  ;;  %v3274_v36 = vpop.f32.mrf.mxu1 }
 0xa35   : > { %v3275_v13 = vadd.f32 %v3274_v36, %v3161_v45 }
 0xa36   : > { %3870 = vst [vmem:[%s4682_s13 + $0x738] sm:$0xff] %v3498_v40 }
 0xa37   : > { %3871 = vst [vmem:[%s4682_s13 + $0x740] sm:$0xff] %v3275_v13 }
 0xa3b   : > { %v3387_v31 = vpop.f32.mrf.mxu2  ;;  %v3500_v8 = vpop.f32.mrf.mxu3 }
 0xa3c   : > { %v3501_v25 = vadd.f32 %v3500_v8, %v3387_v31  ;;  %v3164_v39 = vpop.f32.mrf.mxu0  ;;  %v3277_v44 = vpop.f32.mrf.mxu1 }
 0xa3d   : > { %v3278_v52 = vadd.f32 %v3277_v44, %v3164_v39 }
 0xa3e   : > { %3872 = vst [vmem:[%s4682_s13 + $0x748] sm:$0xff] %v3501_v25 }
 0xa3f   : > { %3873 = vst [vmem:[%s4682_s13 + $0x750] sm:$0xff] %v3278_v52 }
 0xa43   : > { %v3390_v29 = vpop.f32.mrf.mxu2  ;;  %v3503_v17 = vpop.f32.mrf.mxu3 }
 0xa44   : > { %v3504_v12 = vadd.f32 %v3503_v17, %v3390_v29  ;;  %v3167_v28 = vpop.f32.mrf.mxu0  ;;  %v3280_v22 = vpop.f32.mrf.mxu1 }
 0xa45   : > { %v3281_v63 = vadd.f32 %v3280_v22, %v3167_v28 }
 0xa46   : > { %3874 = vst [vmem:[%s4682_s13 + $0x758] sm:$0xff] %v3504_v12 }
 0xa47   : > { %3875 = vst [vmem:[%s4682_s13 + $0x760] sm:$0xff] %v3281_v63 }
 0xa4b   : > { %v3393_v27 = vpop.f32.mrf.mxu2  ;;  %v3506_v10 = vpop.f32.mrf.mxu3 }
 0xa4c   : > { %v3507_v1 = vadd.f32 %v3506_v10, %v3393_v27  ;;  %v3170_v16 = vpop.f32.mrf.mxu0  ;;  %v3283_v15 = vpop.f32.mrf.mxu1 }
 0xa4d   : > { %v3284_v30 = vadd.f32 %v3283_v15, %v3170_v16 }
 0xa4e   : > { %3876 = vst [vmem:[%s4682_s13 + $0x768] sm:$0xff] %v3507_v1 }
 0xa4f   : > { %3877 = vst [vmem:[%s4682_s13 + $0x770] sm:$0xff] %v3284_v30 }
 0xa53   : > { %v3396_v55 = vpop.f32.mrf.mxu2  ;;  %v3509_v20 = vpop.f32.mrf.mxu3 }
 0xa54   : > { %v3510_v41 = vadd.f32 %v3509_v20, %v3396_v55  ;;  %v3173_v6 = vpop.f32.mrf.mxu0  ;;  %v3286_v50 = vpop.f32.mrf.mxu1 }
 0xa55   : > { %v3287_v24 = vadd.f32 %v3286_v50, %v3173_v6 }
 0xa56   : > { %3878 = vst [vmem:[%s4682_s13 + $0x778] sm:$0xff] %v3510_v41 }
 0xa57   : > { %3879 = vst [vmem:[%s4682_s13 + $0x780] sm:$0xff] %v3287_v24 }
 0xa5b   : > { %v3399_v60 = vpop.f32.mrf.mxu2  ;;  %v3512_v62 = vpop.f32.mrf.mxu3 }
 0xa5c   : > { %v3513_v42 = vadd.f32 %v3512_v62, %v3399_v60  ;;  %v3176_v2 = vpop.f32.mrf.mxu0  ;;  %v3289_v32 = vpop.f32.mrf.mxu1 }
 0xa5d   : > { %v3290_v4 = vadd.f32 %v3289_v32, %v3176_v2 }
 0xa5e   : > { %3880 = vst [vmem:[%s4682_s13 + $0x788] sm:$0xff] %v3513_v42 }
 0xa5f   : > { %3881 = vst [vmem:[%s4682_s13 + $0x790] sm:$0xff] %v3290_v4 }
 0xa63   : > { %v3402_v3 = vpop.f32.mrf.mxu2  ;;  %v3515_v37 = vpop.f32.mrf.mxu3 }
 0xa64   : > { %v3516_v35 = vadd.f32 %v3515_v37, %v3402_v3  ;;  %v3179_v47 = vpop.f32.mrf.mxu0  ;;  %v3292_v51 = vpop.f32.mrf.mxu1 }
 0xa65   : > { %v3293_v53 = vadd.f32 %v3292_v51, %v3179_v47 }
 0xa66   : > { %3882 = vst [vmem:[%s4682_s13 + $0x798] sm:$0xff] %v3516_v35 }
 0xa67   : > { %3883 = vst [vmem:[%s4682_s13 + $0x7a0] sm:$0xff] %v3293_v53 }
 0xa6b   : > { %v3405_v49 = vpop.f32.mrf.mxu2  ;;  %v3518_v14 = vpop.f32.mrf.mxu3 }
 0xa6c   : > { %v3519_v21 = vadd.f32 %v3518_v14, %v3405_v49  ;;  %v3182_v0 = vpop.f32.mrf.mxu0  ;;  %v3295_v23 = vpop.f32.mrf.mxu1 }
 0xa6d   : > { %v3296_v9 = vadd.f32 %v3295_v23, %v3182_v0 }
 0xa6e   : > { %3884 = vst [vmem:[%s4682_s13 + $0x7a8] sm:$0xff] %v3519_v21 }
 0xa6f   : > { %3885 = vst [vmem:[%s4682_s13 + $0x7b0] sm:$0xff] %v3296_v9 }
 0xa73   : > { %v3408_v38 = vpop.f32.mrf.mxu2  ;;  %v3521_v48 = vpop.f32.mrf.mxu3 }
 0xa74   : > { %v3522_v46 = vadd.f32 %v3521_v48, %v3408_v38  ;;  %v3185_v5 = vpop.f32.mrf.mxu0  ;;  %v3298_v18 = vpop.f32.mrf.mxu1 }
 0xa75   : > { %v3299_v56 = vadd.f32 %v3298_v18, %v3185_v5 }
 0xa76   : > { %3886 = vst [vmem:[%s4682_s13 + $0x7b8] sm:$0xff] %v3522_v46 }
 0xa77   : > { %3887 = vst [vmem:[%s4682_s13 + $0x7c0] sm:$0xff] %v3299_v56 }
 0xa7b   : > { %v3411_v34 = vpop.f32.mrf.mxu2  ;;  %v3524_v19 = vpop.f32.mrf.mxu3 }
 0xa7c   : > { %v3525_v11 = vadd.f32 %v3524_v19, %v3411_v34  ;;  %v3188_v33 = vpop.f32.mrf.mxu0  ;;  %v3301_v58 = vpop.f32.mrf.mxu1 }
 0xa7d   : > { %v3302_v26 = vadd.f32 %v3301_v58, %v3188_v33 }
 0xa7e   : > { %3888 = vst [vmem:[%s4682_s13 + $0x7c8] sm:$0xff] %v3525_v11 }
 0xa7f   : > { %3889 = vst [vmem:[%s4682_s13 + $0x7d0] sm:$0xff] %v3302_v26 }
 0xa83   : > { %v3414_v57 = vpop.f32.mrf.mxu2  ;;  %v3527_v7 = vpop.f32.mrf.mxu3 }
 0xa84   : > { %v3528_v61 = vadd.f32 %v3527_v7, %v3414_v57  ;;  %v3191_v43 = vpop.f32.mrf.mxu0  ;;  %v3304_v54 = vpop.f32.mrf.mxu1 }
 0xa85   : > { %v3305_v59 = vadd.f32 %v3304_v54, %v3191_v43 }
 0xa86   : > { %3890 = vst [vmem:[%s4682_s13 + $0x7d8] sm:$0xff] %v3528_v61 }
 0xa87   : > { %3891 = vst [vmem:[%s4682_s13 + $0x7e0] sm:$0xff] %v3305_v59 }
 0xa8b   : > { %v3417_v40 = vpop.f32.mrf.mxu2  ;;  %v3530_v45 = vpop.f32.mrf.mxu3 }
 0xa8c   : > { %v3531_v36 = vadd.f32 %v3530_v45, %v3417_v40  ;;  %v3194_v13 = vpop.f32.mrf.mxu0  ;;  %v3307_v31 = vpop.f32.mrf.mxu1 }
 0xa8d   : > { %v3308_v8 = vadd.f32 %v3307_v31, %v3194_v13 }
 0xa8e   : > { %3892 = vst [vmem:[%s4682_s13 + $0x7e8] sm:$0xff] %v3531_v36 }
 0xa8f   : > { %3893 = vst [vmem:[%s4682_s13 + $0x7f0] sm:$0xff] %v3308_v8 }
 0xa93   : > { %v3420_v25 = vpop.f32.mrf.mxu2  ;;  %v3533_v39 = vpop.f32.mrf.mxu3 }
 0xa94   : > { %v3534_v44 = vadd.f32 %v3533_v39, %v3420_v25 }
 0xa96   : > { %3894 = vst [vmem:[%s4682_s13 + $0x7f8] sm:$0xff] %v3534_v44 }
 0xa97   : > { %4021 = shalt.err (!%p4018_p4)
}
 0xa98   : > { %s4075_s21 = smov 256  }
 0xa99   : > { %3906 = dma.vmem_to_hbm [thread:$0]  (%p4136_p11), %s3616_s23, 32768, %s3618_s24, %s3602_s10, %s4075_s21, %s4075_s21, %s4069_s29  }
 0xa9a PF: > { %s3632_s3 = sand.u32 1, %s4048_s6   ;;  %p6509_p7 = scmp.ge.s32.totalorder %s4060_s9, 2 }
 0xa9b   : > { %s3633_s4 = scalar_lea.sflag [#allocation5], %s3632_s3 }
 0xa9c   : > { %p3913_p5 = pnand %p6509_p7, %p4140_p12 }
 0xa9e   : > { %p3914_p8 = pneg %p3913_p5 }
 0xaa0   : > { %4043 = dma.done.wait (%p3914_p8), %s3633_s4, 32768  }
 0xaa1   : > { %4045 = vsyncadd (%p3914_p8), %s3633_s4, 4294934528  ;;  %p14_p10 = scmp.ge.s32.totalorder %s4111_s12, 4   ;;  %s6510_s6 = smov %s4052_s7 }
 0xaa2   : > { %s6511_s7 = smov %s4056_s8  ;;  %s6512_s8 = smov %s4123_s15 }
 0xaa3   : > { %s6513_s9 = smov %s4111_s12  ;;  %16 = sbr.rel (!%p14_p10) target bundleno = 5 (0x5), region = 75 }
 0xaa8   :  { %3639 = vsyncpa [#allocation4], 1 }
 0xaa9   :  { %3641 = vsyncpa [#allocation4 + $0x1], 1 }
 0xaaa   :  { %3642 = vsyncpa [#allocation5], 1 }
 0xaab   :  { %3644 = vsyncpa [#allocation5 + $0x1], 1 }

</bundles_post_ra>
